<compile_context>
chip_gen: v6e
topology: v6e:2x2x1
jax: 0.10.0
libtpu: 0.0.40
codegen_flags: <defaults>
</compile_context>

<pallas_src>
import jax
import jax.numpy as jnp
from jax.experimental import pallas as pl
from jax.experimental.pallas import tpu as pltpu

IN_DIM = 2
H_DIM = 400      # logical hidden width (matches PyTorch h_dim)
H_PAD = 512      # padded to a multiple of 128 lanes
MAX_TB = 2048    # max batch rows per grid step (VMEM-safe on all generations)


def _cdiv(a, b):
    return -(-a // b)


def _round_up(n, m):
    return ((n + m - 1) // m) * m


def _choose_tiles(B):
    """Pick (tb, n_tiles): tb a multiple of 128 (lane-dense epilogue), balanced
    tiles (no padding up to a full MAX_TB tile), and >= 2 grid steps whenever
    the batch allows it so both v7x TensorCores stay busy."""
    n_tiles = _cdiv(B, MAX_TB)
    if B > 128:
        n_tiles = max(n_tiles, 2)
    tb = min(MAX_TB, _round_up(_cdiv(B, n_tiles), 128))
    n_tiles = _cdiv(B, tb)          # re-derive after rounding the tile size
    return tb, n_tiles


def _disc_kernel(x_ref, w1_ref, b1_ref, w2_ref, b2_ref, w3_ref, b3_ref,
                 w4_ref, b4_ref, o_ref):
    # ---- Layer 1: Linear(2 -> H) + ReLU on the VPU (K=2 would waste the MXU).
    x = x_ref[...]                       # (TB, 2)  f32
    w1 = w1_ref[...]                     # (2, H_PAD) f32
    h = x[:, 0:1] * w1[0:1, :] + x[:, 1:2] * w1[1:2, :] + b1_ref[...]
    h = jnp.maximum(h, 0.0)              # (TB, H_PAD) f32

    # ---- Layers 2 & 3: Linear(H -> H) + ReLU on the MXU, bf16 in / f32 acc.
    h = jnp.dot(h.astype(jnp.bfloat16), w2_ref[...],
                preferred_element_type=jnp.float32)
    h = jnp.maximum(h + b2_ref[...], 0.0)

    h = jnp.dot(h.astype(jnp.bfloat16), w3_ref[...],
                preferred_element_type=jnp.float32)
    h = jnp.maximum(h + b3_ref[...], 0.0)

    # ---- Layer 4: Linear(H -> 1) as multiply + lane reduction (an N=1 MXU
    # pass would use 1 of 128 result lanes).  The (TB, H) activations are
    # viewed as (TB//128, 128, H) -- a free split of the sublane-major dim --
    # so the reduced logits come out as a lane-dense (TB//128, 128) slab and
    # the sigmoid / store epilogue runs on fully occupied vregs.
    tb, hp = h.shape
    r = tb // 128
    h3 = h.reshape(r, 128, hp)
    logit = jnp.sum(h3 * w4_ref[...], axis=-1) + b4_ref[...]   # (r, 128) f32
    # sigmoid(x) = 0.5*tanh(0.5*x)+0.5: single EUP transcendental, no overflow.
    out = 0.5 * jnp.tanh(0.5 * logit) + 0.5
    o_ref[...] = out.reshape(o_ref.shape)                       # (1, r, 128)


def discriminator_forward(x, kp):
    """x: (B, 2) float32; kp: packed params (see pack_params). Returns (B,)."""
    B = x.shape[0]
    tb, n_tiles = _choose_tiles(B)
    assert tb % 128 == 0
    b_pad = n_tiles * tb
    if b_pad != B:
        x = jnp.pad(x, ((0, b_pad - B), (0, 0)))
    r = tb // 128

    def resident(shape):
        # Whole-array block, constant index -> stays in VMEM across the grid.
        return pl.BlockSpec(shape, lambda i: (0, 0))

    out = pl.pallas_call(
        _disc_kernel,
        out_shape=jax.ShapeDtypeStruct((n_tiles, r, 128), jnp.float32),
        grid=(n_tiles,),
        in_specs=[
            pl.BlockSpec((tb, IN_DIM), lambda i: (i, 0)),   # x: tiled over batch
            resident((IN_DIM, H_PAD)),                      # w1 (f32)
            resident((1, H_PAD)),                           # b1
            resident((H_PAD, H_PAD)),                       # w2 (bf16)
            resident((1, H_PAD)),                           # b2
            resident((H_PAD, H_PAD)),                       # w3 (bf16)
            resident((1, H_PAD)),                           # b3
            resident((1, H_PAD)),                           # w4 row (f32)
            resident((1, 1)),                               # b4
        ],
        out_specs=pl.BlockSpec((1, r, 128), lambda i: (i, 0, 0)),  # lane-dense
        compiler_params=pltpu.CompilerParams(
            dimension_semantics=("parallel",),              # megacore on v7x
            vmem_limit_bytes=48 * 1024 * 1024,
        ),
    )(x, kp["w1"], kp["b1"], kp["w2"], kp["b2"],
      kp["w3"], kp["b3"], kp["w4"], kp["b4"])

    return out.reshape(-1)[:B]                              # PyTorch: .view(-1)


def init_params(key):
    """Torch-style f32 params: W is (out_features, in_features), b is (out,)."""
    ks = jax.random.split(key, 8)

    def lin(kw, kb, fan_in, fan_out):
        bound = 1.0 / jnp.sqrt(jnp.float32(fan_in))
        w = jax.random.uniform(kw, (fan_out, fan_in), jnp.float32, -bound, bound)
        b = jax.random.uniform(kb, (fan_out,), jnp.float32, -bound, bound)
        return w, b

    w1, b1 = lin(ks[0], ks[1], IN_DIM, H_DIM)
    w2, b2 = lin(ks[2], ks[3], H_DIM, H_DIM)
    w3, b3 = lin(ks[4], ks[5], H_DIM, H_DIM)
    w4, b4 = lin(ks[6], ks[7], H_DIM, 1)
    return {"w1": w1, "b1": b1, "w2": w2, "b2": b2,
            "w3": w3, "b3": b3, "w4": w4, "b4": b4}


def pack_params(p):
    """Kernel layout: W as (in, out) zero-padded to H_PAD, big weights in bf16,
    biases as (1, out) rows.  Zero padding is exactly semantics-preserving."""
    pad_h = H_PAD - H_DIM

    def pad_cols(w):   # (..., H_DIM) -> (..., H_PAD)
        return jnp.pad(w, ((0, 0), (0, pad_h)))

    def pad_rows(w):   # (H_DIM, ...) -> (H_PAD, ...)
        return jnp.pad(w, ((0, pad_h), (0, 0)))

    return {
        "w1": pad_cols(p["w1"].T),                                   # (2, 512) f32
        "b1": pad_cols(p["b1"][None, :]),                            # (1, 512) f32
        "w2": pad_rows(pad_cols(p["w2"].T)).astype(jnp.bfloat16),    # (512, 512) bf16
        "b2": pad_cols(p["b2"][None, :]),
        "w3": pad_rows(pad_cols(p["w3"].T)).astype(jnp.bfloat16),
        "b3": pad_cols(p["b3"][None, :]),
        "w4": pad_cols(p["w4"]),                                     # (1, 512) f32
        "b4": p["b4"][None, :],                                      # (1, 1) f32
    }


def reference_forward_packed(x, kp):
    """Pure-JAX reference with the kernel's dtype choices (bf16 at MXU inputs)."""
    h = jnp.maximum(x[:, 0:1] * kp["w1"][0:1, :]
                    + x[:, 1:2] * kp["w1"][1:2, :] + kp["b1"], 0.0)
    h = jnp.maximum(jnp.dot(h.astype(jnp.bfloat16), kp["w2"],
                            preferred_element_type=jnp.float32) + kp["b2"], 0.0)
    h = jnp.maximum(jnp.dot(h.astype(jnp.bfloat16), kp["w3"],
                            preferred_element_type=jnp.float32) + kp["b3"], 0.0)
    logit = jnp.sum(h * kp["w4"], axis=-1, keepdims=True) + kp["b4"]
    return jax.nn.sigmoid(logit).reshape(-1)


def reference_forward_f32(x, p):
    """Exact PyTorch-module math in f32 (torch weight layout)."""
    h = jnp.maximum(x @ p["w1"].T + p["b1"], 0.0)
    h = jnp.maximum(h @ p["w2"].T + p["b2"], 0.0)
    h = jnp.maximum(h @ p["w3"].T + p["b3"], 0.0)
    return jax.nn.sigmoid(h @ p["w4"].T + p["b4"]).reshape(-1)


if __name__ == "__main__":
    key = jax.random.PRNGKey(0)
    k_params, k_x = jax.random.split(key)
    params = init_params(k_params)
    kparams = pack_params(params)

    # B=8: single-tile demo batch.  B=300: exercises the balanced multi-tile
    # path (2 tiles of 256 rows, batch padding, lane-dense (r=2,128) epilogue).
    for B in (8, 300):
        x = jax.random.normal(jax.random.fold_in(k_x, B), (B, IN_DIM), jnp.float32)
        out = jax.block_until_ready(discriminator_forward(x, kparams))
        assert out.shape == (B,)

        # Tight check vs. a same-precision (bf16-at-the-dot) reference.
        ref_same = reference_forward_packed(x, kparams)
        assert jnp.allclose(out, ref_same, atol=1e-3, rtol=1e-3), (B, out, ref_same)

        # Loose check vs. exact f32 PyTorch-style math (bf16 weight rounding only).
        ref_f32 = reference_forward_f32(x, params)
        assert jnp.allclose(out, ref_f32, atol=3e-2, rtol=3e-2), (B, out, ref_f32)

    print("KERNEL_OK")
</pallas_src>

<mosaic_0001>
module attributes {stable_mosaic.version = 11 : i64} {
  func.func @_disc_kernel(%arg0: i32, %arg1: memref<128x2xf32, #tpu.memory_space<vmem>>, %arg2: memref<2x512xf32, #tpu.memory_space<vmem>>, %arg3: memref<1x512xf32, #tpu.memory_space<vmem>>, %arg4: memref<512x512xbf16, #tpu.memory_space<vmem>>, %arg5: memref<1x512xf32, #tpu.memory_space<vmem>>, %arg6: memref<512x512xbf16, #tpu.memory_space<vmem>>, %arg7: memref<1x512xf32, #tpu.memory_space<vmem>>, %arg8: memref<1x512xf32, #tpu.memory_space<vmem>>, %arg9: memref<1x1xf32, #tpu.memory_space<vmem>>, %arg10: memref<1x1x128xf32, #tpu.memory_space<vmem>>) attributes {dimension_semantics = [#tpu.dimension_semantics<parallel>], iteration_bounds = array<i64: 1>, scalar_prefetch = 0 : i64, scratch_operands = 0 : i64, tpu.core_type = #tpu.core_type<tc>, window_params = [{transform_indices = @transform_0, window_bounds = array<i64: 128, 2>}, {pipeline_mode = #tpu.pipeline_mode<synchronous>, transform_indices = @transform_1, window_bounds = array<i64: 2, 512>}, {pipeline_mode = #tpu.pipeline_mode<synchronous>, transform_indices = @transform_2, window_bounds = array<i64: 1, 512>}, {pipeline_mode = #tpu.pipeline_mode<synchronous>, transform_indices = @transform_3, window_bounds = array<i64: 512, 512>}, {pipeline_mode = #tpu.pipeline_mode<synchronous>, transform_indices = @transform_4, window_bounds = array<i64: 1, 512>}, {pipeline_mode = #tpu.pipeline_mode<synchronous>, transform_indices = @transform_5, window_bounds = array<i64: 512, 512>}, {pipeline_mode = #tpu.pipeline_mode<synchronous>, transform_indices = @transform_6, window_bounds = array<i64: 1, 512>}, {pipeline_mode = #tpu.pipeline_mode<synchronous>, transform_indices = @transform_7, window_bounds = array<i64: 1, 512>}, {pipeline_mode = #tpu.pipeline_mode<synchronous>, transform_indices = @transform_8, window_bounds = array<i64: 1, 1>}, {transform_indices = @transform_9, window_bounds = array<i64: 1, 1, 128>}]} {
    %c0 = arith.constant 0 : index
    %c0_0 = arith.constant 0 : index
    %0 = vector.load %arg1[%c0, %c0_0] : memref<128x2xf32, #tpu.memory_space<vmem>>, vector<128x2xf32>
    %c0_1 = arith.constant 0 : index
    %c0_2 = arith.constant 0 : index
    %1 = vector.load %arg2[%c0_1, %c0_2] : memref<2x512xf32, #tpu.memory_space<vmem>>, vector<2x512xf32>
    %2 = vector.extract_strided_slice %0 {offsets = [0, 0], sizes = [128, 1], strides = [1, 1]} : vector<128x2xf32> to vector<128x1xf32>
    %3 = vector.extract_strided_slice %1 {offsets = [0, 0], sizes = [1, 512], strides = [1, 1]} : vector<2x512xf32> to vector<1x512xf32>
    %4 = vector.broadcast %2 : vector<128x1xf32> to vector<128x512xf32>
    %5 = vector.broadcast %3 : vector<1x512xf32> to vector<128x512xf32>
    %6 = arith.mulf %4, %5 : vector<128x512xf32>
    %7 = vector.extract_strided_slice %0 {offsets = [0, 1], sizes = [128, 1], strides = [1, 1]} : vector<128x2xf32> to vector<128x1xf32>
    %8 = vector.extract_strided_slice %1 {offsets = [1, 0], sizes = [1, 512], strides = [1, 1]} : vector<2x512xf32> to vector<1x512xf32>
    %9 = vector.broadcast %7 : vector<128x1xf32> to vector<128x512xf32>
    %10 = vector.broadcast %8 : vector<1x512xf32> to vector<128x512xf32>
    %11 = arith.mulf %9, %10 : vector<128x512xf32>
    %12 = arith.addf %6, %11 : vector<128x512xf32>
    %c0_3 = arith.constant 0 : index
    %c0_4 = arith.constant 0 : index
    %13 = vector.load %arg3[%c0_3, %c0_4] : memref<1x512xf32, #tpu.memory_space<vmem>>, vector<1x512xf32>
    %14 = vector.broadcast %13 : vector<1x512xf32> to vector<128x512xf32>
    %15 = arith.addf %12, %14 : vector<128x512xf32>
    %cst = arith.constant 0.000000e+00 : f32
    %16 = vector.broadcast %cst : f32 to vector<128x512xf32>
    %17 = arith.maximumf %15, %16 : vector<128x512xf32>
    %18 = arith.truncf %17 : vector<128x512xf32> to vector<128x512xbf16>
    %c0_5 = arith.constant 0 : index
    %c0_6 = arith.constant 0 : index
    %19 = vector.load %arg4[%c0_5, %c0_6] : memref<512x512xbf16, #tpu.memory_space<vmem>>, vector<512x512xbf16>
    %cst_7 = arith.constant dense<0.000000e+00> : vector<128x512xf32>
    %20 = tpu.matmul %18, %19, %cst_7 {dimension_numbers = #tpu.dot_dimension_numbers<[1], [0], [0], [1], [0, 0, 1, 1], [], []>} : vector<128x512xbf16>, vector<512x512xbf16>, vector<128x512xf32> -> vector<128x512xf32>
    %c0_8 = arith.constant 0 : index
    %c0_9 = arith.constant 0 : index
    %21 = vector.load %arg5[%c0_8, %c0_9] : memref<1x512xf32, #tpu.memory_space<vmem>>, vector<1x512xf32>
    %22 = vector.broadcast %21 : vector<1x512xf32> to vector<128x512xf32>
    %23 = arith.addf %20, %22 : vector<128x512xf32>
    %cst_10 = arith.constant 0.000000e+00 : f32
    %24 = vector.broadcast %cst_10 : f32 to vector<128x512xf32>
    %25 = arith.maximumf %23, %24 : vector<128x512xf32>
    %26 = arith.truncf %25 : vector<128x512xf32> to vector<128x512xbf16>
    %c0_11 = arith.constant 0 : index
    %c0_12 = arith.constant 0 : index
    %27 = vector.load %arg6[%c0_11, %c0_12] : memref<512x512xbf16, #tpu.memory_space<vmem>>, vector<512x512xbf16>
    %cst_13 = arith.constant dense<0.000000e+00> : vector<128x512xf32>
    %28 = tpu.matmul %26, %27, %cst_13 {dimension_numbers = #tpu.dot_dimension_numbers<[1], [0], [0], [1], [0, 0, 1, 1], [], []>} : vector<128x512xbf16>, vector<512x512xbf16>, vector<128x512xf32> -> vector<128x512xf32>
    %c0_14 = arith.constant 0 : index
    %c0_15 = arith.constant 0 : index
    %29 = vector.load %arg7[%c0_14, %c0_15] : memref<1x512xf32, #tpu.memory_space<vmem>>, vector<1x512xf32>
    %30 = vector.broadcast %29 : vector<1x512xf32> to vector<128x512xf32>
    %31 = arith.addf %28, %30 : vector<128x512xf32>
    %cst_16 = arith.constant 0.000000e+00 : f32
    %32 = vector.broadcast %cst_16 : f32 to vector<128x512xf32>
    %33 = arith.maximumf %31, %32 : vector<128x512xf32>
    %34 = vector.shape_cast %33 : vector<128x512xf32> to vector<1x128x512xf32>
    %c0_17 = arith.constant 0 : index
    %c0_18 = arith.constant 0 : index
    %35 = vector.load %arg8[%c0_17, %c0_18] : memref<1x512xf32, #tpu.memory_space<vmem>>, vector<1x512xf32>
    %36 = vector.shape_cast %35 : vector<1x512xf32> to vector<1x1x512xf32>
    %37 = vector.broadcast %36 : vector<1x1x512xf32> to vector<1x128x512xf32>
    %38 = arith.mulf %34, %37 : vector<1x128x512xf32>
    %cst_19 = arith.constant dense<0.000000e+00> : vector<1x128xf32>
    %39 = vector.multi_reduction <add>, %38, %cst_19 [2] : vector<1x128x512xf32> to vector<1x128xf32>
    %c0_20 = arith.constant 0 : index
    %c0_21 = arith.constant 0 : index
    %40 = vector.load %arg9[%c0_20, %c0_21] : memref<1x1xf32, #tpu.memory_space<vmem>>, vector<1x1xf32>
    %41 = vector.broadcast %40 : vector<1x1xf32> to vector<1x128xf32>
    %42 = arith.addf %39, %41 : vector<1x128xf32>
    %cst_22 = arith.constant 5.000000e-01 : f32
    %43 = vector.broadcast %cst_22 : f32 to vector<1x128xf32>
    %44 = arith.mulf %43, %42 : vector<1x128xf32>
    %45 = math.tanh %44 : vector<1x128xf32>
    %cst_23 = arith.constant 5.000000e-01 : f32
    %46 = vector.broadcast %cst_23 : f32 to vector<1x128xf32>
    %47 = arith.mulf %46, %45 : vector<1x128xf32>
    %cst_24 = arith.constant 5.000000e-01 : f32
    %48 = vector.broadcast %cst_24 : f32 to vector<1x128xf32>
    %49 = arith.addf %47, %48 : vector<1x128xf32>
    %50 = vector.shape_cast %49 : vector<1x128xf32> to vector<1x1x128xf32>
    %c0_25 = arith.constant 0 : index
    %c0_26 = arith.constant 0 : index
    %c0_27 = arith.constant 0 : index
    %51 = vector.load %arg10[%c0_25, %c0_26, %c0_27] : memref<1x1x128xf32, #tpu.memory_space<vmem>>, vector<1x1x128xf32>
    tpu.vector_store %arg10[%c0_25, %c0_26, %c0_27], %50 {strides = array<i32>} : memref<1x1x128xf32, #tpu.memory_space<vmem>>, vector<1x1x128xf32>,
    return
  }
  func.func @transform_0(%arg0: i32) -> (i32, i32) {
    %c0_i32 = arith.constant 0 : i32
    %c0_i32_0 = arith.constant 0 : i32
    return %arg0, %c0_i32 : i32, i32
  }
  func.func @transform_1(%arg0: i32) -> (i32, i32) {
    %c0_i32 = arith.constant 0 : i32
    %c0_i32_0 = arith.constant 0 : i32
    %c0_i32_1 = arith.constant 0 : i32
    return %c0_i32, %c0_i32_0 : i32, i32
  }
  func.func @transform_2(%arg0: i32) -> (i32, i32) {
    %c0_i32 = arith.constant 0 : i32
    %c0_i32_0 = arith.constant 0 : i32
    %c0_i32_1 = arith.constant 0 : i32
    return %c0_i32, %c0_i32_0 : i32, i32
  }
  func.func @transform_3(%arg0: i32) -> (i32, i32) {
    %c0_i32 = arith.constant 0 : i32
    %c0_i32_0 = arith.constant 0 : i32
    %c0_i32_1 = arith.constant 0 : i32
    return %c0_i32, %c0_i32_0 : i32, i32
  }
  func.func @transform_4(%arg0: i32) -> (i32, i32) {
    %c0_i32 = arith.constant 0 : i32
    %c0_i32_0 = arith.constant 0 : i32
    %c0_i32_1 = arith.constant 0 : i32
    return %c0_i32, %c0_i32_0 : i32, i32
  }
  func.func @transform_5(%arg0: i32) -> (i32, i32) {
    %c0_i32 = arith.constant 0 : i32
    %c0_i32_0 = arith.constant 0 : i32
    %c0_i32_1 = arith.constant 0 : i32
    return %c0_i32, %c0_i32_0 : i32, i32
  }
  func.func @transform_6(%arg0: i32) -> (i32, i32) {
    %c0_i32 = arith.constant 0 : i32
    %c0_i32_0 = arith.constant 0 : i32
    %c0_i32_1 = arith.constant 0 : i32
    return %c0_i32, %c0_i32_0 : i32, i32
  }
  func.func @transform_7(%arg0: i32) -> (i32, i32) {
    %c0_i32 = arith.constant 0 : i32
    %c0_i32_0 = arith.constant 0 : i32
    %c0_i32_1 = arith.constant 0 : i32
    return %c0_i32, %c0_i32_0 : i32, i32
  }
  func.func @transform_8(%arg0: i32) -> (i32, i32) {
    %c0_i32 = arith.constant 0 : i32
    %c0_i32_0 = arith.constant 0 : i32
    %c0_i32_1 = arith.constant 0 : i32
    return %c0_i32, %c0_i32_0 : i32, i32
  }
  func.func @transform_9(%arg0: i32) -> (i32, i32, i32) {
    %c0_i32 = arith.constant 0 : i32
    %c0_i32_0 = arith.constant 0 : i32
    %c0_i32_1 = arith.constant 0 : i32
    return %arg0, %c0_i32, %c0_i32_0 : i32, i32, i32
  }
}

</mosaic_0001>

<bundles_post_ra>
// kernel: tpu_custom_call.1
= control target key start
LH: loop header
LB: loop body
LE: loop exit
PB: predicated region body
PF: predicated region fallthrough
CT: control target
= control target key end

     0   :  { %s5838_s0 = inlined_call_operand.vmem [shape: f32[128,2], index: 0, kind: input, shape index: {}]   ;;  %s5839_s1 = inlined_call_operand.vmem [shape: f32[2,512], index: 1, kind: input, shape index: {}]   ;;  %s5840_s2 = inlined_call_operand.vmem [shape: f32[1,512], index: 2, kind: input, shape index: {}]   ;;  %s5841_s3 = inlined_call_operand.hbm [shape: bf16[512,512], index: 3, kind: input, shape index: {}]   ;;  %s5842_s4 = inlined_call_operand.vmem [shape: f32[1,512], index: 4, kind: input, shape index: {}]   ;;  %s5843_s5 = inlined_call_operand.hbm [shape: bf16[512,512], index: 5, kind: input, shape index: {}]   ;;  %s5844_s6 = inlined_call_operand.vmem [shape: f32[1,512], index: 6, kind: input, shape index: {}]   ;;  %s5845_s7 = inlined_call_operand.vmem [shape: f32[1,512], index: 7, kind: input, shape index: {}]   ;;  %s5846_s8 = inlined_call_operand.<no memory space> [shape: f32[1,1], index: 8, kind: input, shape index: {}]   ;;  %s5847_s9 = inlined_call_operand.hbm [shape: f32[1,1,128], index: 9, kind: output, shape index: {}]  }
   0x1   :  { %v14_v0 = vstv %s5846_s8 }
   0x2   :  { %15 = vst [vmem:[#allocation2] sm:$0x1] %v14_v0 }
   0x3   :  { %16 = vsyncpa [#allocation4], 0 }
   0x4   :  { %17 = vsyncpa [#allocation7], 0 }
   0x5   :  { %18 = vsyncpa [#allocation5], 0  ;;  %s4484_s11 = smov [#allocation3]  }
   0x6   :  { %s30_s12 = sshll.u32 %s4484_s11, 4  ;;  %s31_s12 = int_to_ptr.vmem [resolvable:$true] %s30_s12 }
   0x7   :  { %s4426_s13 = scalar_lea.vmem %s31_s12, 16384  ;;  %p4431_p1 = scmp.lt.s32.totalorder %s31_s12, %s31_s12 }
   0x8   :  { %p4427_p0 = scmp.ne.s32.totalorder %s31_s12, %s4426_s13  ;;  %p4432_p2 = scmp.lt.s32.totalorder %s4426_s13, %s4426_s13 }
   0xa   :  { %p4433_p3 = por %p4432_p2, %p4431_p1 }
   0xc   :  { %p4434_p4 = pnand %p4433_p3, %p4427_p0 }
   0xe   :  { %4437 = shalt.err (!%p4434_p4)
}
   0xf   :  { %s4485_s14 = smov 256   ;;  %s4486_s15 = smov 16  }
  0x10   :  { %36 = dma.hbm_to_vmem [thread:$0]  %s5841_s3, 16384, %s31_s12, [#allocation4], %s4485_s14, %s4485_s14, %s4486_s15  }
  0x11   :  { %s4487_s8 = smov [#allocation6]  }
  0x12   :  { %s44_s18 = sshll.u32 %s4487_s8, 4  ;;  %s45_s18 = int_to_ptr.vmem [resolvable:$true] %s44_s18 }
  0x13   :  { %s4446_s19 = scalar_lea.vmem %s45_s18, 16384  ;;  %p4451_p6 = scmp.lt.s32.totalorder %s45_s18, %s45_s18 }
  0x14   :  { %p4447_p5 = scmp.ne.s32.totalorder %s45_s18, %s4446_s19  ;;  %p4452_p7 = scmp.lt.s32.totalorder %s4446_s19, %s4446_s19 }
  0x16   :  { %p4453_p8 = por %p4452_p7, %p4451_p6 }
  0x18   :  { %p4454_p9 = pnand %p4453_p8, %p4447_p5 }
  0x1a   :  { %4457 = shalt.err (!%p4454_p9)
}
  0x1b   :  { %50 = dma.hbm_to_vmem [thread:$0]  %s5843_s5, 16384, %s45_s18, [#allocation7], %s4485_s14, %s4485_s14, %s4486_s15  }
  0x1c   :  { %4478 = dma.done.wait [#allocation4], 16384  }
  0x1d   :  { %4479 = vsyncadd [#allocation4], 4294950912 }
  0x1e   :  { %4480 = dma.done.wait [#allocation7], 16384  }
  0x1f   :  { %4481 = vsyncadd [#allocation7], 4294950912  ;;  %v4488_v1 = vmov 1   ;;  %v4489_v2 = vmov 0   ;;  %v63_v3 = vld [vmem:[%s5838_s0] sm:$0xff]  ;;  %v64_v4 = vld [vmem:[%s5838_s0 + $0x8] sm:$0xff] }
  0x20   :  { %3980 = vset.pattern.permute.xlu1 %v4488_v1  ;;  %3979 = vset.pattern.permute.xlu0 %v4489_v2  ;;  %v65_v5 = vld [vmem:[%s5838_s0 + $0x10] sm:$0xff]  ;;  %v66_v6 = vld [vmem:[%s5838_s0 + $0x18] sm:$0xff]  ;;  %v67_v17 = vld [vmem:[%s5838_s0 + $0x20] sm:$0xff]  ;;  %vm3598_vm0 = vcmask 130112   ;;  %vm3605_vm1 = vcmask 195712   ;;  %vm3612_vm2 = vcmask 261312  }
  0x21   :  { %262 = vperm.xlu1 %3980, %v63_v3   ;;  %82 = vperm.xlu0 %3979, %v63_v3   ;;  %v4002_v7 = vld [vmem:[#allocation3 + $0xe4] ss:$16 sps:$4 sm:$0xff]   ;;  %v4006_v9 = vld [vmem:[#allocation3 + $0xe0] ss:$16 sps:$4 sm:$0xff]   ;;  %vm3619_vm3 = vcmask 326912   ;;  %vm3626_vm4 = vcmask 392512  }
  0x22   :  { %v4004_v8 = vld [vmem:[#allocation3 + $0x2e4] ss:$16 sps:$4 sm:$0xff]   ;;  %1461 = vmatprep.subr.bf16.mxu0 %v4002_v7  ;;  %v4007_v10 = vld [vmem:[#allocation3 + $0x2e0] ss:$16 sps:$4 sm:$0xff]   ;;  %vm3633_vm5 = vcmask 458112   ;;  %vm3640_vm6 = vcmask 523712  }
  0x23   :  { %1574 = vmatprep.subr.bf16.mxu1 %v4004_v8  ;;  %v4008_v11 = vld [vmem:[#allocation3 + $0xc4] ss:$16 sps:$4 sm:$0xff]   ;;  %1462 = vmatpush1.bf16.msra.mxu0 %v4006_v9  ;;  %v4012_v13 = vld [vmem:[#allocation3 + $0xc0] ss:$16 sps:$4 sm:$0xff]   ;;  %vm3647_vm7 = vcmask 589312   ;;  %vm3654_vm8 = vcmask 654912  }
  0x24   :  { %v4010_v12 = vld [vmem:[#allocation3 + $0x2c4] ss:$16 sps:$4 sm:$0xff]   ;;  %1575 = vmatpush1.bf16.msra.mxu1 %v4007_v10  ;;  %1463 = vmatprep.subr.bf16.mxu0 %v4008_v11  ;;  %v4013_v14 = vld [vmem:[#allocation3 + $0x2c0] ss:$16 sps:$4 sm:$0xff]   ;;  %vm3661_vm9 = vcmask 720512   ;;  %vm3668_vm10 = vcmask 786112  }
  0x25   :  { %266 = vperm.xlu1 %3980, %v64_v4   ;;  %87 = vperm.xlu0 %3979, %v64_v4   ;;  %v4014_v15 = vld [vmem:[#allocation3 + $0xa4] ss:$16 sps:$4 sm:$0xff]   ;;  %v4018_v19 = vld [vmem:[#allocation3 + $0xa0] ss:$16 sps:$4 sm:$0xff]   ;;  %vm3675_vm11 = vcmask 851712   ;;  %vm3682_vm12 = vcmask 917312  }
  0x26   :  { %1576 = vmatprep.subr.bf16.mxu1 %v4010_v12  ;;  %v4016_v16 = vld [vmem:[#allocation3 + $0x2a4] ss:$16 sps:$4 sm:$0xff]   ;;  %v4019_v20 = vld [vmem:[#allocation3 + $0x2a0] ss:$16 sps:$4 sm:$0xff]   ;;  %vm3689_vm13 = vcmask 982912   ;;  %vm3696_vm14 = vcmask 1048512  }
  0x27   :  { %v69_v18 = vld [vmem:[%s5838_s0 + $0x30] sm:$0xff]  ;;  %1464 = vmatpush1.bf16.msra.mxu0 %v4012_v13  ;;  %v68_v24 = vld [vmem:[%s5838_s0 + $0x28] sm:$0xff]  ;;  %v70_v37 = vld [vmem:[%s5838_s0 + $0x38] sm:$0xff] }
  0x28   :  { %1577 = vmatpush1.bf16.msra.mxu1 %v4013_v14  ;;  %1465 = vmatprep.subr.bf16.mxu0 %v4014_v15  ;;  %v4020_v21 = vld [vmem:[#allocation3 + $0x84] ss:$16 sps:$4 sm:$0xff]   ;;  %v4024_v23 = vld [vmem:[#allocation3 + $0x80] ss:$16 sps:$4 sm:$0xff]  }
  0x29   :  { %3981 = vset.pattern.permute.xlu1 %v4489_v2  ;;  %92 = vperm.xlu0 %3979, %v65_v5   ;;  %v4022_v22 = vld [vmem:[#allocation3 + $0x284] ss:$16 sps:$4 sm:$0xff]   ;;  %v4025_v25 = vld [vmem:[#allocation3 + $0x280] ss:$16 sps:$4 sm:$0xff]  }
  0x2a   :  { %97 = vperm.xlu1 %3981, %v66_v6   ;;  %1578 = vmatprep.subr.bf16.mxu1 %v4016_v16  ;;  %v4026_v26 = vld [vmem:[#allocation3 + $0x64] ss:$16 sps:$4 sm:$0xff]   ;;  %v4030_v28 = vld [vmem:[#allocation3 + $0x60] ss:$16 sps:$4 sm:$0xff]  }
  0x2b   :  { %1466 = vmatpush1.bf16.msra.mxu0 %v4018_v19  ;;  %v4028_v27 = vld [vmem:[#allocation3 + $0x264] ss:$16 sps:$4 sm:$0xff]   ;;  %v4031_v29 = vld [vmem:[#allocation3 + $0x260] ss:$16 sps:$4 sm:$0xff]  }
  0x2c   :  { %1579 = vmatpush1.bf16.msra.mxu1 %v4019_v20  ;;  %1467 = vmatprep.subr.bf16.mxu0 %v4020_v21  ;;  %v4032_v30 = vld [vmem:[#allocation3 + $0x44] ss:$16 sps:$4 sm:$0xff]   ;;  %v4036_v33 = vld [vmem:[#allocation3 + $0x40] ss:$16 sps:$4 sm:$0xff]   ;;  %v4100_v20 = vld [vmem:[#allocation3 + $0xec] ss:$16 sps:$4 sm:$0xff]  }
  0x2d   :  { %3982 = vset.pattern.permute.xlu0 %v4488_v1  ;;  %1580 = vmatprep.subr.bf16.mxu1 %v4022_v22  ;;  %v4034_v31 = vld [vmem:[#allocation3 + $0x244] ss:$16 sps:$4 sm:$0xff]   ;;  %v4037_v34 = vld [vmem:[#allocation3 + $0x240] ss:$16 sps:$4 sm:$0xff]   ;;  %v4103_v21 = vld [vmem:[#allocation3 + $0x2ec] ss:$16 sps:$4 sm:$0xff]  }
  0x2e   :  { %3983 = vset.pattern.permute.xlu1 %v4488_v1  ;;  %270 = vperm.xlu0 %3982, %v65_v5   ;;  %v4582_v32 = vld [vmem:[%s5838_s0 + $0x48] sm:$0xff]  ;;  %v73_v38 = vld [vmem:[%s5838_s0 + $0x50] sm:$0xff]  ;;  %v71_v47 = vld [vmem:[%s5838_s0 + $0x40] sm:$0xff] }
  0x2f   :  { %274 = vperm.xlu1 %3983, %v66_v6   ;;  %1468 = vmatpush1.bf16.msra.mxu0 %v4024_v23  ;;  %v4038_v35 = vld [vmem:[#allocation3 + $0x24] ss:$16 sps:$4 sm:$0xff]   ;;  %v4042_v39 = vld [vmem:[#allocation3 + $0x20] ss:$16 sps:$4 sm:$0xff]   ;;  %v5848_v23 = vlaneseq }
  0x30   :  { %1581 = vmatpush1.bf16.msra.mxu1 %v4025_v25  ;;  %1469 = vmatprep.subr.bf16.mxu0 %v4026_v26  ;;  %v4040_v36 = vld [vmem:[#allocation3 + $0x224] ss:$16 sps:$4 sm:$0xff]   ;;  %v4043_v40 = vld [vmem:[#allocation3 + $0x220] ss:$16 sps:$4 sm:$0xff]  }
  0x31   :  { %1582 = vmatprep.subr.bf16.mxu1 %v4028_v27  ;;  %v4044_v41 = vld [vmem:[#allocation3 + $0x4] ss:$16 sps:$4 sm:$0xff]   ;;  %v4048_v43 = vld [vmem:[#allocation3] ss:$16 sps:$4 sm:$0xff]  }
  0x32   :  { %286 = vperm.xlu0 %3982, %v69_v18   ;;  %v4046_v42 = vld [vmem:[#allocation3 + $0x204] ss:$16 sps:$4 sm:$0xff]   ;;  %v4049_v44 = vld [vmem:[#allocation3 + $0x200] ss:$16 sps:$4 sm:$0xff]  }
  0x33   :  { %3984 = vset.pattern.permute.xlu1 %v4489_v2  ;;  %1470 = vmatpush1.bf16.msra.mxu0 %v4030_v28  ;;  %v4050_v45 = vld [vmem:[#allocation3 + $0x1e4] ss:$16 sps:$4 sm:$0xff]   ;;  %v4054_v48 = vld [vmem:[#allocation3 + $0x1e0] ss:$16 sps:$4 sm:$0xff]  }
  0x34   :  { %102 = vperm.xlu1 %3984, %v67_v17   ;;  %1583 = vmatpush1.bf16.msra.mxu1 %v4031_v29  ;;  %v4052_v46 = vld [vmem:[#allocation3 + $0x3e4] ss:$16 sps:$4 sm:$0xff]   ;;  %v4055_v49 = vld [vmem:[#allocation3 + $0x3e0] ss:$16 sps:$4 sm:$0xff]  }
  0x35   :  { %1471 = vmatprep.subr.bf16.mxu0 %v4032_v30  ;;  %1584 = vmatprep.subr.bf16.mxu1 %v4034_v31  ;;  %v4056_v50 = vld [vmem:[#allocation3 + $0x1c4] ss:$16 sps:$4 sm:$0xff]   ;;  %v4060_v53 = vld [vmem:[#allocation3 + $0x1c0] ss:$16 sps:$4 sm:$0xff]  }
  0x36   :  { %3987 = vset.pattern.permute.xlu0 %v4489_v2  ;;  %v4601_v51 = vld [vmem:[%s5838_s0 + $0x68] sm:$0xff]  ;;  %v4061_v54 = vld [vmem:[#allocation3 + $0x3c0] ss:$16 sps:$4 sm:$0xff]   ;;  %v74_v4 = vld [vmem:[%s5838_s0 + $0x58] sm:$0xff] }
  0x37   :  { %107 = vperm.xlu0 %3987, %v68_v24   ;;  %1472 = vmatpush1.bf16.msra.mxu0 %v4036_v33  ;;  %v4058_v52 = vld [vmem:[#allocation3 + $0x3c4] ss:$16 sps:$4 sm:$0xff]   ;;  %v4066_v58 = vld [vmem:[#allocation3 + $0x1a0] ss:$16 sps:$4 sm:$0xff]  }
  0x38   :  { %3985 = vset.pattern.permute.xlu1 %v4488_v1  ;;  %1585 = vmatpush1.bf16.msra.mxu1 %v4037_v34  ;;  %v77_v55 = vld [vmem:[%s5838_s0 + $0x70] sm:$0xff]  ;;  %v75_v14 = vld [vmem:[%s5838_s0 + $0x60] sm:$0xff]  ;;  %v78_v22 = vld [vmem:[%s5838_s0 + $0x78] sm:$0xff] }
  0x39   :  { %278 = vperm.xlu1 %3985, %v67_v17   ;;  %1473 = vmatprep.subr.bf16.mxu0 %v4038_v35  ;;  %v4062_v56 = vld [vmem:[#allocation3 + $0x1a4] ss:$16 sps:$4 sm:$0xff]   ;;  %v4067_v59 = vld [vmem:[#allocation3 + $0x3a0] ss:$16 sps:$4 sm:$0xff]  }
  0x3a   :  { %1586 = vmatprep.subr.bf16.mxu1 %v4040_v36  ;;  %v4064_v57 = vld [vmem:[#allocation3 + $0x3a4] ss:$16 sps:$4 sm:$0xff]   ;;  %v4072_v62 = vld [vmem:[#allocation3 + $0x180] ss:$16 sps:$4 sm:$0xff]  }
  0x3b   :  { %112 = vperm.xlu0 %3987, %v69_v18   ;;  %1474 = vmatpush1.bf16.msra.mxu0 %v4042_v39  ;;  %v4068_v60 = vld [vmem:[#allocation3 + $0x184] ss:$16 sps:$4 sm:$0xff]   ;;  %v4073_v63 = vld [vmem:[#allocation3 + $0x380] ss:$16 sps:$4 sm:$0xff]  }
  0x3c   :  { %1587 = vmatpush1.bf16.msra.mxu1 %v4043_v40  ;;  %1475 = vmatprep.subr.bf16.mxu0 %v4044_v41  ;;  %v4070_v61 = vld [vmem:[#allocation3 + $0x384] ss:$16 sps:$4 sm:$0xff]   ;;  %v4078_v5 = vld [vmem:[#allocation3 + $0x160] ss:$16 sps:$4 sm:$0xff]  }
  0x3d   :  { %282 = vperm.xlu1 %3985, %v68_v24   ;;  %1588 = vmatprep.subr.bf16.mxu1 %v4046_v42  ;;  %v4074_v0 = vld [vmem:[#allocation3 + $0x164] ss:$16 sps:$4 sm:$0xff]   ;;  %v4079_v6 = vld [vmem:[#allocation3 + $0x360] ss:$16 sps:$4 sm:$0xff]   ;;  %v4630_v24 = vshrl.u32 %v5848_v23, 7 }
  0x3e   :  { %v4076_v3 = vld [vmem:[#allocation3 + $0x364] ss:$16 sps:$4 sm:$0xff]   ;;  %v4084_v9 = vld [vmem:[#allocation3 + $0x140] ss:$16 sps:$4 sm:$0xff]  }
  0x3f   :  { %127 = vperm.xlu0 %3987, %v4582_v32   ;;  %1476 = vmatpush1.bf16.msra.mxu0 %v4048_v43  ;;  %v4080_v7 = vld [vmem:[#allocation3 + $0x144] ss:$16 sps:$4 sm:$0xff]   ;;  %v4085_v10 = vld [vmem:[#allocation3 + $0x340] ss:$16 sps:$4 sm:$0xff]   ;;  %5870 = vst [vmem:[#allocation12_spill] sm:$0xff] %v4630_v24  ;;  %v4636_v26 = vsub.s32 1, %v4630_v24 }
  0x40   :  { %1589 = vmatpush1.bf16.msra.mxu1 %v4049_v44  ;;  %1477 = vmatprep.subr.bf16.mxu0 %v4050_v45  ;;  %v4082_v8 = vld [vmem:[#allocation3 + $0x344] ss:$16 sps:$4 sm:$0xff]   ;;  %v4090_v13 = vld [vmem:[#allocation3 + $0x120] ss:$16 sps:$4 sm:$0xff]   ;;  %v4639_v27 = vsub.s32 3, %v4630_v24  ;;  %v335_v28 = vsub.s32 5, %v4630_v24 }
  0x41   :  { %3986 = vset.pattern.permute.xlu1 %v4489_v2  ;;  %1590 = vmatprep.subr.bf16.mxu1 %v4052_v46  ;;  %v4086_v11 = vld [vmem:[#allocation3 + $0x124] ss:$16 sps:$4 sm:$0xff]   ;;  %v4091_v15 = vld [vmem:[#allocation3 + $0x320] ss:$16 sps:$4 sm:$0xff]   ;;  %5871 = vst [vmem:[#allocation13_spill] sm:$0xff] %v4636_v26  ;;  %v4647_v29 = vsub.s32 2, %v4630_v24 }
  0x42   :  { %117 = vperm.xlu1 %3986, %v70_v37   ;;  %v4088_v12 = vld [vmem:[#allocation3 + $0x324] ss:$16 sps:$4 sm:$0xff]   ;;  %v4096_v18 = vld [vmem:[#allocation3 + $0x100] ss:$16 sps:$4 sm:$0xff]   ;;  %5872 = vst [vmem:[#allocation14_spill] sm:$0xff] %v4639_v27  ;;  %v171_v30 = vsub.s32 4, %v4630_v24 }
  0x43   :  { %3992 = vset.pattern.permute.xlu0 %v4488_v1  ;;  %1478 = vmatpush2.bf16.msra.mxu0 %v4054_v48  ;;  %v4092_v16 = vld [vmem:[#allocation3 + $0x104] ss:$16 sps:$4 sm:$0xff]   ;;  %v4097_v19 = vld [vmem:[#allocation3 + $0x300] ss:$16 sps:$4 sm:$0xff]   ;;  %5874 = vst [vmem:[#allocation16_spill] sm:$0xff] %v4647_v29  ;;  %v175_v31 = vsub.s32 6, %v4630_v24 }
  0x44   :  { %302 = vperm.xlu0 %3992, %v73_v38   ;;  %1591 = vmatpush2.bf16.msra.mxu1 %v4055_v49  ;;  %v4094_v17 = vld [vmem:[#allocation3 + $0x304] ss:$16 sps:$4 sm:$0xff]   ;;  %v489_v48 = vld [vmem:[%s5840_s2] sm:$0xf] }
  0x45   :  { %1479 = vmatprep.subr.bf16.mxu0 %v4056_v50  ;;  %1592 = vmatprep.subr.bf16.mxu1 %v4058_v52  ;;  %v79_v25 = vld [vmem:[%s5839_s1] sm:$0xff] }
  0x46   :  { %3988 = vset.pattern.permute.xlu1 %v4488_v1  ;;  %v332_v33 = vrot.slane %v79_v25, %v4639_v27  ;;  %v336_v34 = vrot.slane %v79_v25, %v335_v28  ;;  %v176_v39 = vrot.slane %v79_v25, %v175_v31 }
  0x47   :  { %290 = vperm.xlu1 %3988, %v70_v37   ;;  %1480 = vmatpush2.bf16.msra.mxu0 %v4060_v53  ;;  %v168_v37 = vrot.slane %v79_v25, %v4647_v29 }
  0x48   :  { %3993 = vset.pattern.permute.xlu0 %v4489_v2  ;;  %1593 = vmatpush2.bf16.msra.mxu1 %v4061_v54  ;;  %v4659_v41 = vrot.slane %v332_v33, %v4636_v26  ;;  %v4662_v42 = vrot.slane %v336_v34, %v4636_v26 }
  0x49   :  { %132 = vperm.xlu0 %3993, %v73_v38   ;;  %1481 = vmatprep.subr.bf16.mxu0 %v4062_v56  ;;  %v172_v38 = vrot.slane %v79_v25, %v171_v30 }
  0x4a   :  { %1594 = vmatprep.subr.bf16.mxu1 %v4064_v57 }
  0x4b   :  { %3989 = vset.pattern.permute.xlu1 %v4489_v2  ;;  %1482 = vmatpush2.bf16.msra.mxu0 %v4066_v58 }
  0x4c   :  { %122 = vperm.xlu1 %3989, %v71_v47   ;;  %1595 = vmatpush2.bf16.msra.mxu1 %v4067_v59  ;;  %v4691_v59 = vrot.slane %v489_v48, %v4636_v26 }
  0x4d   :  { %147 = vperm.xlu0 %3993, %v4601_v51   ;;  %1483 = vmatprep.subr.bf16.mxu0 %v4068_v60  ;;  %v4694_v60 = vrot.slane %v489_v48, %v4639_v27 }
  0x4e   :  { %1596 = vmatprep.subr.bf16.mxu1 %v4070_v61 }
  0x4f   :  { %1484 = vmatpush2.bf16.msra.mxu0 %v4072_v62  ;;  %v4700_v62 = vrot.slane %v489_v48, %v4647_v29 }
  0x50   :  { %3990 = vset.pattern.permute.xlu1 %v4488_v1  ;;  %1597 = vmatpush2.bf16.msra.mxu1 %v4073_v63 }
  0x51   :  { %294 = vperm.xlu1 %3990, %v71_v47   ;;  %152 = vperm.xlu0 %3993, %v77_v55  }
  0x52   :  { %1485 = vmatprep.subr.bf16.mxu0 %v4074_v0  ;;  %1598 = vmatprep.subr.bf16.mxu1 %v4076_v3 }
  0x53   :  { %1486 = vmatpush2.bf16.msra.mxu0 %v4078_v5 }
  0x54   :  { %1599 = vmatpush2.bf16.msra.mxu1 %v4079_v6  ;;  %1487 = vmatprep.subr.bf16.mxu0 %v4080_v7 }
  0x55   :  { %298 = vperm.xlu1 %3990, %v4582_v32   ;;  %3998 = vset.pattern.permute.xlu0 %v4488_v1  ;;  %v328_v32 = vrot.slane %v79_v25, %v4636_v26 }
  0x56   :  { %318 = vperm.xlu0 %3998, %v77_v55   ;;  %1600 = vmatprep.subr.bf16.mxu1 %v4082_v8 }
  0x57   :  { %1488 = vmatpush2.bf16.msra.mxu0 %v4084_v9  ;;  %v4656_v40 = vrot.slane %v328_v32, %v4636_v26 }
  0x58   :  { %1601 = vmatpush2.bf16.msra.mxu1 %v4085_v10  ;;  %1489 = vmatprep.subr.bf16.mxu0 %v4086_v11 }
  0x59   :  { %3991 = vset.pattern.permute.xlu1 %v4489_v2  ;;  %1602 = vmatprep.subr.bf16.mxu1 %v4088_v12 }
  0x5a   :  { %137 = vperm.xlu1 %3991, %v74_v4   ;;  %4001 = vset.pattern.permute.xlu0 %v4489_v2 }
  0x5b   :  { %1490 = vmatpush2.bf16.msra.mxu0 %v4090_v13 }
  0x5c   :  { %1603 = vmatpush2.bf16.msra.mxu1 %v4091_v15  ;;  %1491 = vmatprep.subr.bf16.mxu0 %v4092_v16 }
  0x5d   :  { %1604 = vmatprep.subr.bf16.mxu1 %v4094_v17 }
  0x5e   :  { %3994 = vset.pattern.permute.xlu1 %v4488_v1 }
  0x5f   :  { %306 = vperm.xlu1 %3994, %v74_v4   ;;  %1492 = vmatpush2.bf16.msra.mxu0 %v4096_v18 }
  0x60   :  { %1605 = vmatpush2.bf16.msra.mxu1 %v4097_v19  ;;  %1687 = vmatprep.subr.bf16.mxu0 %v4100_v20 }
  0x61   :  { %1800 = vmatprep.subr.bf16.mxu1 %v4103_v21 }
  0x63   :  { %3995 = vset.pattern.permute.xlu1 %v4489_v2 }
  0x64   :  { %142 = vperm.xlu1 %3995, %v75_v14  }
  0x68   :  { %3996 = vset.pattern.permute.xlu1 %v4488_v1 }
  0x69   :  { %310 = vperm.xlu1 %3996, %v75_v14  }
  0x6d   :  { %314 = vperm.xlu1 %3996, %v4601_v51  }
  0x71   :  { %3997 = vset.pattern.permute.xlu1 %v4489_v2 }
  0x72   :  { %157 = vperm.xlu1 %3997, %v78_v22  }
  0x76   :  { %3999 = vset.pattern.permute.xlu1 %v4488_v1  ;;  %v339_v1 = vsub.s32 7, %v4630_v24 }
  0x77   :  { %322 = vperm.xlu1 %3999, %v78_v22  }
  0x78   :  { %v340_v35 = vrot.slane %v79_v25, %v339_v1 }
  0x7a   :  { %v4665_v43 = vrot.slane %v340_v35, %v4636_v26  ;;  %v4148_v26 = vld [vmem:[#allocation3 + $0x1ec] ss:$16 sps:$4 sm:$0xff]  }
  0x7b   :  { %4000 = vset.pattern.permute.xlu1 %v4489_v2  ;;  %v4644_v2 = vsub.s32 0, %v4630_v24  ;;  %v4145_v24 = vld [vmem:[#allocation3 + $0x20c] ss:$16 sps:$4 sm:$0xff]  }
  0x7d   :  { %5873 = vst [vmem:[#allocation15_spill] sm:$0xff] %v4644_v2  ;;  %v164_v36 = vrot.slane %v79_v25, %v4644_v2  ;;  %v4671_v45 = vrot.slane %v168_v37, %v4644_v2  ;;  %v4674_v46 = vrot.slane %v172_v38, %v4644_v2  ;;  %v4677_v47 = vrot.slane %v176_v39, %v4644_v2 }
  0x7e   :  { %v4697_v61 = vrot.slane %v489_v48, %v4644_v2 }
  0x7f   :  { %v4668_v44 = vrot.slane %v164_v36, %v4644_v2 }
  0x9c   :  { %v263_v49 = vpop.permute.xlu1 %262  ;;  %v83_v50 = vpop.permute.xlu0 %82 }
  0x9d   :  { %v361_v51 = vmul.f32 %v4656_v40, %v263_v49  ;;  %v362_v52 = vmul.f32 %v4659_v41, %v263_v49  ;;  %v363_v53 = vmul.f32 %v4662_v42, %v263_v49  ;;  %v364_v54 = vmul.f32 %v4665_v43, %v263_v49 }
  0x9e   :  { %v197_v55 = vmul.f32 %v4668_v44, %v83_v50  ;;  %v198_v56 = vmul.f32 %v4671_v45, %v83_v50  ;;  %v199_v57 = vmul.f32 %v4674_v46, %v83_v50  ;;  %v200_v58 = vmul.f32 %v4677_v47, %v83_v50 }
  0xa0   :  { %v425_v63 = vadd.f32 %v361_v51, %v197_v55  ;;  %v427_v0 = vadd.f32 %v363_v53, %v199_v57  ;;  %v267_v3 = vpop.permute.xlu1 %266  ;;  %v88_v4 = vpop.permute.xlu0 %87  ;;  %v426_v5 = vadd.f32 %v362_v52, %v198_v56  ;;  %v428_v6 = vadd.f32 %v364_v54, %v200_v58 }
  0xa1   :  { %v365_v7 = vmul.f32 %v4656_v40, %v267_v3  ;;  %v366_v8 = vmul.f32 %v4659_v41, %v267_v3  ;;  %v367_v9 = vmul.f32 %v4662_v42, %v267_v3  ;;  %v368_v10 = vmul.f32 %v4665_v43, %v267_v3 }
  0xa2   :  { %v201_v11 = vmul.f32 %v4668_v44, %v88_v4  ;;  %v202_v12 = vmul.f32 %v4671_v45, %v88_v4  ;;  %v203_v13 = vmul.f32 %v4674_v46, %v88_v4  ;;  %v204_v14 = vmul.f32 %v4677_v47, %v88_v4 }
  0xa3   :  { %v512_v17 = vadd.f32 %v4691_v59, %v426_v5  ;;  %v514_v19 = vadd.f32 %v4694_v60, %v428_v6  ;;  %v511_v25 = vadd.f32 %v4697_v61, %v425_v63  ;;  %v513_v28 = vadd.f32 %v4700_v62, %v427_v0 }
  0xa4   :  { %v93_v15 = vpop.permute.xlu0 %92  ;;  %v430_v16 = vadd.f32 %v366_v8, %v202_v12  ;;  %v432_v18 = vadd.f32 %v368_v10, %v204_v14  ;;  %v429_v20 = vadd.f32 %v365_v7, %v201_v11  ;;  %v431_v21 = vadd.f32 %v367_v9, %v203_v13 }
  0xa5   :  { %v98_v22 = vpop.permute.xlu1 %97  ;;  %v205_v1 = vmul.f32 %v4668_v44, %v93_v15  ;;  %v206_v30 = vmul.f32 %v4671_v45, %v93_v15  ;;  %v207_v31 = vmul.f32 %v4674_v46, %v93_v15  ;;  %v208_v32 = vmul.f32 %v4677_v47, %v93_v15 }
  0xa6   :  { %v209_v33 = vmul.f32 %v4668_v44, %v98_v22  ;;  %v210_v34 = vmul.f32 %v4671_v45, %v98_v22  ;;  %v516_v35 = vadd.f32 %v4691_v59, %v430_v16  ;;  %v518_v36 = vadd.f32 %v4694_v60, %v432_v18 }
  0xa7   :  { %v211_v37 = vmul.f32 %v4674_v46, %v98_v22  ;;  %v212_v38 = vmul.f32 %v4677_v47, %v98_v22  ;;  %v576_v39 = vmax.f32 %v512_v17, 0.0  ;;  %v578_v48 = vmax.f32 %v514_v19, 0.0 }
  0xa8   :  { %v580_v50 = vmax.f32 %v516_v35, 0.0  ;;  %v582_v51 = vmax.f32 %v518_v36, 0.0  ;;  %v515_v52 = vadd.f32 %v4697_v61, %v429_v20  ;;  %v517_v53 = vadd.f32 %v4700_v62, %v431_v21 }
  0xa9   :  { %v271_v49 = vpop.permute.xlu0 %270  ;;  %v575_v7 = vmax.f32 %v511_v25, 0.0  ;;  %v577_v8 = vmax.f32 %v513_v28, 0.0  ;;  %v4098_v25 = vld [vmem:[#allocation3 + $0xe8] ss:$16 sps:$4 sm:$0xff]  }
  0xaa   :  { %v275_v54 = vpop.permute.xlu1 %274  ;;  %v369_v55 = vmul.f32 %v4656_v40, %v271_v49  ;;  %v370_v56 = vmul.f32 %v4659_v41, %v271_v49  ;;  %v371_v57 = vmul.f32 %v4662_v42, %v271_v49  ;;  %v372_v58 = vmul.f32 %v4665_v43, %v271_v49  ;;  %v4101_v28 = vld [vmem:[#allocation3 + $0x2e8] ss:$16 sps:$4 sm:$0xff]  }
  0xab   :  { %v373_v63 = vmul.f32 %v4656_v40, %v275_v54  ;;  %v374_v0 = vmul.f32 %v4659_v41, %v275_v54  ;;  %v375_v3 = vmul.f32 %v4662_v42, %v275_v54  ;;  %v376_v4 = vmul.f32 %v4665_v43, %v275_v54 }
  0xac   :  { %v433_v5 = vadd.f32 %v369_v55, %v205_v1  ;;  %v434_v6 = vadd.f32 %v370_v56, %v206_v30  ;;  %v435_v11 = vadd.f32 %v371_v57, %v207_v31  ;;  %v436_v12 = vadd.f32 %v372_v58, %v208_v32  ;;  %v4106_v32 = vld [vmem:[#allocation3 + $0xcc] ss:$16 sps:$4 sm:$0xff]  }
  0xad   :  { %v438_v9 = vadd.f32 %v374_v0, %v210_v34  ;;  %v440_v10 = vadd.f32 %v376_v4, %v212_v38  ;;  %v4734_v13 = vpack.c.bf16 %v580_v50, %v576_v39  ;;  %v4736_v14 = vpack.c.bf16 %v582_v51, %v578_v48  ;;  %v287_v17 = vpop.permute.xlu0 %286 }
  0xae   :  { %v579_v15 = vmax.f32 %v515_v52, 0.0  ;;  %v581_v16 = vmax.f32 %v517_v53, 0.0  ;;  %v437_v18 = vadd.f32 %v373_v63, %v209_v33  ;;  %v439_v19 = vadd.f32 %v375_v3, %v211_v37  ;;  %v4109_v33 = vld [vmem:[#allocation3 + $0x2cc] ss:$16 sps:$4 sm:$0xff]   ;;  %v4104_v53 = vld [vmem:[#allocation3 + $0xc8] ss:$16 sps:$4 sm:$0xff]  }
  0xaf   :  { %v103_v20 = vpop.permute.xlu1 %102  ;;  %v4739_v21 = vmul.f32 %v4656_v40, %v287_v17  ;;  %v4742_v22 = vmul.f32 %v4659_v41, %v287_v17  ;;  %1493 = vmatprep.mubr.bf16.mxu0 %v4734_v13  ;;  %1606 = vmatprep.mubr.bf16.mxu1 %v4736_v14  ;;  %v4751_v31 = vmul.f32 %v4662_v42, %v287_v17 }
  0xb0   :  { %v4746_v1 = vpack.c.bf16 %v579_v15, %v575_v7  ;;  %v4748_v30 = vpack.c.bf16 %v581_v16, %v577_v8  ;;  %v213_v34 = vmul.f32 %v4668_v44, %v103_v20  ;;  %v214_v35 = vmul.f32 %v4671_v45, %v103_v20 }
  0xb1   :  { %v4756_v36 = vmul.f32 %v4665_v43, %v287_v17  ;;  %v520_v37 = vadd.f32 %v4691_v59, %v434_v6  ;;  %v524_v38 = vadd.f32 %v4691_v59, %v438_v9  ;;  %v522_v39 = vadd.f32 %v4694_v60, %v436_v12  ;;  %v4107_v6 = vld [vmem:[#allocation3 + $0x2c8] ss:$16 sps:$4 sm:$0xff]   ;;  %v4112_v17 = vld [vmem:[#allocation3 + $0xac] ss:$16 sps:$4 sm:$0xff]  }
  0xb2   :  { %1494 = vmatmul.mubr.bf16.vlgmr.msra.gmra.mxu0 %v4746_v1  ;;  %1607 = vmatmul.mubr.bf16.vlgmr.msra.gmra.mxu1 %v4748_v30  ;;  %v526_v48 = vadd.f32 %v4694_v60, %v440_v10  ;;  %v519_v50 = vadd.f32 %v4697_v61, %v433_v5  ;;  %v523_v51 = vadd.f32 %v4697_v61, %v437_v18  ;;  %v108_v63 = vpop.permute.xlu0 %107 }
  0xb3   :  { %v584_v49 = vmax.f32 %v520_v37, 0.0  ;;  %v521_v52 = vadd.f32 %v4700_v62, %v435_v11  ;;  %1688 = vmatpush1.bf16.msra.mxu0 %v4098_v25  ;;  %1801 = vmatpush1.bf16.msra.mxu1 %v4101_v28  ;;  %v588_v55 = vmax.f32 %v524_v38, 0.0  ;;  %v586_v56 = vmax.f32 %v522_v39, 0.0  ;;  %v4110_v38 = vld [vmem:[#allocation3 + $0xa8] ss:$16 sps:$4 sm:$0xff]  }
  0xb4   :  { %v279_v54 = vpop.permute.xlu1 %278  ;;  %v590_v57 = vmax.f32 %v526_v48, 0.0  ;;  %v525_v58 = vadd.f32 %v4700_v62, %v439_v19  ;;  %1689 = vmatprep.subr.bf16.mxu0 %v4106_v32  ;;  %1802 = vmatprep.subr.bf16.mxu1 %v4109_v33  ;;  %v215_v0 = vmul.f32 %v4674_v46, %v103_v20  ;;  %v216_v3 = vmul.f32 %v4677_v47, %v103_v20 }
  0xb5   :  { %v377_v4 = vmul.f32 %v4656_v40, %v279_v54  ;;  %v378_v5 = vmul.f32 %v4659_v41, %v279_v54  ;;  %v4772_v7 = vpack.c.bf16 %v588_v55, %v584_v49  ;;  %v583_v9 = vmax.f32 %v519_v50, 0.0 }
  0xb6   :  { %v4774_v8 = vpack.c.bf16 %v590_v57, %v586_v56  ;;  %v587_v10 = vmax.f32 %v523_v51, 0.0  ;;  %v379_v11 = vmul.f32 %v4662_v42, %v279_v54  ;;  %v380_v12 = vmul.f32 %v4665_v43, %v279_v54  ;;  %v113_v32 = vpop.permute.xlu0 %112  ;;  %v4115_v51 = vld [vmem:[#allocation3 + $0x2ac] ss:$16 sps:$4 sm:$0xff]   ;;  %v4113_v56 = vld [vmem:[#allocation3 + $0x2a8] ss:$16 sps:$4 sm:$0xff]  }
  0xb7   :  { %v441_v15 = vadd.f32 %v377_v4, %v213_v34  ;;  %v442_v16 = vadd.f32 %v378_v5, %v214_v35  ;;  %1690 = vmatpush1.bf16.msra.mxu0 %v4104_v53  ;;  %1503 = vmatprep.mubr.bf16.mxu0 %v4772_v7  ;;  %v585_v19 = vmax.f32 %v521_v52, 0.0  ;;  %v589_v20 = vmax.f32 %v525_v58, 0.0  ;;  %v4118_v57 = vld [vmem:[#allocation3 + $0x8c] ss:$16 sps:$4 sm:$0xff]  }
  0xb8   :  { %1616 = vmatprep.mubr.bf16.mxu1 %v4774_v8  ;;  %v4780_v18 = vpack.c.bf16 %v587_v10, %v583_v9  ;;  %v283_v25 = vpop.permute.xlu1 %282  ;;  %v217_v28 = vmul.f32 %v4668_v44, %v108_v63  ;;  %1803 = vmatpush1.bf16.msra.mxu1 %v4107_v6  ;;  %v218_v48 = vmul.f32 %v4671_v45, %v108_v63  ;;  %v4121_v9 = vld [vmem:[#allocation3 + $0x28c] ss:$16 sps:$4 sm:$0xff]  }
  0xb9   :  { %v381_v33 = vmul.f32 %v4656_v40, %v283_v25  ;;  %v382_v37 = vmul.f32 %v4659_v41, %v283_v25  ;;  %v383_v34 = vmul.f32 %v4662_v42, %v283_v25  ;;  %v384_v35 = vmul.f32 %v4665_v43, %v283_v25  ;;  %1691 = vmatprep.subr.bf16.mxu0 %v4112_v17 }
  0xba   :  { %1504 = vmatmul.mubr.bf16.gmra.mxu0 %v4780_v18  ;;  %v4788_v39 = vpack.c.bf16 %v589_v20, %v585_v19  ;;  %v219_v49 = vmul.f32 %v4674_v46, %v108_v63  ;;  %v220_v50 = vmul.f32 %v4677_v47, %v108_v63  ;;  %v443_v52 = vadd.f32 %v379_v11, %v215_v0 }
  0xbb   :  { %v444_v53 = vadd.f32 %v380_v12, %v216_v3  ;;  %v445_v54 = vadd.f32 %v381_v33, %v217_v28  ;;  %v222_v55 = vmul.f32 %v4671_v45, %v113_v32  ;;  %v446_v58 = vadd.f32 %v382_v37, %v218_v48  ;;  %1692 = vmatpush1.bf16.msra.mxu0 %v4110_v38  ;;  %v4116_v12 = vld [vmem:[#allocation3 + $0x88] ss:$16 sps:$4 sm:$0xff]   ;;  %v4124_v28 = vld [vmem:[#allocation3 + $0x6c] ss:$16 sps:$4 sm:$0xff]  }
  0xbc   :  { %1617 = vmatmul.mubr.bf16.gmra.mxu1 %v4788_v39  ;;  %v448_v4 = vadd.f32 %v384_v35, %v220_v50  ;;  %v221_v5 = vmul.f32 %v4668_v44, %v113_v32  ;;  %v224_v6 = vmul.f32 %v4677_v47, %v113_v32  ;;  %v447_v10 = vadd.f32 %v383_v34, %v219_v49  ;;  %v4127_v48 = vld [vmem:[#allocation3 + $0x26c] ss:$16 sps:$4 sm:$0xff]  }
  0xbd   :  { %v118_v63 = vpop.permute.xlu1 %117  ;;  %v223_v0 = vmul.f32 %v4674_v46, %v113_v32  ;;  %v450_v3 = vadd.f32 %v4742_v22, %v222_v55  ;;  %v528_v11 = vadd.f32 %v4691_v59, %v442_v16  ;;  %1804 = vmatprep.subr.bf16.mxu1 %v4115_v51  ;;  %v532_v32 = vadd.f32 %v4691_v59, %v446_v58  ;;  %v4119_v16 = vld [vmem:[#allocation3 + $0x288] ss:$16 sps:$4 sm:$0xff]   ;;  %v128_v55 = vpop.permute.xlu0 %127 }
  0xbe   :  { %v225_v17 = vmul.f32 %v4668_v44, %v118_v63  ;;  %v226_v19 = vmul.f32 %v4671_v45, %v118_v63  ;;  %v227_v20 = vmul.f32 %v4674_v46, %v118_v63  ;;  %v228_v25 = vmul.f32 %v4677_v47, %v118_v63  ;;  %1805 = vmatpush1.bf16.msra.mxu1 %v4113_v56 }
  0xbf   :  { %v452_v33 = vadd.f32 %v4756_v36, %v224_v6  ;;  %v530_v22 = vadd.f32 %v4694_v60, %v444_v53  ;;  %1693 = vmatprep.subr.bf16.mxu0 %v4118_v57  ;;  %v534_v37 = vadd.f32 %v4694_v60, %v448_v4  ;;  %v527_v34 = vadd.f32 %v4697_v61, %v441_v15  ;;  %v4122_v53 = vld [vmem:[#allocation3 + $0x68] ss:$16 sps:$4 sm:$0xff]  }
  0xc0   :  { %v531_v35 = vadd.f32 %v4697_v61, %v445_v54  ;;  %v529_v38 = vadd.f32 %v4700_v62, %v443_v52  ;;  %1806 = vmatprep.subr.bf16.mxu1 %v4121_v9  ;;  %v592_v49 = vmax.f32 %v528_v11, 0.0  ;;  %v596_v50 = vmax.f32 %v532_v32, 0.0  ;;  %1694 = vmatpush1.bf16.msra.mxu0 %v4116_v12 }
  0xc1   :  { %v594_v36 = vmax.f32 %v530_v22, 0.0  ;;  %v533_v51 = vadd.f32 %v4700_v62, %v447_v10  ;;  %v598_v57 = vmax.f32 %v534_v37, 0.0  ;;  %v591_v58 = vmax.f32 %v527_v34, 0.0  ;;  %1695 = vmatprep.subr.bf16.mxu0 %v4124_v28  ;;  %v4824_v34 = vpop.permute.xlu0 %302 }
  0xc2   :  { %v291_v56 = vpop.permute.xlu1 %290  ;;  %v595_v4 = vmax.f32 %v531_v35, 0.0  ;;  %v593_v6 = vmax.f32 %v529_v38, 0.0  ;;  %1807 = vmatpush1.bf16.msra.mxu1 %v4119_v16  ;;  %v4816_v63 = vpack.c.bf16 %v596_v50, %v592_v49  ;;  %v449_v32 = vadd.f32 %v4739_v21, %v221_v5  ;;  %v4125_v35 = vld [vmem:[#allocation3 + $0x268] ss:$16 sps:$4 sm:$0xff]   ;;  %v4130_v38 = vld [vmem:[#allocation3 + $0x4c] ss:$16 sps:$4 sm:$0xff]  }
  0xc3   :  { %v389_v15 = vmul.f32 %v4656_v40, %v291_v56  ;;  %v390_v52 = vmul.f32 %v4659_v41, %v291_v56  ;;  %v391_v54 = vmul.f32 %v4662_v42, %v291_v56  ;;  %v392_v9 = vmul.f32 %v4665_v43, %v291_v56  ;;  %1808 = vmatprep.subr.bf16.mxu1 %v4127_v48  ;;  %v4128_v48 = vld [vmem:[#allocation3 + $0x48] ss:$16 sps:$4 sm:$0xff]  }
  0xc4   :  { %v4818_v10 = vpack.c.bf16 %v598_v57, %v594_v36  ;;  %v4820_v11 = vpack.c.bf16 %v595_v4, %v591_v58  ;;  %v597_v12 = vmax.f32 %v533_v51, 0.0  ;;  %v451_v28 = vadd.f32 %v4751_v31, %v223_v0  ;;  %1696 = vmatpush1.bf16.msra.mxu0 %v4122_v53  ;;  %1513 = vmatprep.mubr.bf16.mxu0 %v4816_v63 }
  0xc5   :  { %v454_v22 = vadd.f32 %v390_v52, %v226_v19  ;;  %v456_v37 = vadd.f32 %v392_v9, %v228_v25  ;;  %v453_v16 = vadd.f32 %v389_v15, %v225_v17  ;;  %v455_v49 = vadd.f32 %v391_v54, %v227_v20  ;;  %v4133_v19 = vld [vmem:[#allocation3 + $0x24c] ss:$16 sps:$4 sm:$0xff]   ;;  %1697 = vmatprep.subr.bf16.mxu0 %v4130_v38 }
  0xc6   :  { %5875 = vst [vmem:[#allocation17_spill] sm:$0xff] %v4820_v11  ;;  %1626 = vmatprep.mubr.bf16.mxu1 %v4818_v10  ;;  %v4828_v50 = vpack.c.bf16 %v597_v12, %v593_v6  ;;  %1514 = vmatmul.mubr.bf16.gmra.mxu0 %v4820_v11  ;;  %v536_v31 = vadd.f32 %v4691_v59, %v450_v3  ;;  %v4136_v25 = vld [vmem:[#allocation3 + $0x2c] ss:$16 sps:$4 sm:$0xff]   ;;  %v4131_v6 = vld [vmem:[#allocation3 + $0x248] ss:$16 sps:$4 sm:$0xff]   ;;  %v133_v12 = vpop.permute.xlu0 %132 }
  0xc7   :  { %v123_v21 = vpop.permute.xlu1 %122  ;;  %v540_v5 = vadd.f32 %v4691_v59, %v454_v22  ;;  %v538_v0 = vadd.f32 %v4694_v60, %v452_v33  ;;  %v4836_v17 = vmul.f32 %v4668_v44, %v128_v55  ;;  %v4839_v20 = vmul.f32 %v4671_v45, %v128_v55  ;;  %1809 = vmatpush1.bf16.msra.mxu1 %v4125_v35  ;;  %v4134_v22 = vld [vmem:[#allocation3 + $0x28] ss:$16 sps:$4 sm:$0xff]  }
  0xc8   :  { %5876 = vst [vmem:[#allocation18_spill] sm:$0xff] %v4828_v50  ;;  %1627 = vmatmul.mubr.bf16.gmra.mxu1 %v4828_v50  ;;  %v4842_v36 = vmul.f32 %v4674_v46, %v128_v55  ;;  %v600_v51 = vmax.f32 %v536_v31, 0.0  ;;  %v542_v3 = vadd.f32 %v4694_v60, %v456_v37  ;;  %v535_v33 = vadd.f32 %v4697_v61, %v449_v32 }
  0xc9   :  { %v604_v53 = vmax.f32 %v540_v5, 0.0  ;;  %v602_v56 = vmax.f32 %v538_v0, 0.0  ;;  %v539_v57 = vadd.f32 %v4697_v61, %v453_v16  ;;  %v537_v58 = vadd.f32 %v4700_v62, %v451_v28  ;;  %1698 = vmatpush1.bf16.msra.mxu0 %v4128_v48  ;;  %1810 = vmatprep.subr.bf16.mxu1 %v4133_v19 }
  0xca   :  { %v541_v4 = vadd.f32 %v4700_v62, %v455_v49  ;;  %v229_v15 = vmul.f32 %v4668_v44, %v123_v21  ;;  %v236_v52 = vmul.f32 %v4677_v47, %v128_v55  ;;  %v606_v9 = vmax.f32 %v542_v3, 0.0  ;;  %1699 = vmatprep.subr.bf16.mxu0 %v4136_v25  ;;  %v4139_v25 = vld [vmem:[#allocation3 + $0x22c] ss:$16 sps:$4 sm:$0xff]  }
  0xcb   :  { %v4851_v54 = vpack.c.bf16 %v604_v53, %v600_v51  ;;  %v599_v37 = vmax.f32 %v535_v33, 0.0  ;;  %v603_v35 = vmax.f32 %v539_v57, 0.0  ;;  %v601_v38 = vmax.f32 %v537_v58, 0.0  ;;  %1811 = vmatpush1.bf16.msra.mxu1 %v4131_v6  ;;  %v4142_v6 = vld [vmem:[#allocation3 + $0xc] ss:$16 sps:$4 sm:$0xff]  }
  0xcc   :  { %v295_v32 = vpop.permute.xlu1 %294  ;;  %v605_v28 = vmax.f32 %v541_v4, 0.0  ;;  %v230_v16 = vmul.f32 %v4671_v45, %v123_v21  ;;  %v231_v49 = vmul.f32 %v4674_v46, %v123_v21  ;;  %v232_v48 = vmul.f32 %v4677_v47, %v123_v21  ;;  %1812 = vmatprep.subr.bf16.mxu1 %v4139_v25 }
  0xcd   :  { %5877 = vst [vmem:[#allocation19_spill] sm:$0xff] %v4851_v54  ;;  %v394_v55 = vmul.f32 %v4659_v41, %v295_v32  ;;  %1523 = vmatprep.mubr.bf16.mxu0 %v4851_v54  ;;  %v4858_v31 = vpack.c.bf16 %v606_v9, %v602_v56  ;;  %v4860_v5 = vpack.c.bf16 %v603_v35, %v599_v37  ;;  %v4137_v56 = vld [vmem:[#allocation3 + $0x228] ss:$16 sps:$4 sm:$0xff]   ;;  %v4881_v35 = vpop.permute.xlu0 %147  ;;  %v4151_v54 = vld [vmem:[#allocation3 + $0x3ec] ss:$16 sps:$4 sm:$0xff]  }
  0xce   :  { %v4862_v0 = vpack.c.bf16 %v605_v28, %v601_v38  ;;  %v401_v19 = vmul.f32 %v4656_v40, %v4824_v34  ;;  %v393_v51 = vmul.f32 %v4656_v40, %v295_v32  ;;  %v395_v53 = vmul.f32 %v4662_v42, %v295_v32  ;;  %1700 = vmatpush1.bf16.msra.mxu0 %v4134_v22  ;;  %v4140_v38 = vld [vmem:[#allocation3 + $0x8] ss:$16 sps:$4 sm:$0xff]  }
  0xcf   :  { %5878 = vst [vmem:[#allocation20_spill] sm:$0xff] %v4858_v31  ;;  %5879 = vst [vmem:[#allocation21_spill] sm:$0xff] %v4860_v5  ;;  %v396_v21 = vmul.f32 %v4665_v43, %v295_v32  ;;  %v402_v3 = vmul.f32 %v4659_v41, %v4824_v34  ;;  %v458_v33 = vadd.f32 %v394_v55, %v230_v16  ;;  %1636 = vmatprep.mubr.bf16.mxu1 %v4858_v31 }
  0xd0   :  { %5880 = vst [vmem:[#allocation22_spill] sm:$0xff] %v4862_v0  ;;  %1524 = vmatmul.mubr.bf16.gmra.mxu0 %v4860_v5  ;;  %v299_v57 = vpop.permute.xlu1 %298  ;;  %v403_v58 = vmul.f32 %v4662_v42, %v4824_v34  ;;  %v237_v4 = vmul.f32 %v4668_v44, %v133_v12  ;;  %1637 = vmatmul.mubr.bf16.gmra.mxu1 %v4862_v0 }
  0xd1   :  { %v397_v9 = vmul.f32 %v4656_v40, %v299_v57  ;;  %v398_v32 = vmul.f32 %v4659_v41, %v299_v57  ;;  %v399_v22 = vmul.f32 %v4662_v42, %v299_v57  ;;  %v400_v37 = vmul.f32 %v4665_v43, %v299_v57  ;;  %1813 = vmatpush1.bf16.msra.mxu1 %v4137_v56  ;;  %v4143_v57 = vld [vmem:[#allocation3 + $0x208] ss:$16 sps:$4 sm:$0xff]  }
  0xd2   :  { %v404_v28 = vmul.f32 %v4665_v43, %v4824_v34  ;;  %v238_v16 = vmul.f32 %v4671_v45, %v133_v12  ;;  %v239_v55 = vmul.f32 %v4674_v46, %v133_v12  ;;  %v240_v23 = vmul.f32 %v4677_v47, %v133_v12  ;;  %1701 = vmatprep.subr.bf16.mxu0 %v4142_v6 }
  0xd3   :  { %v460_v29 = vadd.f32 %v396_v21, %v232_v48  ;;  %v462_v27 = vadd.f32 %v398_v32, %v4839_v20  ;;  %v464_v2 = vadd.f32 %v400_v37, %v236_v52  ;;  %v457_v0 = vadd.f32 %v393_v51, %v229_v15  ;;  %1702 = vmatpush1.bf16.msra.mxu0 %v4140_v38  ;;  %v4146_v20 = vld [vmem:[#allocation3 + $0x1e8] ss:$16 sps:$4 sm:$0xff]  }
  0xd4   :  { %v459_v5 = vadd.f32 %v395_v53, %v231_v49  ;;  %v461_v31 = vadd.f32 %v397_v9, %v4836_v17  ;;  %v463_v34 = vadd.f32 %v399_v22, %v4842_v36  ;;  %v4891_v11 = vadd.f32 %v401_v19, %v237_v4  ;;  %1814 = vmatprep.subr.bf16.mxu1 %v4145_v24  ;;  %v4154_v36 = vld [vmem:[#allocation3 + $0x1cc] ss:$16 sps:$4 sm:$0xff]  }
  0xd5   :  { %v138_v50 = vpop.permute.xlu1 %137  ;;  %v544_v12 = vadd.f32 %v4691_v59, %v458_v33  ;;  %v548_v48 = vadd.f32 %v4691_v59, %v462_v27  ;;  %v466_v52 = vadd.f32 %v402_v3, %v238_v16  ;;  %v4895_v25 = vadd.f32 %v403_v58, %v239_v55  ;;  %v153_v27 = vpop.permute.xlu0 %152  ;;  %1815 = vmatpush1.bf16.msra.mxu1 %v4143_v57  ;;  %v4149_v33 = vld [vmem:[#allocation3 + $0x3e8] ss:$16 sps:$4 sm:$0xff]   ;;  %v4157_v55 = vld [vmem:[#allocation3 + $0x3cc] ss:$16 sps:$4 sm:$0xff]  }
  0xd6   :  { %v4897_v15 = vadd.f32 %v404_v28, %v240_v23  ;;  %v4901_v17 = vmul.f32 %v4668_v44, %v4881_v35  ;;  %v546_v51 = vadd.f32 %v4694_v60, %v460_v29  ;;  %v550_v53 = vadd.f32 %v4694_v60, %v464_v2  ;;  %1703 = vmatprep.subr.bf16.mxu0 %v4148_v26  ;;  %v4152_v2 = vld [vmem:[#allocation3 + $0x1c8] ss:$16 sps:$4 sm:$0xff]  }
  0xd7   :  { %v608_v49 = vmax.f32 %v544_v12, 0.0  ;;  %v612_v19 = vmax.f32 %v548_v48, 0.0  ;;  %v543_v21 = vadd.f32 %v4697_v61, %v457_v0  ;;  %v547_v23 = vadd.f32 %v4697_v61, %v461_v31  ;;  %1816 = vmatprep.subr.bf16.mxu1 %v4151_v54  ;;  %1704 = vmatpush2.bf16.msra.mxu0 %v4146_v20 }
  0xd8   :  { %v545_v3 = vadd.f32 %v4700_v62, %v459_v5  ;;  %v549_v56 = vadd.f32 %v4700_v62, %v463_v34  ;;  %v242_v24 = vmul.f32 %v4671_v45, %v138_v50  ;;  %v610_v29 = vmax.f32 %v546_v51, 0.0  ;;  %1705 = vmatprep.subr.bf16.mxu0 %v4154_v36  ;;  %v4155_v36 = vld [vmem:[#allocation3 + $0x3c8] ss:$16 sps:$4 sm:$0xff]  }
  0xd9   :  { %v4910_v58 = vpack.c.bf16 %v612_v19, %v608_v49  ;;  %v614_v4 = vmax.f32 %v550_v53, 0.0  ;;  %v607_v26 = vmax.f32 %v543_v21, 0.0  ;;  %v611_v9 = vmax.f32 %v547_v23, 0.0  ;;  %1817 = vmatpush2.bf16.msra.mxu1 %v4149_v33  ;;  %v4937_v20 = vpop.permute.xlu0 %318  ;;  %v4160_v53 = vld [vmem:[#allocation3 + $0x1ac] ss:$16 sps:$4 sm:$0xff]  }
  0xda   :  { %v307_v6 = vpop.permute.xlu1 %306  ;;  %v609_v0 = vmax.f32 %v545_v3, 0.0  ;;  %v613_v32 = vmax.f32 %v549_v56, 0.0  ;;  %v244_v31 = vmul.f32 %v4677_v47, %v138_v50  ;;  %v241_v57 = vmul.f32 %v4668_v44, %v138_v50  ;;  %v4163_v21 = vld [vmem:[#allocation3 + $0x3ac] ss:$16 sps:$4 sm:$0xff]   ;;  %v4158_v33 = vld [vmem:[#allocation3 + $0x1a8] ss:$16 sps:$4 sm:$0xff]   ;;  %1818 = vmatprep.subr.bf16.mxu1 %v4157_v55 }
  0xdb   :  { %5881 = vst [vmem:[#allocation23_spill] sm:$0xff] %v4910_v58  ;;  %v405_v5 = vmul.f32 %v4656_v40, %v307_v6  ;;  %v406_v54 = vmul.f32 %v4659_v41, %v307_v6  ;;  %v408_v22 = vmul.f32 %v4665_v43, %v307_v6  ;;  %1533 = vmatprep.mubr.bf16.mxu0 %v4910_v58 }
  0xdc   :  { %v407_v37 = vmul.f32 %v4662_v42, %v307_v6  ;;  %v4918_v38 = vpack.c.bf16 %v614_v4, %v610_v29  ;;  %v4920_v28 = vpack.c.bf16 %v611_v9, %v607_v26  ;;  %v4922_v16 = vpack.c.bf16 %v613_v32, %v609_v0  ;;  %1706 = vmatpush2.bf16.msra.mxu0 %v4152_v2  ;;  %v4166_v6 = vld [vmem:[#allocation3 + $0x18c] ss:$16 sps:$4 sm:$0xff]   ;;  %v4161_v32 = vld [vmem:[#allocation3 + $0x3a8] ss:$16 sps:$4 sm:$0xff]  }
  0xdd   :  { %v4927_v34 = vmul.f32 %v4671_v45, %v4881_v35  ;;  %v4931_v12 = vmul.f32 %v4674_v46, %v4881_v35  ;;  %v4935_v48 = vmul.f32 %v4677_v47, %v4881_v35  ;;  %v243_v49 = vmul.f32 %v4674_v46, %v138_v50  ;;  %1819 = vmatpush2.bf16.msra.mxu1 %v4155_v36 }
  0xde   :  { %5882 = vst [vmem:[#allocation24_spill] sm:$0xff] %v4918_v38  ;;  %5883 = vst [vmem:[#allocation25_spill] sm:$0xff] %v4920_v28  ;;  %v470_v19 = vadd.f32 %v406_v54, %v242_v24  ;;  %v472_v51 = vadd.f32 %v408_v22, %v244_v31  ;;  %1646 = vmatprep.mubr.bf16.mxu1 %v4918_v38  ;;  %1534 = vmatmul.mubr.bf16.gmra.mxu0 %v4920_v28  ;;  %v4169_v22 = vld [vmem:[#allocation3 + $0x38c] ss:$16 sps:$4 sm:$0xff]  }
  0xdf   :  { %5884 = vst [vmem:[#allocation26_spill] sm:$0xff] %v4922_v16  ;;  %v469_v23 = vadd.f32 %v405_v5, %v241_v57  ;;  %1647 = vmatmul.mubr.bf16.gmra.mxu1 %v4922_v16  ;;  %v4944_v35 = vmul.f32 %v4668_v44, %v153_v27  ;;  %v4947_v3 = vmul.f32 %v4671_v45, %v153_v27  ;;  %v143_v56 = vpop.permute.xlu1 %142  ;;  %v4172_v38 = vld [vmem:[#allocation3 + $0x16c] ss:$16 sps:$4 sm:$0xff]  }
  0xe0   :  { %v552_v50 = vadd.f32 %v4691_v59, %v466_v52  ;;  %v471_v24 = vadd.f32 %v407_v37, %v243_v49  ;;  %v4951_v29 = vmul.f32 %v4674_v46, %v153_v27  ;;  %v4954_v4 = vmul.f32 %v4677_v47, %v153_v27  ;;  %1707 = vmatprep.subr.bf16.mxu0 %v4160_v53  ;;  %v4164_v49 = vld [vmem:[#allocation3 + $0x188] ss:$16 sps:$4 sm:$0xff]  }
  0xe1   :  { %v4958_v2 = vmul.f32 %v4656_v40, %v4937_v20  ;;  %v245_v26 = vmul.f32 %v4668_v44, %v143_v56  ;;  %v246_v9 = vmul.f32 %v4671_v45, %v143_v56  ;;  %v247_v52 = vmul.f32 %v4674_v46, %v143_v56  ;;  %1820 = vmatprep.subr.bf16.mxu1 %v4163_v21 }
  0xe2   :  { %v4965_v0 = vmul.f32 %v4659_v41, %v4937_v20  ;;  %v556_v27 = vadd.f32 %v4691_v59, %v470_v19  ;;  %v616_v31 = vmax.f32 %v552_v50, 0.0  ;;  %v554_v5 = vadd.f32 %v4694_v60, %v4897_v15  ;;  %1708 = vmatpush2.bf16.msra.mxu0 %v4158_v33  ;;  %1821 = vmatpush2.bf16.msra.mxu1 %v4161_v32 }
  0xe3   :  { %v558_v54 = vadd.f32 %v4694_v60, %v472_v51  ;;  %v248_v37 = vmul.f32 %v4677_v47, %v143_v56  ;;  %v551_v55 = vadd.f32 %v4697_v61, %v4891_v11  ;;  %v555_v57 = vadd.f32 %v4697_v61, %v469_v23  ;;  %1709 = vmatprep.subr.bf16.mxu0 %v4166_v6  ;;  %v4167_v56 = vld [vmem:[#allocation3 + $0x388] ss:$16 sps:$4 sm:$0xff]  }
  0xe4   :  { %v553_v36 = vadd.f32 %v4700_v62, %v4895_v25  ;;  %v311_v19 = vpop.permute.xlu1 %310  ;;  %v620_v50 = vmax.f32 %v556_v27, 0.0  ;;  %v618_v15 = vmax.f32 %v554_v5, 0.0  ;;  %v557_v51 = vadd.f32 %v4700_v62, %v471_v24  ;;  %1822 = vmatprep.subr.bf16.mxu1 %v4169_v22 }
  0xe5   :  { %v622_v16 = vmax.f32 %v558_v54, 0.0  ;;  %v409_v53 = vmul.f32 %v4656_v40, %v311_v19  ;;  %v410_v21 = vmul.f32 %v4659_v41, %v311_v19  ;;  %v411_v11 = vmul.f32 %v4662_v42, %v311_v19 }
  0xe6   :  { %v412_v23 = vmul.f32 %v4665_v43, %v311_v19  ;;  %v4982_v25 = vpack.c.bf16 %v620_v50, %v616_v31  ;;  %v615_v27 = vmax.f32 %v551_v55, 0.0  ;;  %v619_v5 = vmax.f32 %v555_v57, 0.0  ;;  %1710 = vmatpush2.bf16.msra.mxu0 %v4164_v49  ;;  %v4170_v57 = vld [vmem:[#allocation3 + $0x168] ss:$16 sps:$4 sm:$0xff]   ;;  %1823 = vmatpush2.bf16.msra.mxu1 %v4167_v56  ;;  %v4181_v56 = vld [vmem:[#allocation3 + $0x34c] ss:$16 sps:$4 sm:$0xff]  }
  0xe7   :  { %v4984_v33 = vpack.c.bf16 %v622_v16, %v618_v15  ;;  %v419_v24 = vmul.f32 %v4662_v42, %v4937_v20  ;;  %v473_v6 = vadd.f32 %v409_v53, %v245_v26  ;;  %v474_v54 = vadd.f32 %v410_v21, %v246_v9  ;;  %v4173_v15 = vld [vmem:[#allocation3 + $0x368] ss:$16 sps:$4 sm:$0xff]   ;;  %1711 = vmatprep.subr.bf16.mxu0 %v4172_v38 }
  0xe8   :  { %v476_v28 = vadd.f32 %v412_v23, %v248_v37  ;;  %v475_v58 = vadd.f32 %v411_v11, %v247_v52  ;;  %1543 = vmatprep.mubr.bf16.mxu0 %v4982_v25  ;;  %v4990_v32 = vpack.c.bf16 %v619_v5, %v615_v27  ;;  %v617_v16 = vmax.f32 %v553_v36, 0.0  ;;  %v315_v55 = vpop.permute.xlu1 %314  ;;  %v4175_v52 = vld [vmem:[#allocation3 + $0x36c] ss:$16 sps:$4 sm:$0xff]  }
  0xe9   :  { %1656 = vmatprep.mubr.bf16.mxu1 %v4984_v33  ;;  %v621_v31 = vmax.f32 %v557_v51, 0.0  ;;  %v413_v22 = vmul.f32 %v4656_v40, %v315_v55  ;;  %v414_v19 = vmul.f32 %v4659_v41, %v315_v55  ;;  %v415_v26 = vmul.f32 %v4662_v42, %v315_v55  ;;  %v4178_v23 = vld [vmem:[#allocation3 + $0x14c] ss:$16 sps:$4 sm:$0xff]   ;;  %1824 = vmatprep.subr.bf16.mxu1 %v4175_v52 }
  0xea   :  { %v416_v9 = vmul.f32 %v4665_v43, %v315_v55  ;;  %1544 = vmatmul.mubr.bf16.gmra.mxu0 %v4990_v32  ;;  %v560_v49 = vadd.f32 %v4691_v59, %v474_v54  ;;  %v562_v36 = vadd.f32 %v4694_v60, %v476_v28  ;;  %v559_v50 = vadd.f32 %v4697_v61, %v473_v6 }
  0xeb   :  { %v4997_v37 = vpack.c.bf16 %v621_v31, %v617_v16  ;;  %v477_v51 = vadd.f32 %v413_v22, %v4901_v17  ;;  %v478_v53 = vadd.f32 %v414_v19, %v4927_v34  ;;  %v479_v21 = vadd.f32 %v415_v26, %v4931_v12  ;;  %1712 = vmatpush2.bf16.msra.mxu0 %v4170_v57  ;;  %v4176_v17 = vld [vmem:[#allocation3 + $0x148] ss:$16 sps:$4 sm:$0xff]  }
  0xec   :  { %v480_v11 = vadd.f32 %v416_v9, %v4935_v48  ;;  %v420_v27 = vmul.f32 %v4665_v43, %v4937_v20  ;;  %v482_v28 = vadd.f32 %v4965_v0, %v4947_v3  ;;  %v561_v5 = vadd.f32 %v4700_v62, %v475_v58  ;;  %v4184_v20 = vld [vmem:[#allocation3 + $0x12c] ss:$16 sps:$4 sm:$0xff]   ;;  %1825 = vmatpush2.bf16.msra.mxu1 %v4173_v15  ;;  %v4179_v16 = vld [vmem:[#allocation3 + $0x348] ss:$16 sps:$4 sm:$0xff]  }
  0xed   :  { %1657 = vmatmul.mubr.bf16.gmra.mxu1 %v4997_v37  ;;  %v158_v34 = vpop.permute.xlu1 %157  ;;  %v564_v12 = vadd.f32 %v4691_v59, %v478_v53  ;;  %v563_v38 = vadd.f32 %v4697_v61, %v477_v51  ;;  %v565_v6 = vadd.f32 %v4700_v62, %v479_v21  ;;  %v481_v3 = vadd.f32 %v4958_v2, %v4944_v35  ;;  %v4182_v51 = vld [vmem:[#allocation3 + $0x128] ss:$16 sps:$4 sm:$0xff]   ;;  %v4187_v53 = vld [vmem:[#allocation3 + $0x32c] ss:$16 sps:$4 sm:$0xff]  }
  0xee   :  { %v566_v48 = vadd.f32 %v4694_v60, %v480_v11  ;;  %v483_v0 = vadd.f32 %v419_v24, %v4951_v29  ;;  %v624_v54 = vmax.f32 %v560_v49, 0.0  ;;  %v626_v58 = vmax.f32 %v562_v36, 0.0  ;;  %1713 = vmatprep.subr.bf16.mxu0 %v4178_v23  ;;  %1826 = vmatprep.subr.bf16.mxu1 %v4181_v56 }
  0xef   :  { %v628_v31 = vmax.f32 %v564_v12, 0.0  ;;  %v623_v57 = vmax.f32 %v559_v50, 0.0  ;;  %v627_v22 = vmax.f32 %v563_v38, 0.0  ;;  %v484_v19 = vadd.f32 %v420_v27, %v4954_v4  ;;  %1714 = vmatpush2.bf16.msra.mxu0 %v4176_v17  ;;  %v4193_v27 = vld [vmem:[#allocation3 + $0x30c] ss:$16 sps:$4 sm:$0xff]  }
  0xf0   :  { %v630_v55 = vmax.f32 %v566_v48, 0.0  ;;  %v625_v26 = vmax.f32 %v561_v5, 0.0  ;;  %v629_v9 = vmax.f32 %v565_v6, 0.0  ;;  %v568_v52 = vadd.f32 %v4691_v59, %v482_v28  ;;  %1715 = vmatprep.subr.bf16.mxu0 %v4184_v20  ;;  %1827 = vmatpush2.bf16.msra.mxu1 %v4179_v16  ;;  %v4191_v38 = vld [vmem:[#allocation3 + $0x308] ss:$16 sps:$4 sm:$0xff]  }
  0xf1   :  { %v257_v35 = vmul.f32 %v4668_v44, %v158_v34  ;;  %v5022_v29 = vpack.c.bf16 %v628_v31, %v624_v54  ;;  %v5026_v24 = vpack.c.bf16 %v627_v22, %v623_v57  ;;  %v258_v49 = vmul.f32 %v4671_v45, %v158_v34  ;;  %v4185_v45 = vld [vmem:[#allocation3 + $0x328] ss:$16 sps:$4 sm:$0xff]   ;;  %1828 = vmatprep.subr.bf16.mxu1 %v4187_v53  ;;  %v4196_v54 = vld [vmem:[#allocation6 + $0xe4] ss:$16 sps:$4 sm:$0xff]   ;;  %v4194_v57 = vld [vmem:[#allocation6 + $0xe0] ss:$16 sps:$4 sm:$0xff]  }
  0xf2   :  { %v5024_v2 = vpack.c.bf16 %v630_v55, %v626_v58  ;;  %v259_v36 = vmul.f32 %v4674_v46, %v158_v34  ;;  %v260_v4 = vmul.f32 %v4677_v47, %v158_v34  ;;  %v323_v50 = vpop.permute.xlu1 %322  ;;  %v5031_v15 = vpack.c.bf16 %v629_v9, %v625_v26  ;;  %v4199_v22 = vld [vmem:[#allocation6 + $0xc4] ss:$16 sps:$4 sm:$0xff]   ;;  %v4200_v9 = vld [vmem:[#allocation6 + $0xa0] ss:$16 sps:$4 sm:$0xff]  }
  0xf3   :  { %v421_v44 = vmul.f32 %v4656_v40, %v323_v50  ;;  %v422_v21 = vmul.f32 %v4659_v41, %v323_v50  ;;  %v423_v11 = vmul.f32 %v4662_v42, %v323_v50  ;;  %v424_v23 = vmul.f32 %v4665_v43, %v323_v50  ;;  %1553 = vmatprep.mubr.bf16.mxu0 %v5022_v29  ;;  %v4190_v40 = vld [vmem:[#allocation3 + $0x10c] ss:$16 sps:$4 sm:$0xff]   ;;  %v4188_v43 = vld [vmem:[#allocation3 + $0x108] ss:$16 sps:$4 sm:$0xff]   ;;  %v4202_v26 = vld [vmem:[#allocation6 + $0xa4] ss:$16 sps:$4 sm:$0xff]  }
  0xf4   :  { %1666 = vmatprep.mubr.bf16.mxu1 %v5024_v2  ;;  %1554 = vmatmul.mubr.bf16.gmra.mxu0 %v5026_v24  ;;  %v570_v46 = vadd.f32 %v4694_v60, %v484_v19  ;;  %v567_v47 = vadd.f32 %v4697_v61, %v481_v3  ;;  %v569_v56 = vadd.f32 %v4700_v62, %v483_v0  ;;  %v632_v6 = vmax.f32 %v568_v52, 0.0  ;;  %v4197_v19 = vld [vmem:[#allocation6 + $0xc0] ss:$16 sps:$4 sm:$0xff]   ;;  %v4250_v50 = vld [vmem:[#allocation6 + $0x2c4] ss:$16 sps:$4 sm:$0xff]  }
  0xf5   :  { %v485_v41 = vadd.f32 %v421_v44, %v257_v35  ;;  %v486_v28 = vadd.f32 %v422_v21, %v258_v49  ;;  %v487_v42 = vadd.f32 %v423_v11, %v259_v36  ;;  %v488_v5 = vadd.f32 %v424_v23, %v260_v4  ;;  %1667 = vmatmul.mubr.bf16.gmra.mxu1 %v5031_v15  ;;  %v5886_v52 = vld [vmem:[#allocation18_spill] sm:$0xff]  ;;  %v5887_v35 = vld [vmem:[#allocation19_spill] sm:$0xff]  ;;  %v5892_v21 = vld [vmem:[#allocation24_spill] sm:$0xff] }
  0xf6   :  { %1716 = vmatpush2.bf16.msra.mxu0 %v4182_v51  ;;  %1829 = vmatpush2.bf16.msra.mxu1 %v4185_v45  ;;  %v634_v20 = vmax.f32 %v570_v46, 0.0  ;;  %v631_v3 = vmax.f32 %v567_v47, 0.0  ;;  %v633_v0 = vmax.f32 %v569_v56, 0.0  ;;  %v4212_v49 = vld [vmem:[#allocation6 + $0x20] ss:$16 sps:$4 sm:$0xff]  }
  0xf7   :  { %v572_v17 = vadd.f32 %v4691_v59, %v486_v28  ;;  %v574_v34 = vadd.f32 %v4694_v60, %v488_v5  ;;  %v571_v12 = vadd.f32 %v4697_v61, %v485_v41  ;;  %v573_v48 = vadd.f32 %v4700_v62, %v487_v42  ;;  %1717 = vmatprep.subr.bf16.mxu0 %v4190_v40  ;;  %v4242_v36 = vld [vmem:[#allocation6 + $0x2e0] ss:$16 sps:$4 sm:$0xff]   ;;  %v4217_v4 = vld [vmem:[#allocation6 + $0x4] ss:$16 sps:$4 sm:$0xff]  }
  0xf8   :  { %1830 = vmatprep.subr.bf16.mxu1 %v4193_v27  ;;  %v5889_v51 = vld [vmem:[#allocation21_spill] sm:$0xff]  ;;  %v5890_v53 = vld [vmem:[#allocation22_spill] sm:$0xff]  ;;  %v5891_v44 = vld [vmem:[#allocation23_spill] sm:$0xff] }
  0xf9   :  { %v636_v58 = vmax.f32 %v572_v17, 0.0  ;;  %v638_v16 = vmax.f32 %v574_v34, 0.0  ;;  %v635_v31 = vmax.f32 %v571_v12, 0.0  ;;  %v637_v55 = vmax.f32 %v573_v48, 0.0  ;;  %v4215_v11 = vld [vmem:[#allocation6] ss:$16 sps:$4 sm:$0xff]  }
  0xfa   :  { %1718 = vmatpush2.bf16.msra.mxu0 %v4188_v43  ;;  %1831 = vmatpush2.bf16.msra.mxu1 %v4191_v38  ;;  %v4248_v23 = vld [vmem:[#allocation6 + $0x2c0] ss:$16 sps:$4 sm:$0xff]   ;;  %v4220_v45 = vld [vmem:[#allocation6 + $0x1e4] ss:$16 sps:$4 sm:$0xff]  }
  0xfb   :  { %v5048_v59 = vpack.c.bf16 %v636_v58, %v632_v6  ;;  %v5050_v60 = vpack.c.bf16 %v638_v16, %v634_v20  ;;  %v5052_v61 = vpack.c.bf16 %v635_v31, %v631_v3  ;;  %v5054_v62 = vpack.c.bf16 %v637_v55, %v633_v0  ;;  %2799 = vmatprep.subr.bf16.mxu0 %v4196_v54  ;;  %v4256_v46 = vld [vmem:[#allocation6 + $0x2a4] ss:$16 sps:$4 sm:$0xff]   ;;  %v4218_v47 = vld [vmem:[#allocation6 + $0x1e0] ss:$16 sps:$4 sm:$0xff]  }
  0xfc   :  { %v4254_v56 = vld [vmem:[#allocation6 + $0x2a0] ss:$16 sps:$4 sm:$0xff]   ;;  %v4223_v40 = vld [vmem:[#allocation6 + $0x1c4] ss:$16 sps:$4 sm:$0xff]  }
  0xfd   :  { %1563 = vmatprep.mubr.bf16.mxu0 %v5048_v59  ;;  %1676 = vmatprep.mubr.bf16.mxu1 %v5050_v60  ;;  %v5893_v27 = vld [vmem:[#allocation25_spill] sm:$0xff]  ;;  %v5894_v41 = vld [vmem:[#allocation26_spill] sm:$0xff] }
  0xfe   :  { %1564 = vmatmul.mubr.bf16.gmra.mxu0 %v5052_v61  ;;  %1677 = vmatmul.mubr.bf16.gmra.mxu1 %v5054_v62  ;;  %v4221_v28 = vld [vmem:[#allocation6 + $0x1c0] ss:$16 sps:$4 sm:$0xff]   ;;  %v4226_v42 = vld [vmem:[#allocation6 + $0x1a4] ss:$16 sps:$4 sm:$0xff]  }
  0xff   :  { %1719 = vmatprep.mubr.bf16.mxu0 %v4734_v13  ;;  %1832 = vmatprep.mubr.bf16.mxu1 %v4736_v14  ;;  %v4205_v13 = vld [vmem:[#allocation6 + $0x84] ss:$16 sps:$4 sm:$0xff]   ;;  %v4203_v14 = vld [vmem:[#allocation6 + $0x80] ss:$16 sps:$4 sm:$0xff]  }
 0x100   :  { %v4260_v5 = vld [vmem:[#allocation6 + $0x280] ss:$16 sps:$4 sm:$0xff]   ;;  %v4262_v43 = vld [vmem:[#allocation6 + $0x284] ss:$16 sps:$4 sm:$0xff]  }
 0x101   :  { %v4268_v17 = vld [vmem:[#allocation6 + $0x264] ss:$16 sps:$4 sm:$0xff]   ;;  %v4224_v34 = vld [vmem:[#allocation6 + $0x1a0] ss:$16 sps:$4 sm:$0xff]  }
 0x102   :  { %v4266_v12 = vld [vmem:[#allocation6 + $0x260] ss:$16 sps:$4 sm:$0xff]   ;;  %v4229_v48 = vld [vmem:[#allocation6 + $0x184] ss:$16 sps:$4 sm:$0xff]  }
 0x103   :  { %v4272_v38 = vld [vmem:[#allocation6 + $0x240] ss:$16 sps:$4 sm:$0xff]   ;;  %v4274_v6 = vld [vmem:[#allocation6 + $0x244] ss:$16 sps:$4 sm:$0xff]  }
 0x104   :  { %v4230_v20 = vld [vmem:[#allocation6 + $0x160] ss:$16 sps:$4 sm:$0xff]   ;;  %v4235_v3 = vld [vmem:[#allocation6 + $0x144] ss:$16 sps:$4 sm:$0xff]  }
 0x105   :  { %v4238_v0 = vld [vmem:[#allocation6 + $0x124] ss:$16 sps:$4 sm:$0xff]   ;;  %v4284_v54 = vld [vmem:[#allocation6 + $0x200] ss:$16 sps:$4 sm:$0xff]  }
 0x106   :  { %1720 = vmatmul.mubr.bf16.vlgmr.msra.gmra.mxu0 %v4746_v1  ;;  %1833 = vmatmul.mubr.bf16.vlgmr.msra.gmra.mxu1 %v4748_v30  ;;  %v4208_v1 = vld [vmem:[#allocation6 + $0x64] ss:$16 sps:$4 sm:$0xff]   ;;  %v4206_v30 = vld [vmem:[#allocation6 + $0x60] ss:$16 sps:$4 sm:$0xff]  }
 0x107   :  { %1729 = vmatprep.mubr.bf16.mxu0 %v4772_v7  ;;  %1842 = vmatprep.mubr.bf16.mxu1 %v4774_v8  ;;  %v4211_v7 = vld [vmem:[#allocation6 + $0x44] ss:$16 sps:$4 sm:$0xff]   ;;  %v5885_v8 = vld [vmem:[#allocation17_spill] sm:$0xff] }
 0x108   :  { %2800 = vmatpush1.bf16.msra.mxu0 %v4194_v57  ;;  %v4292_v58 = vld [vmem:[#allocation6 + $0x3e4] ss:$16 sps:$4 sm:$0xff]   ;;  %v4236_v16 = vld [vmem:[#allocation6 + $0x120] ss:$16 sps:$4 sm:$0xff]  }
 0x109   :  { %2801 = vmatprep.subr.bf16.mxu0 %v4199_v22  ;;  %v4298_v31 = vld [vmem:[#allocation6 + $0x3c4] ss:$16 sps:$4 sm:$0xff]   ;;  %v4239_v55 = vld [vmem:[#allocation6 + $0x100] ss:$16 sps:$4 sm:$0xff]  }
 0x10a   :  { %v4304_v57 = vld [vmem:[#allocation6 + $0x3a4] ss:$16 sps:$4 sm:$0xff]   ;;  %v4302_v22 = vld [vmem:[#allocation6 + $0x3a0] ss:$16 sps:$4 sm:$0xff]  }
 0x10c   :  { %2802 = vmatpush1.bf16.msra.mxu0 %v4197_v19  ;;  %v4310_v19 = vld [vmem:[#allocation6 + $0x384] ss:$16 sps:$4 sm:$0xff]  }
 0x10d   :  { %2803 = vmatprep.subr.bf16.mxu0 %v4202_v26  ;;  %v4314_v26 = vld [vmem:[#allocation6 + $0x360] ss:$16 sps:$4 sm:$0xff]  }
 0x10e   :  { %1730 = vmatmul.mubr.bf16.gmra.mxu0 %v4780_v18  ;;  %1843 = vmatmul.mubr.bf16.gmra.mxu1 %v4788_v39  ;;  %v5888_v18 = vld [vmem:[#allocation20_spill] sm:$0xff] }
 0x10f   :  { %1739 = vmatprep.mubr.bf16.mxu0 %v4816_v63  ;;  %1852 = vmatprep.mubr.bf16.mxu1 %v4818_v10  ;;  %v4209_v39 = vld [vmem:[#allocation6 + $0x40] ss:$16 sps:$4 sm:$0xff]   ;;  %v4214_v63 = vld [vmem:[#allocation6 + $0x24] ss:$16 sps:$4 sm:$0xff]  }
 0x110   :  { %2804 = vmatpush1.bf16.msra.mxu0 %v4200_v9  ;;  %v4244_v10 = vld [vmem:[#allocation6 + $0x2e4] ss:$16 sps:$4 sm:$0xff]  }
 0x111   :  { %2805 = vmatprep.subr.bf16.mxu0 %v4205_v13  ;;  %2912 = vmatprep.subr.bf16.mxu1 %v4244_v10  ;;  %v4322_v9 = vld [vmem:[#allocation6 + $0x344] ss:$16 sps:$4 sm:$0xff]   ;;  %v4320_v13 = vld [vmem:[#allocation6 + $0x340] ss:$16 sps:$4 sm:$0xff]  }
 0x112   :  { %2913 = vmatpush1.bf16.msra.mxu1 %v4242_v36 }
 0x113   :  { %2914 = vmatprep.subr.bf16.mxu1 %v4250_v50 }
 0x114   :  { %2806 = vmatpush1.bf16.msra.mxu0 %v4203_v14  ;;  %v4328_v14 = vld [vmem:[#allocation6 + $0x324] ss:$16 sps:$4 sm:$0xff]  }
 0x115   :  { %2807 = vmatprep.subr.bf16.mxu0 %v4208_v1  ;;  %v4326_v1 = vld [vmem:[#allocation6 + $0x320] ss:$16 sps:$4 sm:$0xff]  }
 0x116   :  { %1740 = vmatmul.mubr.bf16.gmra.mxu0 %v5885_v8  ;;  %1853 = vmatmul.mubr.bf16.gmra.mxu1 %v5886_v52  ;;  %v4340_v8 = vld [vmem:[#allocation6 + $0x2ec] ss:$16 sps:$4 sm:$0xff]  }
 0x117   :  { %1749 = vmatprep.mubr.bf16.mxu0 %v5887_v35  ;;  %1862 = vmatprep.mubr.bf16.mxu1 %v5888_v18  ;;  %v5095_v52 = vld [vmem:[%s5842_s4] sm:$0xf]  ;;  %v5895_v35 = vld [vmem:[#allocation13_spill] sm:$0xff] }
 0x118   :  { %2808 = vmatpush1.bf16.msra.mxu0 %v4206_v30  ;;  %2915 = vmatpush1.bf16.msra.mxu1 %v4248_v23  ;;  %v4334_v30 = vld [vmem:[#allocation6 + $0x304] ss:$16 sps:$4 sm:$0xff]   ;;  %v5099_v18 = vrot.slane %v5095_v52, %v5895_v35 }
 0x119   :  { %2809 = vmatprep.subr.bf16.mxu0 %v4211_v7  ;;  %2916 = vmatprep.subr.bf16.mxu1 %v4256_v46  ;;  %v4332_v7 = vld [vmem:[#allocation6 + $0x300] ss:$16 sps:$4 sm:$0xff]  }
 0x11c   :  { %2810 = vmatpush1.bf16.msra.mxu0 %v4209_v39  ;;  %2917 = vmatpush1.bf16.msra.mxu1 %v4254_v56  ;;  %v5896_v39 = vld [vmem:[#allocation15_spill] sm:$0xff] }
 0x11d   :  { %2811 = vmatprep.subr.bf16.mxu0 %v4214_v63  ;;  %2918 = vmatprep.subr.bf16.mxu1 %v4262_v43  ;;  %v5103_v63 = vrot.slane %v5095_v52, %v5896_v39 }
 0x11e   :  { %1750 = vmatmul.mubr.bf16.gmra.mxu0 %v5889_v51  ;;  %1863 = vmatmul.mubr.bf16.gmra.mxu1 %v5890_v53 }
 0x11f   :  { %1759 = vmatprep.mubr.bf16.mxu0 %v5891_v44  ;;  %1872 = vmatprep.mubr.bf16.mxu1 %v5892_v21 }
 0x120   :  { %2812 = vmatpush1.bf16.msra.mxu0 %v4212_v49  ;;  %2919 = vmatpush1.bf16.msra.mxu1 %v4260_v5 }
 0x121   :  { %2813 = vmatprep.subr.bf16.mxu0 %v4217_v4  ;;  %2920 = vmatprep.subr.bf16.mxu1 %v4268_v17 }
 0x124   :  { %2814 = vmatpush1.bf16.msra.mxu0 %v4215_v11  ;;  %2921 = vmatpush1.bf16.msra.mxu1 %v4266_v12 }
 0x125   :  { %2815 = vmatprep.subr.bf16.mxu0 %v4220_v45  ;;  %2922 = vmatprep.subr.bf16.mxu1 %v4274_v6  ;;  %v4245_v6 = vld [vmem:[#allocation6 + $0xe8] ss:$16 sps:$4 sm:$0xff]  }
 0x126   :  { %1760 = vmatmul.mubr.bf16.gmra.mxu0 %v5893_v27  ;;  %1873 = vmatmul.mubr.bf16.gmra.mxu1 %v5894_v41 }
 0x127   :  { %1769 = vmatprep.mubr.bf16.mxu0 %v4982_v25  ;;  %1882 = vmatprep.mubr.bf16.mxu1 %v4984_v33  ;;  %v4227_v25 = vld [vmem:[#allocation6 + $0x180] ss:$16 sps:$4 sm:$0xff]   ;;  %v4232_v33 = vld [vmem:[#allocation6 + $0x164] ss:$16 sps:$4 sm:$0xff]  }
 0x128   :  { %2816 = vmatpush2.bf16.msra.mxu0 %v4218_v47  ;;  %2923 = vmatpush1.bf16.msra.mxu1 %v4272_v38 }
 0x129   :  { %2817 = vmatprep.subr.bf16.mxu0 %v4223_v40 }
 0x12c   :  { %2818 = vmatpush2.bf16.msra.mxu0 %v4221_v28 }
 0x12d   :  { %2819 = vmatprep.subr.bf16.mxu0 %v4226_v42 }
 0x12e   :  { %1770 = vmatmul.mubr.bf16.gmra.mxu0 %v4990_v32  ;;  %1883 = vmatmul.mubr.bf16.gmra.mxu1 %v4997_v37  ;;  %v4280_v32 = vld [vmem:[#allocation6 + $0x224] ss:$16 sps:$4 sm:$0xff]   ;;  %v4278_v37 = vld [vmem:[#allocation6 + $0x220] ss:$16 sps:$4 sm:$0xff]  }
 0x12f   :  { %1779 = vmatprep.mubr.bf16.mxu0 %v5022_v29  ;;  %1892 = vmatprep.mubr.bf16.mxu1 %v5024_v2  ;;  %v4286_v29 = vld [vmem:[#allocation6 + $0x204] ss:$16 sps:$4 sm:$0xff]   ;;  %v4233_v2 = vld [vmem:[#allocation6 + $0x140] ss:$16 sps:$4 sm:$0xff]  }
 0x130   :  { %2820 = vmatpush2.bf16.msra.mxu0 %v4224_v34  ;;  %2924 = vmatprep.subr.bf16.mxu1 %v4280_v32 }
 0x131   :  { %2821 = vmatprep.subr.bf16.mxu0 %v4229_v48  ;;  %2925 = vmatpush1.bf16.msra.mxu1 %v4278_v37  ;;  %v4253_v37 = vld [vmem:[#allocation6 + $0xcc] ss:$16 sps:$4 sm:$0xff]  }
 0x132   :  { %2926 = vmatprep.subr.bf16.mxu1 %v4286_v29 }
 0x134   :  { %2822 = vmatpush2.bf16.msra.mxu0 %v4227_v25 }
 0x135   :  { %2823 = vmatprep.subr.bf16.mxu0 %v4232_v33  ;;  %2927 = vmatpush1.bf16.msra.mxu1 %v4284_v54 }
 0x136   :  { %1780 = vmatmul.mubr.bf16.gmra.mxu0 %v5026_v24  ;;  %1893 = vmatmul.mubr.bf16.gmra.mxu1 %v5031_v15  ;;  %v4241_v24 = vld [vmem:[#allocation6 + $0x104] ss:$16 sps:$4 sm:$0xff]   ;;  %v4290_v15 = vld [vmem:[#allocation6 + $0x3e0] ss:$16 sps:$4 sm:$0xff]  }
 0x137   :  { %1789 = vmatprep.mubr.bf16.mxu0 %v5048_v59  ;;  %1902 = vmatprep.mubr.bf16.mxu1 %v5050_v60  ;;  %v4247_v59 = vld [vmem:[#allocation6 + $0xec] ss:$16 sps:$4 sm:$0xff]   ;;  %v4296_v60 = vld [vmem:[#allocation6 + $0x3c0] ss:$16 sps:$4 sm:$0xff]  }
 0x138   :  { %2824 = vmatpush2.bf16.msra.mxu0 %v4230_v20  ;;  %2928 = vmatprep.subr.bf16.mxu1 %v4292_v58 }
 0x139   :  { %2825 = vmatprep.subr.bf16.mxu0 %v4235_v3  ;;  %2929 = vmatpush2.bf16.msra.mxu1 %v4290_v15 }
 0x13a   :  { %2930 = vmatprep.subr.bf16.mxu1 %v4298_v31  ;;  %v4259_v31 = vld [vmem:[#allocation6 + $0xac] ss:$16 sps:$4 sm:$0xff]  }
 0x13c   :  { %2826 = vmatpush2.bf16.msra.mxu0 %v4233_v2 }
 0x13d   :  { %2827 = vmatprep.subr.bf16.mxu0 %v4238_v0  ;;  %2931 = vmatpush2.bf16.msra.mxu1 %v4296_v60 }
 0x13e   :  { %1790 = vmatmul.mubr.bf16.gmra.mxu0 %v5052_v61  ;;  %1903 = vmatmul.mubr.bf16.gmra.mxu1 %v5054_v62  ;;  %v4308_v61 = vld [vmem:[#allocation6 + $0x380] ss:$16 sps:$4 sm:$0xff]   ;;  %v4316_v62 = vld [vmem:[#allocation6 + $0x364] ss:$16 sps:$4 sm:$0xff]  }
 0x13f   :  { %2932 = vmatprep.subr.bf16.mxu1 %v4304_v57 }
 0x140   :  { %2828 = vmatpush2.bf16.msra.mxu0 %v4236_v16 }
 0x141   :  { %2829 = vmatprep.subr.bf16.mxu0 %v4241_v24  ;;  %2933 = vmatpush2.bf16.msra.mxu1 %v4302_v22  ;;  %v4251_v24 = vld [vmem:[#allocation6 + $0xc8] ss:$16 sps:$4 sm:$0xff]  }
 0x142   :  { %2934 = vmatprep.subr.bf16.mxu1 %v4310_v19  ;;  %v4257_v19 = vld [vmem:[#allocation6 + $0xa8] ss:$16 sps:$4 sm:$0xff]  }
 0x144   :  { %2830 = vmatpush2.bf16.msra.mxu0 %v4239_v55 }
 0x145   :  { %3025 = vmatprep.subr.bf16.mxu0 %v4247_v59  ;;  %2935 = vmatpush2.bf16.msra.mxu1 %v4308_v61 }
 0x146   :  { %2936 = vmatprep.subr.bf16.mxu1 %v4316_v62 }
 0x149   :  { %2937 = vmatpush2.bf16.msra.mxu1 %v4314_v26  ;;  %v4265_v26 = vld [vmem:[#allocation6 + $0x8c] ss:$16 sps:$4 sm:$0xff]  }
 0x14a   :  { %2938 = vmatprep.subr.bf16.mxu1 %v4322_v9 }
 0x14d   :  { %2939 = vmatpush2.bf16.msra.mxu1 %v4320_v13 }
 0x14e   :  { %2940 = vmatprep.subr.bf16.mxu1 %v4328_v14 }
 0x151   :  { %2941 = vmatpush2.bf16.msra.mxu1 %v4326_v1 }
 0x152   :  { %2942 = vmatprep.subr.bf16.mxu1 %v4334_v30 }
 0x155   :  { %2943 = vmatpush2.bf16.msra.mxu1 %v4332_v7  ;;  %v4263_v7 = vld [vmem:[#allocation6 + $0x88] ss:$16 sps:$4 sm:$0xff]  }
 0x156   :  { %3138 = vmatprep.subr.bf16.mxu1 %v4340_v8 }
 0x172   :  { %v1495_v10 = vpop.f32.mrf.mxu0  ;;  %v1608_v49 = vpop.f32.mrf.mxu1 }
 0x173   :  { %v1496_v51 = vadd.f32 %v1495_v10, %v5103_v63 }
 0x174   :  { %v1497_v36 = vpop.f32.mrf.mxu0  ;;  %v1610_v4 = vpop.f32.mrf.mxu1 }
 0x175   :  { %v1498_v50 = vadd.f32 %v1497_v36, %v5099_v18  ;;  %v1609_v47 = vadd.f32 %v1608_v49, %v1496_v51  ;;  %v4271_v49 = vld [vmem:[#allocation6 + $0x6c] ss:$16 sps:$4 sm:$0xff]  }
 0x176   :  { %v1499_v53 = vpop.f32.mrf.mxu0  ;;  %v1612_v44 = vpop.f32.mrf.mxu1 }
 0x177   :  { %v1500_v21 = vadd.f32 %v1499_v53, %v5103_v63  ;;  %v1611_v23 = vadd.f32 %v1610_v4, %v1498_v50  ;;  %v1913_v34 = vmax.f32 %v1609_v47, 0.0 }
 0x178   :  { %v1501_v11 = vpop.f32.mrf.mxu0  ;;  %v1614_v56 = vpop.f32.mrf.mxu1 }
 0x179   :  { %v1613_v45 = vadd.f32 %v1612_v44, %v1500_v21  ;;  %v1502_v46 = vadd.f32 %v1501_v11, %v5099_v18  ;;  %v1914_v5 = vmax.f32 %v1611_v23, 0.0  ;;  %v4269_v21 = vld [vmem:[#allocation6 + $0x68] ss:$16 sps:$4 sm:$0xff]  }
 0x17a   :  { %v1505_v40 = vpop.f32.mrf.mxu0 }
 0x17b   :  { %v1615_v27 = vadd.f32 %v1614_v56, %v1502_v46  ;;  %v1917_v41 = vmax.f32 %v1613_v45, 0.0  ;;  %v1506_v12 = vadd.f32 %v1505_v40, %v5103_v63  ;;  %v4277_v45 = vld [vmem:[#allocation6 + $0x4c] ss:$16 sps:$4 sm:$0xff]  }
 0x17c   :  { %v1618_v28 = vpop.f32.mrf.mxu1  ;;  %v1507_v42 = vpop.f32.mrf.mxu0 }
 0x17d   :  { %v1918_v43 = vmax.f32 %v1615_v27, 0.0  ;;  %v1508_v17 = vadd.f32 %v1507_v42, %v5099_v18  ;;  %v5114_v20 = vpack.c.bf16 %v1917_v41, %v1913_v34  ;;  %v1619_v54 = vadd.f32 %v1618_v28, %v1506_v12  ;;  %v4275_v34 = vld [vmem:[#allocation6 + $0x48] ss:$16 sps:$4 sm:$0xff]  }
 0x17e   :  { %v1620_v48 = vpop.f32.mrf.mxu1  ;;  %v1509_v25 = vpop.f32.mrf.mxu0 }
 0x17f   :  { %v1510_v33 = vadd.f32 %v1509_v25, %v5103_v63  ;;  %v5112_v38 = vpack.c.bf16 %v1918_v43, %v1914_v5  ;;  %v1621_v29 = vadd.f32 %v1620_v48, %v1508_v17  ;;  %v1921_v60 = vmax.f32 %v1619_v54, 0.0 }
 0x180   :  { %v1622_v3 = vpop.f32.mrf.mxu1  ;;  %v1511_v32 = vpop.f32.mrf.mxu0 }
 0x181   :  { %v1623_v2 = vadd.f32 %v1622_v3, %v1510_v33  ;;  %2831 = vmatprep.mubr.bf16.mxu0 %v5112_v38  ;;  %v1512_v0 = vadd.f32 %v1511_v32, %v5099_v18  ;;  %v1922_v55 = vmax.f32 %v1621_v29, 0.0  ;;  %v4283_v33 = vld [vmem:[#allocation6 + $0x2c] ss:$16 sps:$4 sm:$0xff]  }
 0x182   :  { %v1624_v58 = vpop.f32.mrf.mxu1  ;;  %2832 = vmatmul.mubr.bf16.vlgmr.msra.gmra.mxu0 %v5114_v20 }
 0x183   :  { %v1625_v16 = vadd.f32 %v1624_v58, %v1512_v0  ;;  %3026 = vmatpush1.bf16.msra.mxu0 %v4245_v6  ;;  %v1925_v15 = vmax.f32 %v1623_v2, 0.0  ;;  %v4281_v0 = vld [vmem:[#allocation6 + $0x28] ss:$16 sps:$4 sm:$0xff]   ;;  %v4289_v58 = vld [vmem:[#allocation6 + $0xc] ss:$16 sps:$4 sm:$0xff]  }
 0x184   :  { %3027 = vmatprep.subr.bf16.mxu0 %v4253_v37 }
 0x185   :  { %v1926_v59 = vmax.f32 %v1625_v16, 0.0  ;;  %v5121_v61 = vpack.c.bf16 %v1925_v15, %v1921_v60 }
 0x186   :  { %v1515_v57 = vpop.f32.mrf.mxu0 }
 0x187   :  { %v5119_v22 = vpack.c.bf16 %v1926_v59, %v1922_v55  ;;  %3028 = vmatpush1.bf16.msra.mxu0 %v4251_v24  ;;  %v1516_v1 = vadd.f32 %v1515_v57, %v5103_v63  ;;  %v4287_v59 = vld [vmem:[#allocation6 + $0x8] ss:$16 sps:$4 sm:$0xff]  }
 0x188   :  { %v1628_v62 = vpop.f32.mrf.mxu1  ;;  %3029 = vmatprep.subr.bf16.mxu0 %v4259_v31  ;;  %v1517_v9 = vpop.f32.mrf.mxu0 }
 0x189   :  { %2841 = vmatprep.mubr.bf16.mxu0 %v5119_v22  ;;  %v1518_v13 = vadd.f32 %v1517_v9, %v5099_v18  ;;  %v1629_v53 = vadd.f32 %v1628_v62, %v1516_v1 }
 0x18a   :  { %v1630_v14 = vpop.f32.mrf.mxu1  ;;  %2842 = vmatmul.mubr.bf16.gmra.mxu0 %v5121_v61  ;;  %v1519_v30 = vpop.f32.mrf.mxu0 }
 0x18b   :  { %3030 = vmatpush1.bf16.msra.mxu0 %v4257_v19  ;;  %v1520_v8 = vadd.f32 %v1519_v30, %v5103_v63  ;;  %v1631_v4 = vadd.f32 %v1630_v14, %v1518_v13  ;;  %v1929_v41 = vmax.f32 %v1629_v53, 0.0  ;;  %v4295_v19 = vld [vmem:[#allocation6 + $0x1ec] ss:$16 sps:$4 sm:$0xff]   ;;  %v4293_v14 = vld [vmem:[#allocation6 + $0x1e8] ss:$16 sps:$4 sm:$0xff]  }
 0x18c   :  { %v1632_v10 = vpop.f32.mrf.mxu1  ;;  %3031 = vmatprep.subr.bf16.mxu0 %v4265_v26  ;;  %v1521_v36 = vpop.f32.mrf.mxu0 }
 0x18d   :  { %v1633_v50 = vadd.f32 %v1632_v10, %v1520_v8  ;;  %v1522_v51 = vadd.f32 %v1521_v36, %v5099_v18  ;;  %v1930_v56 = vmax.f32 %v1631_v4, 0.0 }
 0x18e   :  { %v1634_v44 = vpop.f32.mrf.mxu1 }
 0x18f   :  { %3032 = vmatpush1.bf16.msra.mxu0 %v4263_v7  ;;  %v1635_v11 = vadd.f32 %v1634_v44, %v1522_v51  ;;  %v1933_v46 = vmax.f32 %v1633_v50, 0.0  ;;  %v4301_v7 = vld [vmem:[#allocation6 + $0x1cc] ss:$16 sps:$4 sm:$0xff]   ;;  %v4299_v51 = vld [vmem:[#allocation6 + $0x1c8] ss:$16 sps:$4 sm:$0xff]  }
 0x190   :  { %v1525_v23 = vpop.f32.mrf.mxu0  ;;  %3033 = vmatprep.subr.bf16.mxu0 %v4271_v49  ;;  %v1638_v47 = vpop.f32.mrf.mxu1 }
 0x191   :  { %v1934_v40 = vmax.f32 %v1635_v11, 0.0  ;;  %v1526_v5 = vadd.f32 %v1525_v23, %v5103_v63  ;;  %v5133_v12 = vpack.c.bf16 %v1933_v46, %v1929_v41 }
 0x192   :  { %v1527_v27 = vpop.f32.mrf.mxu0  ;;  %v1640_v42 = vpop.f32.mrf.mxu1 }
 0x193   :  { %v1528_v28 = vadd.f32 %v1527_v27, %v5099_v18  ;;  %3034 = vmatpush1.bf16.msra.mxu0 %v4269_v21  ;;  %v5131_v17 = vpack.c.bf16 %v1934_v40, %v1930_v56  ;;  %v1639_v29 = vadd.f32 %v1638_v47, %v1526_v5  ;;  %v4307_v21 = vld [vmem:[#allocation6 + $0x1ac] ss:$16 sps:$4 sm:$0xff]   ;;  %v4305_v47 = vld [vmem:[#allocation6 + $0x1a8] ss:$16 sps:$4 sm:$0xff]  }
 0x194   :  { %v1529_v43 = vpop.f32.mrf.mxu0  ;;  %3035 = vmatprep.subr.bf16.mxu0 %v4277_v45  ;;  %v1642_v25 = vpop.f32.mrf.mxu1  ;;  %v4313_v27 = vld [vmem:[#allocation6 + $0x18c] ss:$16 sps:$4 sm:$0xff]  }
 0x195   :  { %v1530_v48 = vadd.f32 %v1529_v43, %v5103_v63  ;;  %2851 = vmatprep.mubr.bf16.mxu0 %v5131_v17  ;;  %v1641_v3 = vadd.f32 %v1640_v42, %v1528_v28  ;;  %v1937_v31 = vmax.f32 %v1639_v29, 0.0 }
 0x196   :  { %v1531_v6 = vpop.f32.mrf.mxu0  ;;  %2852 = vmatmul.mubr.bf16.gmra.mxu0 %v5133_v12  ;;  %v1644_v2 = vpop.f32.mrf.mxu1 }
 0x197   :  { %v1643_v32 = vadd.f32 %v1642_v25, %v1530_v48  ;;  %v1532_v37 = vadd.f32 %v1531_v6, %v5099_v18  ;;  %3036 = vmatpush1.bf16.msra.mxu0 %v4275_v34  ;;  %v1938_v24 = vmax.f32 %v1641_v3, 0.0  ;;  %v4311_v34 = vld [vmem:[#allocation6 + $0x188] ss:$16 sps:$4 sm:$0xff]   ;;  %v4319_v6 = vld [vmem:[#allocation6 + $0x16c] ss:$16 sps:$4 sm:$0xff]  }
 0x198   :  { %3037 = vmatprep.subr.bf16.mxu0 %v4283_v33 }
 0x199   :  { %v1645_v54 = vadd.f32 %v1644_v2, %v1532_v37  ;;  %v1941_v16 = vmax.f32 %v1643_v32, 0.0 }
 0x19b   :  { %v1942_v15 = vmax.f32 %v1645_v54, 0.0  ;;  %3038 = vmatpush1.bf16.msra.mxu0 %v4281_v0  ;;  %v5141_v60 = vpack.c.bf16 %v1941_v16, %v1937_v31  ;;  %v4317_v54 = vld [vmem:[#allocation6 + $0x168] ss:$16 sps:$4 sm:$0xff]  }
 0x19c   :  { %3039 = vmatprep.subr.bf16.mxu0 %v4289_v58 }
 0x19d   :  { %v5139_v55 = vpack.c.bf16 %v1942_v15, %v1938_v24  ;;  %v4325_v24 = vld [vmem:[#allocation6 + $0x14c] ss:$16 sps:$4 sm:$0xff]  }
 0x19e   :  { %v1535_v57 = vpop.f32.mrf.mxu0 }
 0x19f   :  { %v1648_v62 = vpop.f32.mrf.mxu1  ;;  %2861 = vmatprep.mubr.bf16.mxu0 %v5139_v55  ;;  %3040 = vmatpush1.bf16.msra.mxu0 %v4287_v59  ;;  %v1536_v1 = vadd.f32 %v1535_v57, %v5103_v63 }
 0x1a0   :  { %v1537_v26 = vpop.f32.mrf.mxu0  ;;  %2862 = vmatmul.mubr.bf16.gmra.mxu0 %v5141_v60  ;;  %3041 = vmatprep.subr.bf16.mxu0 %v4295_v19 }
 0x1a1   :  { %v1538_v9 = vadd.f32 %v1537_v26, %v5099_v18  ;;  %v1650_v13 = vpop.f32.mrf.mxu1  ;;  %v1649_v53 = vadd.f32 %v1648_v62, %v1536_v1  ;;  %v4323_v26 = vld [vmem:[#allocation6 + $0x148] ss:$16 sps:$4 sm:$0xff]  }
 0x1a2   :  { %v1539_v30 = vpop.f32.mrf.mxu0 }
 0x1a3   :  { %v1540_v8 = vadd.f32 %v1539_v30, %v5103_v63  ;;  %v1652_v10 = vpop.f32.mrf.mxu1  ;;  %v1651_v36 = vadd.f32 %v1650_v13, %v1538_v9  ;;  %3042 = vmatpush2.bf16.msra.mxu0 %v4293_v14  ;;  %v1945_v56 = vmax.f32 %v1649_v53, 0.0  ;;  %v4331_v14 = vld [vmem:[#allocation6 + $0x12c] ss:$16 sps:$4 sm:$0xff]  }
 0x1a4   :  { %v1541_v49 = vpop.f32.mrf.mxu0  ;;  %3043 = vmatprep.subr.bf16.mxu0 %v4301_v7  ;;  %v4337_v53 = vld [vmem:[#allocation6 + $0x10c] ss:$16 sps:$4 sm:$0xff]  }
 0x1a5   :  { %v1653_v4 = vadd.f32 %v1652_v10, %v1540_v8  ;;  %v1542_v50 = vadd.f32 %v1541_v49, %v5099_v18  ;;  %v1654_v44 = vpop.f32.mrf.mxu1  ;;  %v1946_v45 = vmax.f32 %v1651_v36, 0.0 }
 0x1a7   :  { %v1655_v11 = vadd.f32 %v1654_v44, %v1542_v50  ;;  %v1949_v23 = vmax.f32 %v1653_v4, 0.0  ;;  %3044 = vmatpush2.bf16.msra.mxu0 %v4299_v51  ;;  %v4329_v50 = vld [vmem:[#allocation6 + $0x128] ss:$16 sps:$4 sm:$0xff]  }
 0x1a8   :  { %3045 = vmatprep.subr.bf16.mxu0 %v4307_v21 }
 0x1a9   :  { %v1950_v46 = vmax.f32 %v1655_v11, 0.0  ;;  %v5151_v28 = vpack.c.bf16 %v1949_v23, %v1945_v56 }
 0x1aa   :  { %v1545_v40 = vpop.f32.mrf.mxu0 }
 0x1ab   :  { %v5149_v41 = vpack.c.bf16 %v1950_v46, %v1946_v45  ;;  %3046 = vmatpush2.bf16.msra.mxu0 %v4305_v47  ;;  %v1546_v48 = vadd.f32 %v1545_v40, %v5103_v63  ;;  %v4335_v47 = vld [vmem:[#allocation6 + $0x108] ss:$16 sps:$4 sm:$0xff]  }
 0x1ac   :  { %v1547_v5 = vpop.f32.mrf.mxu0  ;;  %3047 = vmatprep.subr.bf16.mxu0 %v4313_v27 }
 0x1ad   :  { %v1658_v42 = vpop.f32.mrf.mxu1  ;;  %v1548_v43 = vadd.f32 %v1547_v5, %v5099_v18  ;;  %2871 = vmatprep.mubr.bf16.mxu0 %v5149_v41 }
 0x1ae   :  { %v1549_v33 = vpop.f32.mrf.mxu0  ;;  %2872 = vmatmul.mubr.bf16.gmra.mxu0 %v5151_v28  ;;  %v1659_v58 = vadd.f32 %v1658_v42, %v1546_v48 }
 0x1af   :  { %v1660_v25 = vpop.f32.mrf.mxu1  ;;  %v1550_v3 = vadd.f32 %v1549_v33, %v5103_v63  ;;  %3048 = vmatpush2.bf16.msra.mxu0 %v4311_v34 }
 0x1b0   :  { %v1551_v37 = vpop.f32.mrf.mxu0  ;;  %v1661_v29 = vadd.f32 %v1660_v25, %v1548_v43  ;;  %3049 = vmatprep.subr.bf16.mxu0 %v4319_v6  ;;  %v1953_v9 = vmax.f32 %v1659_v58, 0.0 }
 0x1b1   :  { %v1662_v32 = vpop.f32.mrf.mxu1  ;;  %v1552_v0 = vadd.f32 %v1551_v37, %v5099_v18 }
 0x1b2   :  { %v1663_v2 = vadd.f32 %v1662_v32, %v1550_v3  ;;  %v1954_v57 = vmax.f32 %v1661_v29, 0.0 }
 0x1b3   :  { %v1664_v16 = vpop.f32.mrf.mxu1  ;;  %3050 = vmatpush2.bf16.msra.mxu0 %v4317_v54 }
 0x1b4   :  { %v1665_v15 = vadd.f32 %v1664_v16, %v1552_v0  ;;  %v1957_v31 = vmax.f32 %v1663_v2, 0.0  ;;  %v1555_v59 = vpop.f32.mrf.mxu0  ;;  %3051 = vmatprep.subr.bf16.mxu0 %v4325_v24  ;;  %v5897_v24 = vld [vmem:[#allocation14_spill] sm:$0xff] }
 0x1b5   :  { %v1668_v62 = vpop.f32.mrf.mxu1  ;;  %v1556_v10 = vadd.f32 %v1555_v59, %v5103_v63  ;;  %v5898_v59 = vld [vmem:[#allocation16_spill] sm:$0xff] }
 0x1b6   :  { %v1958_v19 = vmax.f32 %v1665_v15, 0.0  ;;  %v1557_v13 = vpop.f32.mrf.mxu0  ;;  %v5162_v8 = vpack.c.bf16 %v1957_v31, %v1953_v9  ;;  %v5181_v15 = vrot.slane %v5095_v52, %v5897_v24 }
 0x1b7   :  { %v1558_v30 = vadd.f32 %v1557_v13, %v5099_v18  ;;  %v1670_v7 = vpop.f32.mrf.mxu1  ;;  %3052 = vmatpush2.bf16.msra.mxu0 %v4323_v26  ;;  %v1669_v23 = vadd.f32 %v1668_v62, %v1556_v10 }
 0x1b8   :  { %v5159_v1 = vpack.c.bf16 %v1958_v19, %v1954_v57  ;;  %v1559_v49 = vpop.f32.mrf.mxu0  ;;  %3053 = vmatprep.subr.bf16.mxu0 %v4331_v14  ;;  %v5185_v57 = vrot.slane %v5095_v52, %v5898_v59 }
 0x1b9   :  { %v1560_v36 = vadd.f32 %v1559_v49, %v5103_v63  ;;  %v1672_v4 = vpop.f32.mrf.mxu1  ;;  %v1671_v44 = vadd.f32 %v1670_v7, %v1558_v30  ;;  %v1961_v43 = vmax.f32 %v1669_v23, 0.0 }
 0x1ba   :  { %2881 = vmatprep.mubr.bf16.mxu0 %v5159_v1  ;;  %v1561_v51 = vpop.f32.mrf.mxu0 }
 0x1bb   :  { %2882 = vmatmul.mubr.bf16.gmra.mxu0 %v5162_v8  ;;  %v1673_v21 = vadd.f32 %v1672_v4, %v1560_v36  ;;  %v1562_v11 = vadd.f32 %v1561_v51, %v5099_v18  ;;  %v1674_v45 = vpop.f32.mrf.mxu1  ;;  %v1962_v42 = vmax.f32 %v1671_v44, 0.0 }
 0x1bc   :  { %3054 = vmatpush2.bf16.msra.mxu0 %v4329_v50 }
 0x1bd   :  { %v1675_v46 = vadd.f32 %v1674_v45, %v1562_v11  ;;  %v1965_v56 = vmax.f32 %v1673_v21, 0.0  ;;  %3055 = vmatprep.subr.bf16.mxu0 %v4337_v53 }
 0x1be   :  { %v1565_v40 = vpop.f32.mrf.mxu0  ;;  %v1678_v27 = vpop.f32.mrf.mxu1 }
 0x1bf   :  { %v1966_v5 = vmax.f32 %v1675_v46, 0.0  ;;  %v5172_v6 = vpack.c.bf16 %v1965_v56, %v1961_v43  ;;  %v1566_v3 = vadd.f32 %v1565_v40, %v5103_v63 }
 0x1c0   :  { %v1567_v34 = vpop.f32.mrf.mxu0  ;;  %v1680_v48 = vpop.f32.mrf.mxu1  ;;  %3056 = vmatpush2.bf16.msra.mxu0 %v4335_v47 }
 0x1c1   :  { %v5169_v25 = vpack.c.bf16 %v1966_v5, %v1962_v42  ;;  %v1568_v33 = vadd.f32 %v1567_v34, %v5099_v18  ;;  %v1679_v31 = vadd.f32 %v1678_v27, %v1566_v3 }
 0x1c2   :  { %v1569_v32 = vpop.f32.mrf.mxu0  ;;  %v1682_v37 = vpop.f32.mrf.mxu1 }
 0x1c3   :  { %v1570_v29 = vadd.f32 %v1569_v32, %v5103_v63  ;;  %2891 = vmatprep.mubr.bf16.mxu0 %v5169_v25  ;;  %v1681_v54 = vadd.f32 %v1680_v48, %v1568_v33 }
 0x1c4   :  { %v1571_v2 = vpop.f32.mrf.mxu0  ;;  %v1684_v0 = vpop.f32.mrf.mxu1  ;;  %2892 = vmatmul.mubr.bf16.gmra.mxu0 %v5172_v6 }
 0x1c5   :  { %v1683_v58 = vadd.f32 %v1682_v37, %v1570_v29  ;;  %v1572_v16 = vadd.f32 %v1571_v2, %v5099_v18  ;;  %v1970_v14 = vmax.f32 %v1681_v54, 0.0  ;;  %v1969_v18 = vmax.f32 %v1679_v31, 0.0  ;;  %v4338_v29 = vld [vmem:[#allocation6 + $0x2e8] ss:$16 sps:$4 sm:$0xff]   ;;  %v4343_v54 = vld [vmem:[#allocation6 + $0x2cc] ss:$16 sps:$4 sm:$0xff]  }
 0x1c6   :  { %v1721_v63 = vpop.f32.mrf.mxu0  ;;  %v1834_v19 = vpop.f32.mrf.mxu1 }
 0x1c7   :  { %v1685_v62 = vadd.f32 %v1684_v0, %v1572_v16  ;;  %v1973_v26 = vmax.f32 %v1683_v58, 0.0  ;;  %v1722_v10 = vadd.f32 %v1721_v63, %v5185_v57 }
 0x1c8   :  { %v1723_v9 = vpop.f32.mrf.mxu0  ;;  %v1836_v13 = vpop.f32.mrf.mxu1 }
 0x1c9   :  { %v1974_v30 = vmax.f32 %v1685_v62, 0.0  ;;  %v1724_v7 = vadd.f32 %v1723_v9, %v5181_v15  ;;  %v5192_v50 = vpack.c.bf16 %v1973_v26, %v1969_v18  ;;  %v1835_v23 = vadd.f32 %v1834_v19, %v1722_v10  ;;  %v4341_v9 = vld [vmem:[#allocation6 + $0x2c8] ss:$16 sps:$4 sm:$0xff]  }
 0x1ca   :  { %v1725_v49 = vpop.f32.mrf.mxu0  ;;  %v1838_v36 = vpop.f32.mrf.mxu1 }
 0x1cb   :  { %v5189_v4 = vpack.c.bf16 %v1974_v30, %v1970_v14  ;;  %v1726_v52 = vadd.f32 %v1725_v49, %v5185_v57  ;;  %v1837_v44 = vadd.f32 %v1836_v13, %v1724_v7  ;;  %v1915_v34 = vmax.f32 %v1835_v23, 0.0  ;;  %v4346_v7 = vld [vmem:[#allocation6 + $0x2ac] ss:$16 sps:$4 sm:$0xff]  }
 0x1cc   :  { %v1727_v51 = vpop.f32.mrf.mxu0  ;;  %v1840_v53 = vpop.f32.mrf.mxu1 }
 0x1cd   :  { %v1839_v21 = vadd.f32 %v1838_v36, %v1726_v52  ;;  %v1728_v11 = vadd.f32 %v1727_v51, %v5181_v15  ;;  %2901 = vmatprep.mubr.bf16.mxu0 %v5189_v4  ;;  %v1916_v42 = vmax.f32 %v1837_v44, 0.0 }
 0x1ce   :  { %v1731_v45 = vpop.f32.mrf.mxu0  ;;  %v1844_v46 = vpop.f32.mrf.mxu1  ;;  %2902 = vmatmul.mubr.bf16.gmra.mxu0 %v5192_v50 }
 0x1cf   :  { %v1841_v47 = vadd.f32 %v1840_v53, %v1728_v11  ;;  %3057 = vmatprep.mubr.bf16.mxu0 %v5112_v38  ;;  %v1919_v56 = vmax.f32 %v1839_v21, 0.0  ;;  %v1732_v48 = vadd.f32 %v1731_v45, %v5185_v57  ;;  %v4349_v45 = vld [vmem:[#allocation6 + $0x28c] ss:$16 sps:$4 sm:$0xff]  }
 0x1d0   :  { %v1733_v40 = vpop.f32.mrf.mxu0  ;;  %v1846_v27 = vpop.f32.mrf.mxu1 }
 0x1d1   :  { %v1920_v5 = vmax.f32 %v1841_v47, 0.0  ;;  %v1734_v43 = vadd.f32 %v1733_v40, %v5181_v15  ;;  %v5203_v2 = vpack.c.bf16 %v1919_v56, %v1915_v34  ;;  %v1845_v63 = vadd.f32 %v1844_v46, %v1732_v48 }
 0x1d2   :  { %v1735_v33 = vpop.f32.mrf.mxu0  ;;  %v1848_v3 = vpop.f32.mrf.mxu1 }
 0x1d3   :  { %v5200_v32 = vpack.c.bf16 %v1920_v5, %v1916_v42  ;;  %v1736_v37 = vadd.f32 %v1735_v33, %v5185_v57  ;;  %v1847_v58 = vadd.f32 %v1846_v27, %v1734_v43  ;;  %v1923_v36 = vmax.f32 %v1845_v63, 0.0  ;;  %v4347_v43 = vld [vmem:[#allocation6 + $0x288] ss:$16 sps:$4 sm:$0xff]  }
 0x1d4   :  { %v1737_v38 = vpop.f32.mrf.mxu0  ;;  %v1850_v0 = vpop.f32.mrf.mxu1 }
 0x1d5   :  { %v1849_v16 = vadd.f32 %v1848_v3, %v1736_v37  ;;  %v1738_v31 = vadd.f32 %v1737_v38, %v5181_v15  ;;  %2944 = vmatprep.mubr.bf16.mxu1 %v5200_v32  ;;  %v1924_v18 = vmax.f32 %v1847_v58, 0.0  ;;  %v4352_v3 = vld [vmem:[#allocation6 + $0x26c] ss:$16 sps:$4 sm:$0xff]  }
 0x1d6   :  { %v1741_v19 = vpop.f32.mrf.mxu0  ;;  %v1854_v62 = vpop.f32.mrf.mxu1  ;;  %2945 = vmatmul.mubr.bf16.vlgmr.msra.gmra.mxu1 %v5203_v2  ;;  %3058 = vmatmul.mubr.bf16.vlgmr.msra.gmra.mxu0 %v5114_v20 }
 0x1d7   :  { %v1851_v26 = vadd.f32 %v1850_v0, %v1738_v31  ;;  %3139 = vmatpush1.bf16.msra.mxu1 %v4338_v29  ;;  %3067 = vmatprep.mubr.bf16.mxu0 %v5119_v22  ;;  %v1927_v13 = vmax.f32 %v1849_v16, 0.0  ;;  %v1742_v52 = vadd.f32 %v1741_v19, %v5185_v57  ;;  %v4344_v22 = vld [vmem:[#allocation6 + $0x2a8] ss:$16 sps:$4 sm:$0xff]  }
 0x1d8   :  { %v1743_v14 = vpop.f32.mrf.mxu0  ;;  %v1856_v30 = vpop.f32.mrf.mxu1  ;;  %3140 = vmatprep.subr.bf16.mxu1 %v4343_v54 }
 0x1d9   :  { %v1928_v10 = vmax.f32 %v1851_v26, 0.0  ;;  %v1744_v49 = vadd.f32 %v1743_v14, %v5181_v15  ;;  %v5215_v21 = vpack.c.bf16 %v1927_v13, %v1923_v36  ;;  %v1855_v40 = vadd.f32 %v1854_v62, %v1742_v52  ;;  %v4355_v26 = vld [vmem:[#allocation6 + $0x24c] ss:$16 sps:$4 sm:$0xff]  }
 0x1da   :  { %v1745_v51 = vpop.f32.mrf.mxu0  ;;  %v1858_v53 = vpop.f32.mrf.mxu1 }
 0x1db   :  { %v5212_v20 = vpack.c.bf16 %v1928_v10, %v1924_v18  ;;  %v1746_v44 = vadd.f32 %v1745_v51, %v5185_v57  ;;  %3141 = vmatpush1.bf16.msra.mxu1 %v4341_v9  ;;  %v1857_v46 = vadd.f32 %v1856_v30, %v1744_v49  ;;  %v1931_v0 = vmax.f32 %v1855_v40, 0.0  ;;  %v4353_v49 = vld [vmem:[#allocation6 + $0x248] ss:$16 sps:$4 sm:$0xff]  }
 0x1dc   :  { %v1747_v11 = vpop.f32.mrf.mxu0  ;;  %v1860_v23 = vpop.f32.mrf.mxu1  ;;  %3142 = vmatprep.subr.bf16.mxu1 %v4346_v7 }
 0x1dd   :  { %v1859_v47 = vadd.f32 %v1858_v53, %v1746_v44  ;;  %v1748_v56 = vadd.f32 %v1747_v11, %v5181_v15  ;;  %2954 = vmatprep.mubr.bf16.mxu1 %v5212_v20  ;;  %v1932_v37 = vmax.f32 %v1857_v46, 0.0  ;;  %v4358_v53 = vld [vmem:[#allocation6 + $0x22c] ss:$16 sps:$4 sm:$0xff]  }
 0x1de   :  { %v1751_v27 = vpop.f32.mrf.mxu0  ;;  %v1864_v42 = vpop.f32.mrf.mxu1  ;;  %2955 = vmatmul.mubr.bf16.gmra.mxu1 %v5215_v21  ;;  %3068 = vmatmul.mubr.bf16.gmra.mxu0 %v5121_v61 }
 0x1df   :  { %v1861_v5 = vadd.f32 %v1860_v23, %v1748_v56  ;;  %3143 = vmatpush1.bf16.msra.mxu1 %v4344_v22  ;;  %3077 = vmatprep.mubr.bf16.mxu0 %v5131_v17  ;;  %v1935_v34 = vmax.f32 %v1859_v47, 0.0  ;;  %v1752_v54 = vadd.f32 %v1751_v27, %v5185_v57  ;;  %v4350_v17 = vld [vmem:[#allocation6 + $0x268] ss:$16 sps:$4 sm:$0xff]  }
 0x1e0   :  { %v1753_v48 = vpop.f32.mrf.mxu0  ;;  %v1866_v33 = vpop.f32.mrf.mxu1  ;;  %3144 = vmatprep.subr.bf16.mxu1 %v4349_v45 }
 0x1e1   :  { %v1936_v29 = vmax.f32 %v1861_v5, 0.0  ;;  %v1754_v38 = vadd.f32 %v1753_v48, %v5181_v15  ;;  %v5227_v63 = vpack.c.bf16 %v1935_v34, %v1931_v0  ;;  %v1865_v30 = vadd.f32 %v1864_v42, %v1752_v54  ;;  %v4361_v5 = vld [vmem:[#allocation6 + $0x20c] ss:$16 sps:$4 sm:$0xff]  }
 0x1e2   :  { %v1755_v58 = vpop.f32.mrf.mxu0  ;;  %v1868_v16 = vpop.f32.mrf.mxu1 }
 0x1e3   :  { %v5224_v61 = vpack.c.bf16 %v1936_v29, %v1932_v37  ;;  %v1756_v31 = vadd.f32 %v1755_v58, %v5185_v57  ;;  %3145 = vmatpush1.bf16.msra.mxu1 %v4347_v43  ;;  %v1867_v9 = vadd.f32 %v1866_v33, %v1754_v38  ;;  %v1939_v23 = vmax.f32 %v1865_v30, 0.0  ;;  %v4359_v38 = vld [vmem:[#allocation6 + $0x208] ss:$16 sps:$4 sm:$0xff]  }
 0x1e4   :  { %v1757_v19 = vpop.f32.mrf.mxu0  ;;  %v1870_v62 = vpop.f32.mrf.mxu1  ;;  %3146 = vmatprep.subr.bf16.mxu1 %v4352_v3 }
 0x1e5   :  { %v1869_v13 = vadd.f32 %v1868_v16, %v1756_v31  ;;  %v1758_v14 = vadd.f32 %v1757_v19, %v5181_v15  ;;  %2964 = vmatprep.mubr.bf16.mxu1 %v5224_v61  ;;  %v1940_v44 = vmax.f32 %v1867_v9, 0.0  ;;  %v4364_v16 = vld [vmem:[#allocation6 + $0x3ec] ss:$16 sps:$4 sm:$0xff]  }
 0x1e6   :  { %v1761_v7 = vpop.f32.mrf.mxu0  ;;  %v1874_v18 = vpop.f32.mrf.mxu1  ;;  %2965 = vmatmul.mubr.bf16.gmra.mxu1 %v5227_v63  ;;  %3078 = vmatmul.mubr.bf16.gmra.mxu0 %v5133_v12 }
 0x1e7   :  { %v1871_v10 = vadd.f32 %v1870_v62, %v1758_v14  ;;  %3147 = vmatpush1.bf16.msra.mxu1 %v4350_v17  ;;  %3087 = vmatprep.mubr.bf16.mxu0 %v5139_v55  ;;  %v1943_v36 = vmax.f32 %v1869_v13, 0.0  ;;  %v1762_v45 = vadd.f32 %v1761_v7, %v5185_v57  ;;  %v4356_v55 = vld [vmem:[#allocation6 + $0x228] ss:$16 sps:$4 sm:$0xff]  }
 0x1e8   :  { %v1763_v52 = vpop.f32.mrf.mxu0  ;;  %v1876_v51 = vpop.f32.mrf.mxu1  ;;  %3148 = vmatprep.subr.bf16.mxu1 %v4355_v26 }
 0x1e9   :  { %v1944_v22 = vmax.f32 %v1871_v10, 0.0  ;;  %v1764_v11 = vadd.f32 %v1763_v52, %v5181_v15  ;;  %v5239_v40 = vpack.c.bf16 %v1943_v36, %v1939_v23  ;;  %v1875_v33 = vadd.f32 %v1874_v18, %v1762_v45  ;;  %v4367_v10 = vld [vmem:[#allocation6 + $0x3cc] ss:$16 sps:$4 sm:$0xff]  }
 0x1ea   :  { %v1765_v46 = vpop.f32.mrf.mxu0  ;;  %v1878_v47 = vpop.f32.mrf.mxu1 }
 0x1eb   :  { %v5236_v12 = vpack.c.bf16 %v1944_v22, %v1940_v44  ;;  %v1766_v56 = vadd.f32 %v1765_v46, %v5185_v57  ;;  %3149 = vmatpush1.bf16.msra.mxu1 %v4353_v49  ;;  %v1877_v43 = vadd.f32 %v1876_v51, %v1764_v11  ;;  %v1947_v62 = vmax.f32 %v1875_v33, 0.0  ;;  %v4365_v11 = vld [vmem:[#allocation6 + $0x3c8] ss:$16 sps:$4 sm:$0xff]  }
 0x1ec   :  { %v1767_v27 = vpop.f32.mrf.mxu0  ;;  %v1880_v42 = vpop.f32.mrf.mxu1  ;;  %3150 = vmatprep.subr.bf16.mxu1 %v4358_v53 }
 0x1ed   :  { %v1879_v34 = vadd.f32 %v1878_v47, %v1766_v56  ;;  %v1768_v48 = vadd.f32 %v1767_v27, %v5181_v15  ;;  %2974 = vmatprep.mubr.bf16.mxu1 %v5236_v12  ;;  %v1948_v31 = vmax.f32 %v1877_v43, 0.0  ;;  %v4370_v47 = vld [vmem:[#allocation6 + $0x3ac] ss:$16 sps:$4 sm:$0xff]  }
 0x1ee   :  { %v1771_v3 = vpop.f32.mrf.mxu0  ;;  %v1884_v37 = vpop.f32.mrf.mxu1  ;;  %2975 = vmatmul.mubr.bf16.gmra.mxu1 %v5239_v40  ;;  %3088 = vmatmul.mubr.bf16.gmra.mxu0 %v5141_v60 }
 0x1ef   :  { %v1881_v29 = vadd.f32 %v1880_v42, %v1768_v48  ;;  %3151 = vmatpush1.bf16.msra.mxu1 %v4356_v55  ;;  %3097 = vmatprep.mubr.bf16.mxu0 %v5149_v41  ;;  %v1951_v0 = vmax.f32 %v1879_v34, 0.0  ;;  %v1772_v26 = vadd.f32 %v1771_v3, %v5185_v57  ;;  %v4362_v41 = vld [vmem:[#allocation6 + $0x3e8] ss:$16 sps:$4 sm:$0xff]  }
 0x1f0   :  { %v1773_v54 = vpop.f32.mrf.mxu0  ;;  %v1886_v58 = vpop.f32.mrf.mxu1  ;;  %3152 = vmatprep.subr.bf16.mxu1 %v4361_v5 }
 0x1f1   :  { %v1952_v17 = vmax.f32 %v1881_v29, 0.0  ;;  %v1774_v19 = vadd.f32 %v1773_v54, %v5181_v15  ;;  %v5251_v30 = vpack.c.bf16 %v1951_v0, %v1947_v62  ;;  %v1885_v51 = vadd.f32 %v1884_v37, %v1772_v26  ;;  %v4373_v29 = vld [vmem:[#allocation6 + $0x38c] ss:$16 sps:$4 sm:$0xff]  }
 0x1f2   :  { %v1775_v9 = vpop.f32.mrf.mxu0  ;;  %v1888_v13 = vpop.f32.mrf.mxu1 }
 0x1f3   :  { %v5248_v60 = vpack.c.bf16 %v1952_v17, %v1948_v31  ;;  %v1776_v14 = vadd.f32 %v1775_v9, %v5185_v57  ;;  %3153 = vmatpush1.bf16.msra.mxu1 %v4359_v38  ;;  %v1887_v49 = vadd.f32 %v1886_v58, %v1774_v19  ;;  %v1955_v42 = vmax.f32 %v1885_v51, 0.0  ;;  %v4371_v19 = vld [vmem:[#allocation6 + $0x388] ss:$16 sps:$4 sm:$0xff]  }
 0x1f4   :  { %v1777_v7 = vpop.f32.mrf.mxu0  ;;  %v1890_v18 = vpop.f32.mrf.mxu1  ;;  %3154 = vmatprep.subr.bf16.mxu1 %v4364_v16 }
 0x1f5   :  { %v1889_v36 = vadd.f32 %v1888_v13, %v1776_v14  ;;  %v1778_v52 = vadd.f32 %v1777_v7, %v5181_v15  ;;  %2984 = vmatprep.mubr.bf16.mxu1 %v5248_v60  ;;  %v1956_v56 = vmax.f32 %v1887_v49, 0.0  ;;  %v4376_v13 = vld [vmem:[#allocation6 + $0x36c] ss:$16 sps:$4 sm:$0xff]  }
 0x1f6   :  { %v1781_v53 = vpop.f32.mrf.mxu0  ;;  %v1894_v44 = vpop.f32.mrf.mxu1  ;;  %2985 = vmatmul.mubr.bf16.gmra.mxu1 %v5251_v30  ;;  %3098 = vmatmul.mubr.bf16.gmra.mxu0 %v5151_v28 }
 0x1f7   :  { %v1891_v22 = vadd.f32 %v1890_v18, %v1778_v52  ;;  %3155 = vmatpush2.bf16.msra.mxu1 %v4362_v41  ;;  %3107 = vmatprep.mubr.bf16.mxu0 %v5159_v1  ;;  %v1959_v23 = vmax.f32 %v1889_v36, 0.0  ;;  %v1782_v5 = vadd.f32 %v1781_v53, %v5185_v57  ;;  %v4368_v1 = vld [vmem:[#allocation6 + $0x3a8] ss:$16 sps:$4 sm:$0xff]  }
 0x1f8   :  { %v1783_v45 = vpop.f32.mrf.mxu0  ;;  %v1896_v46 = vpop.f32.mrf.mxu1  ;;  %3156 = vmatprep.subr.bf16.mxu1 %v4367_v10 }
 0x1f9   :  { %v1960_v55 = vmax.f32 %v1891_v22, 0.0  ;;  %v1784_v27 = vadd.f32 %v1783_v45, %v5181_v15  ;;  %v5263_v33 = vpack.c.bf16 %v1959_v23, %v1955_v42  ;;  %v1895_v58 = vadd.f32 %v1894_v44, %v1782_v5  ;;  %v4379_v44 = vld [vmem:[#allocation6 + $0x34c] ss:$16 sps:$4 sm:$0xff]  }
 0x1fa   :  { %v1785_v43 = vpop.f32.mrf.mxu0  ;;  %v1898_v34 = vpop.f32.mrf.mxu1 }
 0x1fb   :  { %v5260_v28 = vpack.c.bf16 %v1960_v55, %v1956_v56  ;;  %v1786_v48 = vadd.f32 %v1785_v43, %v5185_v57  ;;  %3157 = vmatpush2.bf16.msra.mxu1 %v4365_v11  ;;  %v1897_v38 = vadd.f32 %v1896_v46, %v1784_v27  ;;  %v1963_v18 = vmax.f32 %v1895_v58, 0.0  ;;  %v4382_v55 = vld [vmem:[#allocation6 + $0x32c] ss:$16 sps:$4 sm:$0xff]  }
 0x1fc   :  { %v1787_v3 = vpop.f32.mrf.mxu0  ;;  %v1900_v37 = vpop.f32.mrf.mxu1  ;;  %3158 = vmatprep.subr.bf16.mxu1 %v4370_v47 }
 0x1fd   :  { %v1899_v0 = vadd.f32 %v1898_v34, %v1786_v48  ;;  %v1788_v54 = vadd.f32 %v1787_v3, %v5181_v15  ;;  %2994 = vmatprep.mubr.bf16.mxu1 %v5260_v28  ;;  %v1964_v14 = vmax.f32 %v1897_v38, 0.0  ;;  %v4385_v48 = vld [vmem:[#allocation6 + $0x30c] ss:$16 sps:$4 sm:$0xff]  }
 0x1fe   :  { %v1791_v16 = vpop.f32.mrf.mxu0  ;;  %v1904_v31 = vpop.f32.mrf.mxu1  ;;  %2995 = vmatmul.mubr.bf16.gmra.mxu1 %v5263_v33  ;;  %3108 = vmatmul.mubr.bf16.gmra.mxu0 %v5162_v8 }
 0x1ff   :  { %v1901_v17 = vadd.f32 %v1900_v37, %v1788_v54  ;;  %3159 = vmatpush2.bf16.msra.mxu1 %v4368_v1  ;;  %3117 = vmatprep.mubr.bf16.mxu0 %v5169_v25  ;;  %v1967_v62 = vmax.f32 %v1899_v0, 0.0  ;;  %v1792_v10 = vadd.f32 %v1791_v16, %v5185_v57  ;;  %v4374_v25 = vld [vmem:[#allocation6 + $0x368] ss:$16 sps:$4 sm:$0xff]  }
 0x200   :  { %v1793_v26 = vpop.f32.mrf.mxu0  ;;  %v1906_v9 = vpop.f32.mrf.mxu1  ;;  %3160 = vmatprep.subr.bf16.mxu1 %v4373_v29 }
 0x201   :  { %v1968_v41 = vmax.f32 %v1901_v17, 0.0  ;;  %v1794_v7 = vadd.f32 %v1793_v26, %v5181_v15  ;;  %v2003_v51 = vpack.c.bf16 %v1967_v62, %v1963_v18  ;;  %v1905_v45 = vadd.f32 %v1904_v31, %v1792_v10 }
 0x202   :  { %v1795_v49 = vpop.f32.mrf.mxu0  ;;  %v1908_v36 = vpop.f32.mrf.mxu1 }
 0x203   :  { %v2004_v8 = vpack.c.bf16 %v1968_v41, %v1964_v14  ;;  %v1796_v52 = vadd.f32 %v1795_v49, %v5185_v57  ;;  %3161 = vmatpush2.bf16.msra.mxu1 %v4371_v19  ;;  %v1907_v22 = vadd.f32 %v1906_v9, %v1794_v7  ;;  %v4377_v57 = vld [vmem:[#allocation6 + $0x348] ss:$16 sps:$4 sm:$0xff]   ;;  %v1971_v5 = vmax.f32 %v1905_v45, 0.0 }
 0x204   :  { %v1797_v53 = vpop.f32.mrf.mxu0  ;;  %3162 = vmatprep.subr.bf16.mxu1 %v4376_v13  ;;  %v1910_v46 = vpop.f32.mrf.mxu1 }
 0x205   :  { %v1909_v11 = vadd.f32 %v1908_v36, %v1796_v52  ;;  %v1798_v23 = vadd.f32 %v1797_v53, %v5181_v15  ;;  %3004 = vmatprep.mubr.bf16.mxu1 %v2004_v8  ;;  %v1972_v27 = vmax.f32 %v1907_v22, 0.0  ;;  %v4380_v15 = vld [vmem:[#allocation6 + $0x328] ss:$16 sps:$4 sm:$0xff]  }
 0x206   :  { %3005 = vmatmul.mubr.bf16.gmra.mxu1 %v2003_v51  ;;  %3118 = vmatmul.mubr.bf16.gmra.mxu0 %v5172_v6  ;;  %v4383_v6 = vld [vmem:[#allocation6 + $0x308] ss:$16 sps:$4 sm:$0xff]  }
 0x207   :  { %v1911_v47 = vadd.f32 %v1910_v46, %v1798_v23  ;;  %3163 = vmatpush2.bf16.msra.mxu1 %v4374_v25  ;;  %3127 = vmatprep.mubr.bf16.mxu0 %v5189_v4  ;;  %v1975_v56 = vmax.f32 %v1909_v11, 0.0 }
 0x208   :  { %3164 = vmatprep.subr.bf16.mxu1 %v4379_v44 }
 0x209   :  { %v1976_v42 = vmax.f32 %v1911_v47, 0.0  ;;  %v2007_v34 = vpack.c.bf16 %v1975_v56, %v1971_v5 }
 0x20b   :  { %v2008_v43 = vpack.c.bf16 %v1976_v42, %v1972_v27  ;;  %3165 = vmatpush2.bf16.msra.mxu1 %v4377_v57 }
 0x20c   :  { %3166 = vmatprep.subr.bf16.mxu1 %v4382_v55 }
 0x20d   :  { %3014 = vmatprep.mubr.bf16.mxu1 %v2008_v43 }
 0x20e   :  { %3015 = vmatmul.mubr.bf16.gmra.mxu1 %v2007_v34  ;;  %3128 = vmatmul.mubr.bf16.gmra.mxu0 %v5192_v50 }
 0x20f   :  { %3167 = vmatpush2.bf16.msra.mxu1 %v4380_v15  ;;  %3170 = vmatprep.mubr.bf16.mxu1 %v5200_v32 }
 0x210   :  { %3168 = vmatprep.subr.bf16.mxu1 %v4385_v48 }
 0x213   :  { %3169 = vmatpush2.bf16.msra.mxu1 %v4383_v6 }
 0x216   :  { %3171 = vmatmul.mubr.bf16.vlgmr.msra.gmra.mxu1 %v5203_v2 }
 0x217   :  { %3180 = vmatprep.mubr.bf16.mxu1 %v5212_v20 }
 0x21e   :  { %3181 = vmatmul.mubr.bf16.gmra.mxu1 %v5215_v21 }
 0x21f   :  { %3190 = vmatprep.mubr.bf16.mxu1 %v5224_v61 }
 0x226   :  { %3191 = vmatmul.mubr.bf16.gmra.mxu1 %v5227_v63 }
 0x227   :  { %3200 = vmatprep.mubr.bf16.mxu1 %v5236_v12 }
 0x22e   :  { %3201 = vmatmul.mubr.bf16.gmra.mxu1 %v5239_v40 }
 0x22f   :  { %3210 = vmatprep.mubr.bf16.mxu1 %v5248_v60 }
 0x236   :  { %3211 = vmatmul.mubr.bf16.gmra.mxu1 %v5251_v30 }
 0x237   :  { %3220 = vmatprep.mubr.bf16.mxu1 %v5260_v28 }
 0x23e   :  { %3221 = vmatmul.mubr.bf16.gmra.mxu1 %v5263_v33 }
 0x23f   :  { %3230 = vmatprep.mubr.bf16.mxu1 %v2004_v8 }
 0x242   :  { %v5289_v4 = vpop.f32.mrf.mxu0 }
 0x244   :  { %v5291_v50 = vpop.f32.mrf.mxu0 }
 0x246   :  { %v5293_v32 = vpop.f32.mrf.mxu0  ;;  %3231 = vmatmul.mubr.bf16.gmra.mxu1 %v2003_v51 }
 0x247   :  { %3240 = vmatprep.mubr.bf16.mxu1 %v2008_v43 }
 0x248   :  { %v5295_v2 = vpop.f32.mrf.mxu0 }
 0x24a   :  { %v5297_v20 = vpop.f32.mrf.mxu0 }
 0x24c   :  { %v5299_v21 = vpop.f32.mrf.mxu0 }
 0x24e   :  { %3241 = vmatmul.mubr.bf16.gmra.mxu1 %v2007_v34  ;;  %v5301_v61 = vpop.f32.mrf.mxu0 }
 0x250   :  { %v5303_v63 = vpop.f32.mrf.mxu0 }
 0x256   :  { %v5305_v12 = vpop.f32.mrf.mxu0 }
 0x258   :  { %v5307_v40 = vpop.f32.mrf.mxu0 }
 0x25a   :  { %v5309_v60 = vpop.f32.mrf.mxu0 }
 0x25c   :  { %v5311_v30 = vpop.f32.mrf.mxu0 }
 0x260   :  { %v5313_v28 = vpop.f32.mrf.mxu0 }
 0x262   :  { %v5315_v1 = vpop.f32.mrf.mxu0 }
 0x264   :  { %v5317_v33 = vpop.f32.mrf.mxu0 }
 0x266   :  { %v5319_v3 = vpop.f32.mrf.mxu0 }
 0x26e   :  { %v5321_v37 = vpop.f32.mrf.mxu0 }
 0x270   :  { %v5323_v29 = vpop.f32.mrf.mxu0 }
 0x272   :  { %v5325_v38 = vpop.f32.mrf.mxu0 }
 0x274   :  { %v5327_v0 = vpop.f32.mrf.mxu0 }
 0x27b   :  { %v5329_v54 = vpop.f32.mrf.mxu0 }
 0x27d   :  { %v5331_v58 = vpop.f32.mrf.mxu0 }
 0x27f   :  { %v2887_v16 = vpop.f32.mrf.mxu0 }
 0x281   :  { %v2889_v31 = vpop.f32.mrf.mxu0 }
 0x284   :  { %v5333_v17 = vpop.f32.mrf.mxu0 }
 0x286   :  { %v5335_v19 = vpop.f32.mrf.mxu0 }
 0x288   :  { %v5337_v62 = vpop.f32.mrf.mxu0 }
 0x28a   :  { %v5339_v26 = vpop.f32.mrf.mxu0 }
 0x28e   :  { %v5341_v9 = vpop.f32.mrf.mxu0 }
 0x290   :  { %v5343_v13 = vpop.f32.mrf.mxu0 }
 0x292   :  { %v5345_v14 = vpop.f32.mrf.mxu0 }
 0x293   :  { %5899 = vst [vmem:[#allocation17_spill] sm:$0xff] %v5345_v14 }
 0x294   :  { %v5347_v41 = vpop.f32.mrf.mxu0 }
 0x295   :  { %5900 = vst [vmem:[#allocation18_spill] sm:$0xff] %v5347_v41 }
 0x296   :  { %v5349_v7 = vpop.f32.mrf.mxu1  ;;  %v5351_v18 = vpop.f32.mrf.mxu0 }
 0x298   :  { %v5353_v10 = vpop.f32.mrf.mxu1  ;;  %v5355_v49 = vpop.f32.mrf.mxu0 }
 0x29a   :  { %v5357_v36 = vpop.f32.mrf.mxu1  ;;  %v5359_v8 = vpop.f32.mrf.mxu0 }
 0x29c   :  { %v5361_v52 = vpop.f32.mrf.mxu1  ;;  %v5365_v51 = vpop.f32.mrf.mxu0 }
 0x29e   :  { %v5363_v25 = vpop.f32.mrf.mxu1  ;;  %v5371_v22 = vpop.f32.mrf.mxu0 }
 0x2a0   :  { %v5367_v53 = vpop.f32.mrf.mxu1  ;;  %v5377_v45 = vpop.f32.mrf.mxu0 }
 0x2a1   :  { %5902 = vst [vmem:[#allocation20_spill] sm:$0xff] %v5377_v45 }
 0x2a2   :  { %v5369_v44 = vpop.f32.mrf.mxu1  ;;  %v5383_v57 = vpop.f32.mrf.mxu0 }
 0x2a3   :  { %5905 = vst [vmem:[#allocation23_spill] sm:$0xff] %v5383_v57 }
 0x2a4   :  { %v5373_v11 = vpop.f32.mrf.mxu1  ;;  %v5389_v27 = vpop.f32.mrf.mxu0 }
 0x2a5   :  { %5908 = vst [vmem:[#allocation26_spill] sm:$0xff] %v5389_v27 }
 0x2a6   :  { %v5375_v23 = vpop.f32.mrf.mxu1  ;;  %v5395_v43 = vpop.f32.mrf.mxu0 }
 0x2a7   :  { %5901 = vst [vmem:[#allocation19_spill] sm:$0xff] %v5375_v23  ;;  %5911 = vst [vmem:[#allocation16_spill] sm:$0xff] %v5395_v43 }
 0x2a8   :  { %v5379_v46 = vpop.f32.mrf.mxu1  ;;  %v5401_v48 = vpop.f32.mrf.mxu0 }
 0x2a9   :  { %5903 = vst [vmem:[#allocation21_spill] sm:$0xff] %v5379_v46  ;;  %5914 = vst [vmem:[#allocation29_spill] sm:$0xff] %v5401_v48 }
 0x2aa   :  { %v5381_v47 = vpop.f32.mrf.mxu1  ;;  %v5407_v14 = vpop.f32.mrf.mxu0 }
 0x2ab   :  { %5904 = vst [vmem:[#allocation22_spill] sm:$0xff] %v5381_v47  ;;  %5917 = vst [vmem:[#allocation32_spill] sm:$0xff] %v5407_v14  ;;  %v3315_v14 = vld [vmem:[%s5845_s7] sm:$0xf] }
 0x2ac   :  { %v5385_v56 = vpop.f32.mrf.mxu1 }
 0x2ad   :  { %5906 = vst [vmem:[#allocation24_spill] sm:$0xff] %v5385_v56 }
 0x2ae   :  { %v5387_v55 = vpop.f32.mrf.mxu1 }
 0x2af   :  { %5907 = vst [vmem:[#allocation25_spill] sm:$0xff] %v5387_v55  ;;  %v2137_v55 = vld [vmem:[%s5844_s6] sm:$0xf]  ;;  %s4490_s6 = smov [#allocation8]  }
 0x2b0   :  { %v5391_v42 = vpop.f32.mrf.mxu1  ;;  %s3706_s7 = sshll.u32 %s4490_s6, 4  ;;  %s3707_s7 = int_to_ptr.vmem [resolvable:$true] %s3706_s7 }
 0x2b1   :  { %5909 = vst [vmem:[#allocation13_spill] sm:$0xff] %v5391_v42  ;;  %s4458_s13 = scalar_lea.vmem %s3707_s7, 16  ;;  %s4462_s14 = scalar_lea.vmem %s3707_s7, 32 }
 0x2b2   :  { %v5393_v5 = vpop.f32.mrf.mxu1  ;;  %p4459_p10 = scmp.ne.s32.totalorder %s3707_s7, %s4458_s13  ;;  %p4463_p11 = scmp.lt.s32.totalorder %s3707_s7, %s3707_s7 }
 0x2b3   :  { %5910 = vst [vmem:[#allocation14_spill] sm:$0xff] %v5393_v5  ;;  %p4464_p12 = scmp.lt.s32.totalorder %s4462_s14, %s4458_s13 }
 0x2b4   :  { %v5397_v15 = vpop.f32.mrf.mxu1 }
 0x2b5   :  { %5912 = vst [vmem:[#allocation27_spill] sm:$0xff] %v5397_v15  ;;  %v5417_v15 = vrot.slane %v2137_v55, %v5896_v39  ;;  %p4465_p13 = por %p4464_p12, %p4463_p11 }
 0x2b6   :  { %v5399_v34 = vpop.f32.mrf.mxu1 }
 0x2b7   :  { %5913 = vst [vmem:[#allocation28_spill] sm:$0xff] %v5399_v34  ;;  %v5419_v34 = vpop.f32.mrf.mxu0  ;;  %p4466_p0 = pnand %p4465_p13, %p4459_p10 }
 0x2b8   :  { %v5403_v6 = vpop.f32.mrf.mxu1  ;;  %5920 = vst [vmem:[#allocation35_spill] sm:$0xff] %v5419_v34  ;;  %v5434_v34 = vrot.slane %v3315_v14, %v5896_v39  ;;  %v5450_v39 = vrot.slane %v2137_v55, %v5898_v59 }
 0x2b9   :  { %5915 = vst [vmem:[#allocation30_spill] sm:$0xff] %v5403_v6  ;;  %v5424_v6 = vrot.slane %v2137_v55, %v5895_v35 }
 0x2ba   :  { %v5405_v41 = vpop.f32.mrf.mxu1 }
 0x2bb   :  { %5916 = vst [vmem:[#allocation31_spill] sm:$0xff] %v5405_v41  ;;  %v2888_v41 = vadd.f32 %v2887_v16, %v5417_v15  ;;  %v5439_v16 = vrot.slane %v3315_v14, %v5895_v35  ;;  %v2834_v35 = vadd.f32 %v5289_v4, %v5417_v15  ;;  %v2846_v4 = vadd.f32 %v5299_v21, %v5424_v6 }
 0x2bc   :  { %v5412_v42 = vpop.f32.mrf.mxu1 }
 0x2bd   :  { %5918 = vst [vmem:[#allocation33_spill] sm:$0xff] %v5412_v42  ;;  %v2890_v42 = vadd.f32 %v2889_v31, %v5424_v6  ;;  %v2947_v21 = vadd.f32 %v5349_v7, %v2834_v35  ;;  %v5508_v7 = vadd.f32 %v5313_v28, %v5417_v15 }
 0x2be   :  { %v5414_v5 = vpop.f32.mrf.mxu1 }
 0x2bf   :  { %5919 = vst [vmem:[#allocation34_spill] sm:$0xff] %v5414_v5  ;;  %v5431_v5 = vpop.f32.mrf.mxu0 }
 0x2c0   :  { %v5421_v47 = vpop.f32.mrf.mxu1 }
 0x2c1   :  { %5921 = vst [vmem:[#allocation36_spill] sm:$0xff] %v5421_v47  ;;  %v5441_v57 = vpop.f32.mrf.mxu0 }
 0x2c2   :  { %v3000_v48 = vpop.f32.mrf.mxu1 }
 0x2c3   :  { %v3001_v43 = vadd.f32 %v3000_v48, %v2888_v41 }
 0x2c4   :  { %v3002_v56 = vpop.f32.mrf.mxu1 }
 0x2c5   :  { %v3295_v47 = vmax.f32 %v3001_v43, 0.0  ;;  %v3003_v23 = vadd.f32 %v3002_v56, %v2890_v42  ;;  %v5452_v56 = vpop.f32.mrf.mxu0 }
 0x2c6   :  { %v5436_v27 = vpop.f32.mrf.mxu1 }
 0x2c7   :  { %v3381_v46 = vmul.f32 %v5434_v34, %v3295_v47  ;;  %v3296_v45 = vmax.f32 %v3003_v23, 0.0  ;;  %v2836_v47 = vadd.f32 %v5291_v50, %v5424_v6  ;;  %v2838_v23 = vadd.f32 %v5293_v32, %v5417_v15 }
 0x2c8   :  { %v5444_v31 = vpop.f32.mrf.mxu1  ;;  %v2848_v50 = vadd.f32 %v5301_v61, %v5417_v15  ;;  %v2850_v32 = vadd.f32 %v5303_v63, %v5424_v6  ;;  %v5490_v61 = vpop.f32.mrf.mxu0  ;;  %v5493_v63 = vrot.slane %v3315_v14, %v5898_v59 }
 0x2c9   :  { %v3382_v41 = vmul.f32 %v5439_v16, %v3296_v45  ;;  %v5463_v45 = vrot.slane %v2137_v55, %v5897_v24  ;;  %v5479_v55 = vadd.f32 %v5305_v12, %v5417_v15  ;;  %v5496_v12 = vrot.slane %v3315_v14, %v5897_v24 }
 0x2ca   :  { %v5447_v48 = vpop.f32.mrf.mxu1  ;;  %v5518_v24 = vadd.f32 %v5317_v33, %v5417_v15  ;;  %v2951_v28 = vadd.f32 %v5357_v36, %v2838_v23  ;;  %v5535_v14 = vadd.f32 %v5325_v38, %v5417_v15  ;;  %v3251_v36 = vmax.f32 %v2947_v21, 0.0 }
 0x2cb   :  { %5922 = vst [vmem:[#allocation37_spill] sm:$0xff] %v5447_v48  ;;  %v5454_v42 = vadd.f32 %v3382_v41, %v3381_v46  ;;  %v2840_v48 = vadd.f32 %v5295_v2, %v5424_v6  ;;  %v2844_v46 = vadd.f32 %v5297_v20, %v5417_v15  ;;  %v5483_v41 = vadd.f32 %v5307_v40, %v5424_v6 }
 0x2cc   :  { %v5465_v43 = vpop.f32.mrf.mxu1  ;;  %v2949_v2 = vadd.f32 %v5353_v10, %v2836_v47  ;;  %v5500_v40 = vadd.f32 %v5309_v60, %v5417_v15  ;;  %v5504_v10 = vadd.f32 %v5311_v30, %v5424_v6  ;;  %v5522_v60 = vadd.f32 %v5319_v3, %v5424_v6  ;;  %v5548_v47 = vpop.f32.mrf.mxu0 }
 0x2cd   :  { %5923 = vst [vmem:[#allocation38_spill] sm:$0xff] %v5454_v42  ;;  %v2953_v42 = vadd.f32 %v5361_v52, %v2840_v48  ;;  %v5512_v52 = vadd.f32 %v5315_v1, %v5424_v6  ;;  %v5526_v30 = vadd.f32 %v5321_v37, %v5417_v15  ;;  %v5531_v1 = vadd.f32 %v5323_v29, %v5424_v6 }
 0x2ce   :  { %v5486_v20 = vpop.f32.mrf.mxu1  ;;  %v3252_v33 = vmax.f32 %v2949_v2, 0.0  ;;  %v2959_v48 = vadd.f32 %v5367_v53, %v2846_v4  ;;  %v5542_v3 = vadd.f32 %v5327_v0, %v5424_v6  ;;  %v5546_v37 = vadd.f32 %v5329_v54, %v5417_v15 }
 0x2cf   :  { %5924 = vst [vmem:[#allocation39_spill] sm:$0xff] %v5486_v20  ;;  %v3256_v29 = vmax.f32 %v2953_v42, 0.0  ;;  %v5552_v38 = vadd.f32 %v5331_v58, %v5424_v6  ;;  %v5556_v53 = vadd.f32 %v5333_v17, %v5417_v15  ;;  %v5560_v0 = vadd.f32 %v5335_v19, %v5424_v6 }
 0x2d0   :  { %v5514_v59 = vpop.f32.mrf.mxu1  ;;  %v2957_v23 = vadd.f32 %v5363_v25, %v2844_v46  ;;  %v5567_v42 = vadd.f32 %v5337_v62, %v5417_v15  ;;  %v5571_v58 = vadd.f32 %v5339_v26, %v5424_v6  ;;  %v3060_v17 = vadd.f32 %v5351_v18, %v5450_v39 }
 0x2d1   :  { %5925 = vst [vmem:[#allocation40_spill] sm:$0xff] %v5514_v59  ;;  %v3255_v4 = vmax.f32 %v2951_v28, 0.0  ;;  %v5577_v19 = vadd.f32 %v5341_v9, %v5417_v15  ;;  %v5581_v25 = vadd.f32 %v5343_v13, %v5424_v6  ;;  %v3338_v46 = vmul.f32 %v5439_v16, %v3252_v33  ;;  %v5588_v28 = vpop.f32.mrf.mxu0 }
 0x2d2   :  { %v5538_v35 = vpop.f32.mrf.mxu1  ;;  %5928 = vst [vmem:[#allocation43_spill] sm:$0xff] %v5567_v42  ;;  %v3260_v62 = vmax.f32 %v2959_v48, 0.0  ;;  %v3337_v21 = vmul.f32 %v5434_v34, %v3251_v36  ;;  %v3062_v26 = vadd.f32 %v5355_v49, %v5463_v45  ;;  %v3342_v18 = vmul.f32 %v5439_v16, %v3256_v29 }
 0x2d3   :  { %5926 = vst [vmem:[#allocation41_spill] sm:$0xff] %v5538_v35  ;;  %5929 = vst [vmem:[#allocation44_spill] sm:$0xff] %v5577_v19  ;;  %v3064_v9 = vadd.f32 %v5359_v8, %v5450_v39  ;;  %v2961_v13 = vadd.f32 %v5369_v44, %v2848_v50  ;;  %v2963_v33 = vadd.f32 %v5373_v11, %v2850_v32  ;;  %v5931_v8 = vld [vmem:[#allocation20_spill] sm:$0xff]  ;;  %v5602_v11 = vpop.f32.mrf.mxu0 }
 0x2d4   :  { %v5563_v54 = vpop.f32.mrf.mxu1  ;;  %5930 = vst [vmem:[#allocation45_spill] sm:$0xff] %v5581_v25  ;;  %v3341_v20 = vmul.f32 %v5434_v34, %v3255_v4  ;;  %v3066_v36 = vadd.f32 %v5365_v51, %v5463_v45  ;;  %v3401_v29 = vadd.f32 %v3338_v46, %v3337_v21  ;;  %v5932_v21 = vld [vmem:[#allocation21_spill] sm:$0xff] }
 0x2d5   :  { %5927 = vst [vmem:[#allocation42_spill] sm:$0xff] %v5563_v54  ;;  %v3259_v54 = vmax.f32 %v2957_v23, 0.0  ;;  %v3072_v23 = vadd.f32 %v5931_v8, %v5463_v45  ;;  %v3264_v46 = vmax.f32 %v2963_v33, 0.0 }
 0x2d6   :  { %v3172_v2 = vpop.f32.mrf.mxu1  ;;  %v3406_v50 = vadd.f32 %v3342_v18, %v3341_v20  ;;  %v5933_v18 = vld [vmem:[#allocation23_spill] sm:$0xff] }
 0x2d7   :  { %v3173_v35 = vadd.f32 %v3172_v2, %v3060_v17  ;;  %v3070_v17 = vadd.f32 %v5371_v22, %v5450_v39  ;;  %v3346_v2 = vmul.f32 %v5439_v16, %v3260_v62  ;;  %v3345_v51 = vmul.f32 %v5434_v34, %v3259_v54  ;;  %v5935_v54 = vld [vmem:[#allocation19_spill] sm:$0xff] }
 0x2d8   :  { %v3174_v48 = vpop.f32.mrf.mxu1  ;;  %v2969_v22 = vadd.f32 %v5932_v21, %v5483_v41  ;;  %v3074_v42 = vadd.f32 %v5933_v18, %v5450_v39 }
 0x2d9   :  { %v3253_v49 = vmax.f32 %v3173_v35, 0.0  ;;  %v3175_v19 = vadd.f32 %v3174_v48, %v3062_v26  ;;  %v3263_v35 = vmax.f32 %v2961_v13, 0.0  ;;  %v3411_v20 = vadd.f32 %v3346_v2, %v3345_v51 }
 0x2da   :  { %v3176_v44 = vpop.f32.mrf.mxu1  ;;  %v2967_v13 = vadd.f32 %v5935_v54, %v5479_v55  ;;  %v3268_v2 = vmax.f32 %v2969_v22, 0.0 }
 0x2db   :  { %v3339_v32 = vmul.f32 %v5493_v63, %v3253_v49  ;;  %v3254_v4 = vmax.f32 %v3175_v19, 0.0  ;;  %v3177_v59 = vadd.f32 %v3176_v44, %v3064_v9  ;;  %v5934_v19 = vld [vmem:[#allocation26_spill] sm:$0xff]  ;;  %v5615_v49 = vpop.f32.mrf.mxu0 }
 0x2dc   :  { %v3178_v26 = vpop.f32.mrf.mxu1  ;;  %v3076_v9 = vadd.f32 %v5934_v19, %v5463_v45  ;;  %v3267_v54 = vmax.f32 %v2967_v13, 0.0 }
 0x2dd   :  { %v3340_v62 = vmul.f32 %v5496_v12, %v3254_v4  ;;  %v3257_v48 = vmax.f32 %v3177_v59, 0.0  ;;  %v3179_v8 = vadd.f32 %v3178_v26, %v3066_v36  ;;  %v3402_v25 = vadd.f32 %v3401_v29, %v3339_v32  ;;  %v5936_v32 = vld [vmem:[#allocation24_spill] sm:$0xff] }
 0x2de   :  { %v3182_v33 = vpop.f32.mrf.mxu1  ;;  %v3349_v36 = vmul.f32 %v5434_v34, %v3263_v35  ;;  %v3350_v29 = vmul.f32 %v5439_v16, %v3264_v46  ;;  %v2973_v51 = vadd.f32 %v5936_v32, %v5504_v10  ;;  %v5939_v46 = vld [vmem:[#allocation22_spill] sm:$0xff] }
 0x2df   :  { %v3343_v41 = vmul.f32 %v5493_v63, %v3257_v48  ;;  %v3258_v44 = vmax.f32 %v3179_v8, 0.0  ;;  %v3183_v4 = vadd.f32 %v3182_v33, %v3070_v17  ;;  %v3403_v59 = vadd.f32 %v3402_v25, %v3340_v62  ;;  %v5937_v48 = vld [vmem:[#allocation16_spill] sm:$0xff]  ;;  %v5938_v25 = vld [vmem:[#allocation29_spill] sm:$0xff]  ;;  %v5629_v8 = vpop.f32.mrf.mxu0 }
 0x2e0   :  { %v3184_v21 = vpop.f32.mrf.mxu1  ;;  %v3080_v17 = vadd.f32 %v5937_v48, %v5450_v39  ;;  %v3082_v35 = vadd.f32 %v5938_v25, %v5463_v45  ;;  %v2971_v22 = vadd.f32 %v5939_v46, %v5500_v40  ;;  %v3272_v13 = vmax.f32 %v2973_v51, 0.0 }
 0x2e1   :  { %v3344_v26 = vmul.f32 %v5496_v12, %v3258_v44  ;;  %v3261_v55 = vmax.f32 %v3183_v4, 0.0  ;;  %v3185_v18 = vadd.f32 %v3184_v21, %v3072_v23  ;;  %3404 = vadd.xlane.f32.xlu1 %v3403_v59  ;;  %v3407_v19 = vadd.f32 %v3406_v50, %v3343_v41  ;;  %v5940_v41 = vld [vmem:[#allocation13_spill] sm:$0xff]  ;;  %v5641_v51 = vpop.f32.mrf.mxu0 }
 0x2e2   :  { %v3186_v62 = vpop.f32.mrf.mxu1  ;;  %v3416_v4 = vadd.f32 %v3350_v29, %v3349_v36  ;;  %v3354_v50 = vmul.f32 %v5439_v16, %v3268_v2  ;;  %v2979_v59 = vadd.f32 %v5940_v41, %v5512_v52  ;;  %v3353_v46 = vmul.f32 %v5434_v34, %v3267_v54  ;;  %v5942_v36 = vld [vmem:[#allocation25_spill] sm:$0xff]  ;;  %v5943_v54 = vld [vmem:[#allocation35_spill] sm:$0xff] }
 0x2e3   :  { %v3347_v10 = vmul.f32 %v5493_v63, %v3261_v55  ;;  %v3262_v33 = vmax.f32 %v3185_v18, 0.0  ;;  %v3187_v44 = vadd.f32 %v3186_v62, %v3074_v42  ;;  %v3408_v23 = vadd.f32 %v3407_v19, %v3344_v26  ;;  %v5941_v42 = vld [vmem:[#allocation32_spill] sm:$0xff] }
 0x2e4   :  { %v3188_v32 = vpop.f32.mrf.mxu1  ;;  %v3271_v55 = vmax.f32 %v2971_v22, 0.0  ;;  %v3084_v26 = vadd.f32 %v5941_v42, %v5450_v39  ;;  %v2977_v29 = vadd.f32 %v5942_v36, %v5508_v7  ;;  %v3086_v22 = vadd.f32 %v5943_v54, %v5463_v45 }
 0x2e5   :  { %v3348_v21 = vmul.f32 %v5496_v12, %v3262_v33  ;;  %v3265_v48 = vmax.f32 %v3187_v44, 0.0  ;;  %v3189_v40 = vadd.f32 %v3188_v32, %v3076_v9  ;;  %3409 = vadd.xlane.f32.xlu0 %v3408_v23  ;;  %v3412_v25 = vadd.f32 %v3411_v20, %v3347_v10 }
 0x2e6   :  { %v3192_v2 = vpop.f32.mrf.mxu1  ;;  %v3421_v9 = vadd.f32 %v3354_v50, %v3353_v46  ;;  %v3358_v20 = vmul.f32 %v5439_v16, %v3272_v13  ;;  %v3276_v10 = vmax.f32 %v2979_v59, 0.0  ;;  %v3357_v32 = vmul.f32 %v5434_v34, %v3271_v55  ;;  %v5945_v50 = vld [vmem:[#allocation27_spill] sm:$0xff] }
 0x2e7   :  { %v3351_v52 = vmul.f32 %v5493_v63, %v3265_v48  ;;  %v3266_v18 = vmax.f32 %v3189_v40, 0.0  ;;  %v3193_v19 = vadd.f32 %v3192_v2, %v3080_v17  ;;  %v3413_v62 = vadd.f32 %v3412_v25, %v3348_v21  ;;  %v5944_v17 = vld [vmem:[#allocation14_spill] sm:$0xff]  ;;  %v5653_v25 = vpop.f32.mrf.mxu0 }
 0x2e8   :  { %v3194_v33 = vpop.f32.mrf.mxu1  ;;  %v3275_v48 = vmax.f32 %v2977_v29, 0.0  ;;  %v2981_v21 = vadd.f32 %v5944_v17, %v5518_v24  ;;  %v2983_v13 = vadd.f32 %v5945_v50, %v5522_v60  ;;  %v3362_v55 = vmul.f32 %v5439_v16, %v3276_v10 }
 0x2e9   :  { %v3352_v44 = vmul.f32 %v5496_v12, %v3266_v18  ;;  %v3269_v23 = vmax.f32 %v3193_v19, 0.0  ;;  %v3195_v7 = vadd.f32 %v3194_v33, %v3082_v35  ;;  %3414 = vadd.xlane.f32.xlu0 %v3413_v62  ;;  %v3417_v41 = vadd.f32 %v3416_v4, %v3351_v52  ;;  %v5665_v33 = vpop.f32.mrf.mxu0 }
 0x2ea   :  { %v3196_v40 = vpop.f32.mrf.mxu1  ;;  %v3426_v35 = vadd.f32 %v3358_v20, %v3357_v32  ;;  %v3090_v4 = vadd.f32 %v5431_v5, %v5450_v39  ;;  %v3092_v24 = vadd.f32 %v5441_v57, %v5463_v45  ;;  %v3361_v19 = vmul.f32 %v5434_v34, %v3275_v48  ;;  %v5946_v20 = vld [vmem:[#allocation30_spill] sm:$0xff] }
 0x2eb   :  { %v3355_v59 = vmul.f32 %v5493_v63, %v3269_v23  ;;  %v3270_v46 = vmax.f32 %v3195_v7, 0.0  ;;  %v3197_v42 = vadd.f32 %v3196_v40, %v3084_v26  ;;  %v3418_v36 = vadd.f32 %v3417_v41, %v3352_v44  ;;  %v5947_v41 = vld [vmem:[#allocation28_spill] sm:$0xff] }
 0x2ec   :  { %v3198_v29 = vpop.f32.mrf.mxu1  ;;  %v3279_v26 = vmax.f32 %v2981_v21, 0.0  ;;  %v3280_v62 = vmax.f32 %v2983_v13, 0.0  ;;  %v2989_v54 = vadd.f32 %v5946_v20, %v5531_v1  ;;  %v3431_v7 = vadd.f32 %v3362_v55, %v3361_v19 }
 0x2ed   :  { %v3356_v60 = vmul.f32 %v5496_v12, %v3270_v46  ;;  %v3273_v2 = vmax.f32 %v3197_v42, 0.0  ;;  %v3199_v52 = vadd.f32 %v3198_v29, %v3086_v22  ;;  %3419 = vadd.xlane.f32.xlu1 %v3418_v36  ;;  %v3422_v18 = vadd.f32 %v3421_v9, %v3355_v59 }
 0x2ee   :  { %v3202_v5 = vpop.f32.mrf.mxu1  ;;  %v3094_v22 = vadd.f32 %v5452_v56, %v5450_v39  ;;  %v3096_v9 = vadd.f32 %v5490_v61, %v5463_v45  ;;  %v2987_v32 = vadd.f32 %v5947_v41, %v5526_v30  ;;  %v3365_v13 = vmul.f32 %v5434_v34, %v3279_v26  ;;  %v5948_v56 = vld [vmem:[#allocation33_spill] sm:$0xff]  ;;  %v5679_v61 = vpop.f32.mrf.mxu0  ;;  %v5951_v41 = vld [vmem:[#allocation34_spill] sm:$0xff] }
 0x2ef   :  { %v3359_v10 = vmul.f32 %v5493_v63, %v3273_v2  ;;  %v3274_v57 = vmax.f32 %v3199_v52, 0.0  ;;  %v3203_v44 = vadd.f32 %v3202_v5, %v3090_v4  ;;  %v3423_v23 = vadd.f32 %v3422_v18, %v3356_v60  ;;  %v5949_v60 = vld [vmem:[#allocation31_spill] sm:$0xff]  ;;  %v5950_v5 = vld [vmem:[#allocation36_spill] sm:$0xff] }
 0x2f0   :  { %v3204_v48 = vpop.f32.mrf.mxu1  ;;  %v3366_v40 = vmul.f32 %v5439_v16, %v3280_v62  ;;  %v3284_v59 = vmax.f32 %v2989_v54, 0.0  ;;  %v2993_v46 = vadd.f32 %v5948_v56, %v5542_v3  ;;  %v3283_v29 = vmax.f32 %v2987_v32, 0.0 }
 0x2f1   :  { %v3360_v1 = vmul.f32 %v5496_v12, %v3274_v57  ;;  %v3277_v17 = vmax.f32 %v3203_v44, 0.0  ;;  %v3205_v21 = vadd.f32 %v3204_v48, %v3092_v24  ;;  %3424 = vadd.xlane.f32.xlu0 %v3423_v23  ;;  %v3427_v50 = vadd.f32 %v3426_v35, %v3359_v10  ;;  %v5692_v57 = vpop.f32.mrf.mxu0 }
 0x2f2   :  { %v3206_v42 = vpop.f32.mrf.mxu1  ;;  %v3100_v35 = vadd.f32 %v5548_v47, %v5450_v39  ;;  %v3102_v24 = vadd.f32 %v5588_v28, %v5463_v45  ;;  %v2991_v2 = vadd.f32 %v5949_v60, %v5535_v14  ;;  %v3436_v62 = vadd.f32 %v3366_v40, %v3365_v13 }
 0x2f3   :  { %v3363_v30 = vmul.f32 %v5493_v63, %v3277_v17  ;;  %v3278_v36 = vmax.f32 %v3205_v21, 0.0  ;;  %v3207_v4 = vadd.f32 %v3206_v42, %v3094_v22  ;;  %v3428_v55 = vadd.f32 %v3427_v50, %v3360_v1 }
 0x2f4   :  { %v3208_v52 = vpop.f32.mrf.mxu1  ;;  %v3370_v20 = vmul.f32 %v5439_v16, %v3284_v59  ;;  %v3288_v54 = vmax.f32 %v2993_v46, 0.0  ;;  %v2999_v47 = vadd.f32 %v5950_v5, %v5552_v38  ;;  %v3369_v22 = vmul.f32 %v5434_v34, %v3283_v29  ;;  %v5704_v46 = vpop.f32.mrf.mxu0  ;;  %v5952_v5 = vld [vmem:[#allocation17_spill] sm:$0xff] }
 0x2f5   :  { %v3364_v3 = vmul.f32 %v5496_v12, %v3278_v36  ;;  %v3281_v18 = vmax.f32 %v3207_v4, 0.0  ;;  %v3209_v19 = vadd.f32 %v3208_v52, %v3096_v9  ;;  %3429 = vadd.xlane.f32.xlu1 %v3428_v55  ;;  %v3432_v26 = vadd.f32 %v3431_v7, %v3363_v30 }
 0x2f6   :  { %v3212_v10 = vpop.f32.mrf.mxu1  ;;  %v3287_v9 = vmax.f32 %v2991_v2, 0.0  ;;  %v3104_v7 = vadd.f32 %v5602_v11, %v5450_v39  ;;  %v2997_v32 = vadd.f32 %v5951_v41, %v5546_v37  ;;  %v3441_v50 = vadd.f32 %v3370_v20, %v3369_v22 }
 0x2f7   :  { %v3367_v28 = vmul.f32 %v5493_v63, %v3281_v18  ;;  %v3282_v14 = vmax.f32 %v3209_v19, 0.0  ;;  %v3213_v44 = vadd.f32 %v3212_v10, %v3100_v35  ;;  %v3433_v23 = vadd.f32 %v3432_v26, %v3364_v3  ;;  %v3125_v26 = vpop.f32.mrf.mxu0 }
 0x2f8   :  { %v3214_v48 = vpop.f32.mrf.mxu1  ;;  %v3374_v13 = vmul.f32 %v5439_v16, %v3288_v54  ;;  %v3106_v40 = vadd.f32 %v5615_v49, %v5463_v45  ;;  %v3292_v59 = vmax.f32 %v2999_v47, 0.0  ;;  %v3373_v36 = vmul.f32 %v5434_v34, %v3287_v9 }
 0x2f9   :  { %v3368_v38 = vmul.f32 %v5496_v12, %v3282_v14  ;;  %v3285_v1 = vmax.f32 %v3213_v44, 0.0  ;;  %v3215_v17 = vadd.f32 %v3214_v48, %v3102_v24  ;;  %3434 = vadd.xlane.f32.xlu0 %v3433_v23  ;;  %v3437_v21 = vadd.f32 %v3436_v62, %v3367_v28  ;;  %v3129_v41 = vpop.f32.mrf.mxu0 }
 0x2fa   :  { %v3216_v56 = vpop.f32.mrf.mxu1  ;;  %v3291_v4 = vmax.f32 %v2997_v32, 0.0  ;;  %v3110_v55 = vadd.f32 %v5629_v8, %v5450_v39  ;;  %v3112_v29 = vadd.f32 %v5641_v51, %v5463_v45  ;;  %v3446_v52 = vadd.f32 %v3374_v13, %v3373_v36  ;;  %v5954_v13 = vld [vmem:[#allocation43_spill] sm:$0xff]  ;;  %v5956_v36 = vld [vmem:[#allocation45_spill] sm:$0xff] }
 0x2fb   :  { %v3371_v11 = vmul.f32 %v5493_v63, %v3285_v1  ;;  %v3286_v37 = vmax.f32 %v3215_v17, 0.0  ;;  %v3217_v42 = vadd.f32 %v3216_v56, %v3104_v7  ;;  %v3438_v30 = vadd.f32 %v3437_v21, %v3368_v38  ;;  %v3481_v38 = vld [vmem:[#allocation2] sm:$0x1]  ;;  %v5953_v1 = vld [vmem:[#allocation18_spill] sm:$0xff] }
 0x2fc   :  { %v3218_v35 = vpop.f32.mrf.mxu1  ;;  %v3378_v3 = vmul.f32 %v5439_v16, %v3292_v59  ;;  %v3007_v18 = vadd.f32 %v5436_v27, %v5556_v53  ;;  %v3009_v19 = vadd.f32 %v5444_v31, %v5560_v0  ;;  %v5721_v47 = vadd.f32 %v5952_v5, %v5417_v15 }
 0x2fd   :  { %v3372_v49 = vmul.f32 %v5496_v12, %v3286_v37  ;;  %v3289_v24 = vmax.f32 %v3217_v42, 0.0  ;;  %v3219_v60 = vadd.f32 %v3218_v35, %v3106_v40  ;;  %3439 = vadd.xlane.f32.xlu0 %v3438_v30  ;;  %v3442_v2 = vadd.f32 %v3441_v50, %v3371_v11  ;;  %v5955_v40 = vld [vmem:[#allocation37_spill] sm:$0xff] }
 0x2fe   :  { %v3222_v8 = vpop.f32.mrf.mxu1  ;;  %v3377_v10 = vmul.f32 %v5434_v34, %v3291_v4  ;;  %v3114_v28 = vadd.f32 %v5653_v25, %v5450_v39  ;;  %v3116_v27 = vadd.f32 %v5665_v33, %v5463_v45  ;;  %v3299_v22 = vmax.f32 %v3007_v18, 0.0  ;;  %v5959_v18 = vld [vmem:[#allocation39_spill] sm:$0xff] }
 0x2ff   :  { %v3375_v51 = vmul.f32 %v5493_v63, %v3289_v24  ;;  %v3290_v62 = vmax.f32 %v3219_v60, 0.0  ;;  %v3223_v20 = vadd.f32 %v3222_v8, %v3110_v55  ;;  %v3443_v54 = vadd.f32 %v3442_v2, %v3372_v49 }
 0x300   :  { %v3224_v31 = vpop.f32.mrf.mxu1  ;;  %v3451_v23 = vadd.f32 %v3378_v3, %v3377_v10  ;;  %v3300_v9 = vmax.f32 %v3009_v19, 0.0  ;;  %v3013_v15 = vadd.f32 %v5465_v43, %v5571_v58  ;;  %v2910_v17 = vadd.f32 %v5953_v1, %v5424_v6  ;;  %v5958_v3 = vld [vmem:[#allocation44_spill] sm:$0xff] }
 0x301   :  { %v3376_v53 = vmul.f32 %v5496_v12, %v3290_v62  ;;  %v3293_v0 = vmax.f32 %v3223_v20, 0.0  ;;  %v3225_v14 = vadd.f32 %v3224_v31, %v3112_v29  ;;  %3444 = vadd.xlane.f32.xlu0 %v3443_v54  ;;  %v3447_v44 = vadd.f32 %v3446_v52, %v3375_v51  ;;  %v5960_v54 = vld [vmem:[#allocation38_spill] sm:$0xff] }
 0x302   :  { %v3226_v7 = vpop.f32.mrf.mxu1  ;;  %v3120_v21 = vadd.f32 %v5679_v61, %v5450_v39  ;;  %v3122_v50 = vadd.f32 %v5692_v57, %v5463_v45  ;;  %v3011_v43 = vadd.f32 %v5955_v40, %v5954_v13  ;;  %v3385_v42 = vmul.f32 %v5434_v34, %v3299_v22  ;;  %v5957_v61 = vld [vmem:[#allocation40_spill] sm:$0xff]  ;;  %v3131_v57 = vpop.f32.mrf.mxu0  ;;  %v5961_v31 = vld [vmem:[#allocation42_spill] sm:$0xff] }
 0x303   :  { %v3379_v25 = vmul.f32 %v5493_v63, %v3293_v0  ;;  %v3294_v32 = vmax.f32 %v3225_v14, 0.0  ;;  %v3227_v48 = vadd.f32 %v3226_v7, %v3114_v28  ;;  %v3448_v33 = vadd.f32 %v3447_v44, %v3376_v53  ;;  %v5962_v7 = vld [vmem:[#allocation41_spill] sm:$0xff] }
 0x304   :  { %v3228_v58 = vpop.f32.mrf.mxu1  ;;  %v3386_v6 = vmul.f32 %v5439_v16, %v3300_v9  ;;  %v3304_v30 = vmax.f32 %v3013_v15, 0.0  ;;  %v3019_v4 = vadd.f32 %v5957_v61, %v5956_v36  ;;  %v3303_v60 = vmax.f32 %v3011_v43, 0.0  ;;  %v3133_v0 = vpop.f32.mrf.mxu0 }
 0x305   :  { %v3380_v59 = vmul.f32 %v5496_v12, %v3294_v32  ;;  %v3297_v56 = vmax.f32 %v3227_v48, 0.0  ;;  %v3229_v11 = vadd.f32 %v3228_v58, %v3116_v27  ;;  %3449 = vadd.xlane.f32.xlu0 %v3448_v33  ;;  %v3452_v37 = vadd.f32 %v3451_v23, %v3379_v25 }
 0x306   :  { %v3232_v55 = vpop.f32.mrf.mxu1  ;;  %3484 = vperm.xlu1 %4000, %v3481_v38   ;;  %v3124_v2 = vadd.f32 %v5704_v46, %v5450_v39  ;;  %v3126_v52 = vadd.f32 %v3125_v26, %v5463_v45  ;;  %v3017_v19 = vadd.f32 %v5959_v18, %v5958_v3  ;;  %v3461_v10 = vadd.f32 %v3386_v6, %v3385_v42  ;;  %v3135_v43 = vpop.f32.mrf.mxu0 }
 0x307   :  { %v3383_v29 = vmul.f32 %v5493_v63, %v3297_v56  ;;  %v3298_v35 = vmax.f32 %v3229_v11, 0.0  ;;  %v3233_v49 = vadd.f32 %v3232_v55, %v3120_v21  ;;  %v3453_v24 = vadd.f32 %v3452_v37, %v3380_v59 }
 0x308   :  { %v3234_v8 = vpop.f32.mrf.mxu1  ;;  %v3390_v28 = vmul.f32 %v5439_v16, %v3304_v30  ;;  %v3308_v27 = vmax.f32 %v3019_v4, 0.0  ;;  %v3023_v53 = vadd.f32 %v5961_v31, %v2910_v17  ;;  %v3389_v22 = vmul.f32 %v5434_v34, %v3303_v60 }
 0x309   :  { %v3384_v51 = vmul.f32 %v5496_v12, %v3298_v35  ;;  %v3301_v62 = vmax.f32 %v3233_v49, 0.0  ;;  %v3235_v20 = vadd.f32 %v3234_v8, %v3122_v50  ;;  %3454 = vadd.xlane.f32.xlu0 %v3453_v24  ;;  %v3457_v5 = vadd.f32 %v5960_v54, %v3383_v29 }
 0x30a   :  { %v3236_v46 = vpop.f32.mrf.mxu1  ;;  %v3307_v9 = vmax.f32 %v3017_v19, 0.0  ;;  %v3130_v15 = vadd.f32 %v3129_v41, %v5450_v39  ;;  %v3021_v25 = vadd.f32 %v5962_v7, %v5721_v47  ;;  %v3466_v17 = vadd.f32 %v3390_v28, %v3389_v22 }
 0x30b   :  { %v3387_v26 = vmul.f32 %v5493_v63, %v3301_v62  ;;  %v3302_v14 = vmax.f32 %v3235_v20, 0.0  ;;  %v3237_v44 = vadd.f32 %v3236_v46, %v3124_v2  ;;  %v3458_v23 = vadd.f32 %v3457_v5, %v3384_v51 }
 0x30c   :  { %v3238_v32 = vpop.f32.mrf.mxu1  ;;  %v3394_v21 = vmul.f32 %v5439_v16, %v3308_v27  ;;  %v3132_v50 = vadd.f32 %v3131_v57, %v5463_v45  ;;  %v3312_v13 = vmax.f32 %v3023_v53, 0.0  ;;  %v3393_v47 = vmul.f32 %v5434_v34, %v3307_v9 }
 0x30d   :  { %v3388_v48 = vmul.f32 %v5496_v12, %v3302_v14  ;;  %v3305_v33 = vmax.f32 %v3237_v44, 0.0  ;;  %v3239_v38 = vadd.f32 %v3238_v32, %v3126_v52  ;;  %v3462_v1 = vadd.f32 %v3461_v10, %v3387_v26 }
 0x30e   :  { %v3242_v40 = vpop.f32.mrf.mxu1  ;;  %v3311_v11 = vmax.f32 %v3021_v25, 0.0  ;;  %v3134_v37 = vadd.f32 %v3133_v0, %v5450_v39  ;;  %v3471_v4 = vadd.f32 %v3394_v21, %v3393_v47  ;;  %v3398_v55 = vmul.f32 %v5439_v16, %v3312_v13 }
 0x30f   :  { %v3391_v58 = vmul.f32 %v5493_v63, %v3305_v33  ;;  %v3306_v41 = vmax.f32 %v3239_v38, 0.0  ;;  %v3243_v59 = vadd.f32 %v3242_v40, %v3130_v15  ;;  %v3463_v56 = vadd.f32 %v3462_v1, %v3388_v48 }
 0x310   :  { %v3244_v42 = vpop.f32.mrf.mxu1  ;;  %v3136_v57 = vadd.f32 %v3135_v43, %v5463_v45  ;;  %v3397_v39 = vmul.f32 %v5434_v34, %v3311_v11  ;;  %v5964_v40 = vlaneseq }
 0x311   :  { %v3392_v6 = vmul.f32 %v5496_v12, %v3306_v41  ;;  %v3309_v30 = vmax.f32 %v3243_v59, 0.0  ;;  %v3245_v36 = vadd.f32 %v3244_v42, %v3132_v50  ;;  %3464 = vadd.xlane.f32.xlu0 %v3463_v56  ;;  %v3467_v61 = vadd.f32 %v3466_v17, %v3391_v58 }
 0x312   :  { %v3246_v29 = vpop.f32.mrf.mxu1  ;;  %v3476_v8 = vadd.f32 %v3398_v55, %v3397_v39  ;;  %v5785_v43 = vand.u32 127, %v5964_v40 }
 0x313   :  { %v3395_v35 = vmul.f32 %v5493_v63, %v3309_v30  ;;  %v3310_v49 = vmax.f32 %v3245_v36, 0.0  ;;  %v3247_v24 = vadd.f32 %v3246_v29, %v3134_v37  ;;  %v3468_v60 = vadd.f32 %v3467_v61, %v3392_v6 }
 0x314   :  { %v3248_v2 = vpop.f32.mrf.mxu1  ;;  %v3593_v42 = vadd.s32 4294967288, %v5785_v43 }
 0x315   :  { %v3396_v52 = vmul.f32 %v5496_v12, %v3310_v49  ;;  %v3313_v3 = vmax.f32 %v3247_v24, 0.0  ;;  %v3249_v18 = vadd.f32 %v3248_v2, %v3136_v57  ;;  %3469 = vadd.xlane.f32.xlu0 %v3468_v60  ;;  %v3472_v19 = vadd.f32 %v3471_v4, %v3395_v35  ;;  %v5965_v57 = vld [vmem:[#allocation12_spill] sm:$0xff] }
 0x316   :  { %v3591_v29 = vsub.s32 %v5785_v43, %v5965_v57  ;;  %v3600_v35 = vadd.s32 4294967280, %v5785_v43  ;;  %v3596_v24 = vsub.s32 %v3593_v42, %v5965_v57 }
 0x317   :  { %v3399_v16 = vmul.f32 %v5493_v63, %v3313_v3  ;;  %v3314_v51 = vmax.f32 %v3249_v18, 0.0  ;;  %v3473_v45 = vadd.f32 %v3472_v19, %v3396_v52  ;;  %v5963_v63 = vld [vmem:[#allocation15_spill] sm:$0xff] }
 0x319   :  { %v3400_v62 = vmul.f32 %v5496_v12, %v3314_v51  ;;  %3474 = vadd.xlane.f32.xlu0 %v3473_v45  ;;  %v3477_v20 = vadd.f32 %v3476_v8, %v3399_v16  ;;  %v3607_v51 = vadd.s32 4294967272, %v5785_v43 }
 0x31b   :  { %v3478_v54 = vadd.f32 %v3477_v20, %v3400_v62  ;;  %v3603_v62 = vsub.s32 %v3600_v35, %v5965_v57 }
 0x31d   :  { %3479 = vadd.xlane.f32.xlu0 %v3478_v54 }
 0x32a   :  { %3459 = vadd.xlane.f32.xlu1 %v3458_v23 }
 0x36a   :  { %v3405_v5 = vpop.xlane.xlu1 %3404 }
 0x36e   :  { %v3410_v34 = vpop.xlane.xlu0 %3409 }
 0x372   :  { %v3415_v10 = vpop.xlane.xlu0 %3414 }
 0x376   :  { %v3420_v28 = vpop.xlane.xlu1 %3419 }
 0x37a   :  { %v3425_v27 = vpop.xlane.xlu0 %3424 }
 0x37e   :  { %v3430_v31 = vpop.xlane.xlu1 %3429 }
 0x382   :  { %v3435_v53 = vpop.xlane.xlu0 %3434  ;;  %v3485_v0 = vpop.permute.xlu1 %3484 }
 0x383   :  { %v5775_v14 = vrot.slane %v3485_v0, %v5963_v63 }
 0x385   :  { %v3491_v12 = vadd.f32 %v5775_v14, %v3405_v5  ;;  %v3492_v44 = vadd.f32 %v5775_v14, %v3410_v34  ;;  %v3493_v23 = vadd.f32 %v5775_v14, %v3415_v10  ;;  %v3494_v32 = vadd.f32 %v5775_v14, %v3420_v28 }
 0x386   :  { %v3440_v46 = vpop.xlane.xlu0 %3439  ;;  %v3495_v33 = vadd.f32 %v5775_v14, %v3425_v27  ;;  %v3496_v1 = vadd.f32 %v5775_v14, %v3430_v31  ;;  %v3497_v50 = vadd.f32 %v5775_v14, %v3435_v53  ;;  %v3610_v53 = vsub.s32 %v3607_v51, %v5965_v57 }
 0x387   :  { %v3507_v9 = vmul.f32 0.5, %v3491_v12  ;;  %v3508_v15 = vmul.f32 0.5, %v3492_v44  ;;  %v3509_v25 = vmul.f32 0.5, %v3493_v23  ;;  %v3510_v38 = vmul.f32 0.5, %v3494_v32 }
 0x388   :  { %v3511_v17 = vmul.f32 0.5, %v3495_v33  ;;  %v3512_v13 = vmul.f32 0.5, %v3496_v1  ;;  %v3498_v41 = vadd.f32 %v5775_v14, %v3440_v46  ;;  %v3513_v56 = vmul.f32 0.5, %v3497_v50 }
 0x389   :  { %4386 = vtanh.f32 %v3507_v9  ;;  %v3628_v1 = vadd.s32 4294967248, %v5785_v43 }
 0x38a   :  { %v3445_v26 = vpop.xlane.xlu0 %3444  ;;  %4388 = vtanh.f32 %v3508_v15  ;;  %v3514_v36 = vmul.f32 0.5, %v3498_v41 }
 0x38b   :  { %4390 = vtanh.f32 %v3509_v25  ;;  %v3499_v47 = vadd.f32 %v5775_v14, %v3445_v26  ;;  %v3614_v26 = vadd.s32 4294967264, %v5785_v43 }
 0x38c   :  { %4392 = vtanh.f32 %v3510_v38 }
 0x38d   :  { %4394 = vtanh.f32 %v3511_v17  ;;  %v3515_v55 = vmul.f32 0.5, %v3499_v47 }
 0x38e   :  { %v3450_v22 = vpop.xlane.xlu0 %3449  ;;  %4396 = vtanh.f32 %v3512_v13 }
 0x38f   :  { %v3500_v37 = vadd.f32 %v5775_v14, %v3450_v22  ;;  %4398 = vtanh.f32 %v3513_v56 }
 0x390   :  { %4400 = vtanh.f32 %v3514_v36 }
 0x391   :  { %v3516_v49 = vmul.f32 0.5, %v3500_v37  ;;  %4402 = vtanh.f32 %v3515_v55 }
 0x392   :  { %v3455_v7 = vpop.xlane.xlu0 %3454 }
 0x393   :  { %v3501_v6 = vadd.f32 %v5775_v14, %v3455_v7  ;;  %4404 = vtanh.f32 %v3516_v49  ;;  %v3621_v7 = vadd.s32 4294967256, %v5785_v43 }
 0x395   :  { %v3517_v39 = vmul.f32 0.5, %v3501_v6  ;;  %v3624_v13 = vsub.s32 %v3621_v7, %v5965_v57 }
 0x396   :  { %v4387_v58 = vpop.eup %4386 }
 0x397   :  { %v4389_v59 = vpop.eup %4388  ;;  %v3539_v61 = vmul.f32 0.5, %v4387_v58  ;;  %4406 = vtanh.f32 %v3517_v39 }
 0x398   :  { %v4391_v30 = vpop.eup %4390  ;;  %v3540_v4 = vmul.f32 0.5, %v4389_v59  ;;  %v3635_v59 = vadd.s32 4294967240, %v5785_v43 }
 0x399   :  { %v3541_v60 = vmul.f32 0.5, %v4391_v30  ;;  %v3555_v3 = vadd.f32 0.5, %v3539_v61  ;;  %v4393_v8 = vpop.eup %4392  ;;  %v3642_v30 = vadd.s32 4294967232, %v5785_v43 }
 0x39a   :  { %v3465_v48 = vpop.xlane.xlu0 %3464  ;;  %v3556_v18 = vadd.f32 0.5, %v3540_v4  ;;  %v4395_v34 = vpop.eup %4394  ;;  %v3542_v5 = vmul.f32 0.5, %v4393_v8  ;;  %v3649_v4 = vadd.s32 4294967224, %v5785_v43  ;;  %v3638_v35 = vsub.s32 %v3635_v59, %v5965_v57 }
 0x39b   :  { %v3503_v2 = vadd.f32 %v5775_v14, %v3465_v48  ;;  %v3557_v20 = vadd.f32 0.5, %v3541_v60  ;;  %v3592_v10 = vrot.slane %v3555_v3, %v3591_v29  ;;  %v4397_v0 = vpop.eup %4396  ;;  %v3543_v63 = vmul.f32 0.5, %v4395_v34 }
 0x39c   :  { %v3597_v28 = vrot.slane %v3556_v18, %v3596_v24  ;;  %v3558_v22 = vadd.f32 0.5, %v3542_v5  ;;  %v4399_v15 = vpop.eup %4398  ;;  %v3544_v25 = vmul.f32 0.5, %v4397_v0  ;;  %v3617_v48 = vsub.s32 %v3614_v26, %v5965_v57 }
 0x39d   :  { %v3519_v54 = vmul.f32 0.5, %v3503_v2  ;;  %v3604_v12 = vrot.slane %v3557_v20, %v3603_v62  ;;  %v3559_v33 = vadd.f32 0.5, %v3543_v63  ;;  %v3545_v50 = vmul.f32 0.5, %v4399_v15 }
 0x39e   :  { %v3470_v21 = vpop.xlane.xlu0 %3469  ;;  %v3599_v23 = vsel %vm3598_vm0, %v3597_v28, %v3592_v10  ;;  %v3611_v17 = vrot.slane %v3558_v22, %v3610_v53  ;;  %v3560_v40 = vadd.f32 0.5, %v3544_v25  ;;  %v3656_v29 = vadd.s32 4294967216, %v5785_v43 }
 0x39f   :  { %v3504_v19 = vadd.f32 %v5775_v14, %v3470_v21  ;;  %4408 = vtanh.f32 %v3519_v54  ;;  %v3606_v38 = vsel %vm3605_vm1, %v3604_v12, %v3599_v23  ;;  %v4401_v21 = vpop.eup %4400  ;;  %v3618_v56 = vrot.slane %v3559_v33, %v3617_v48 }
 0x3a0   :  { %v3613_v58 = vsel %vm3612_vm2, %v3611_v17, %v3606_v38  ;;  %v3546_v37 = vmul.f32 0.5, %v4401_v21  ;;  %v3561_v42 = vadd.f32 0.5, %v3545_v50  ;;  %v3625_v61 = vrot.slane %v3560_v40, %v3624_v13 }
 0x3a1   :  { %v3520_v27 = vmul.f32 0.5, %v3504_v19  ;;  %v3620_v6 = vsel %vm3619_vm3, %v3618_v56, %v3613_v58  ;;  %v3645_v3 = vsub.s32 %v3642_v30, %v5965_v57  ;;  %v3663_v19 = vadd.s32 4294967208, %v5785_v43 }
 0x3a2   :  { %v3475_v11 = vpop.xlane.xlu0 %3474  ;;  %v3562_v60 = vadd.f32 0.5, %v3546_v37  ;;  %v3627_v39 = vsel %vm3626_vm4, %v3625_v61, %v3620_v6  ;;  %v3670_v34 = vadd.s32 4294967200, %v5785_v43  ;;  %v3677_v28 = vadd.s32 4294967192, %v5785_v43 }
 0x3a3   :  { %v3505_v16 = vadd.f32 %v5775_v14, %v3475_v11  ;;  %4410 = vtanh.f32 %v3520_v27  ;;  %v3631_v11 = vsub.s32 %v3628_v1, %v5965_v57  ;;  %v3666_v26 = vsub.s32 %v3663_v19, %v5965_v57 }
 0x3a4   :  { %v3639_v10 = vrot.slane %v3562_v60, %v3638_v35  ;;  %v3691_v63 = vadd.s32 4294967176, %v5785_v43  ;;  %v3673_v15 = vsub.s32 %v3670_v34, %v5965_v57  ;;  %v3680_v25 = vsub.s32 %v3677_v28, %v5965_v57 }
 0x3a5   :  { %v3521_v31 = vmul.f32 0.5, %v3505_v16  ;;  %v3652_v16 = vsub.s32 %v3649_v4, %v5965_v57 }
 0x3a6   :  { %v3480_v52 = vpop.xlane.xlu0 %3479 }
 0x3a7   :  { %v3506_v45 = vadd.f32 %v5775_v14, %v3480_v52  ;;  %4412 = vtanh.f32 %v3521_v31  ;;  %v3632_v52 = vrot.slane %v3561_v42, %v3631_v11  ;;  %v3684_v31 = vadd.s32 4294967184, %v5785_v43 }
 0x3a8   :  { %v3694_v43 = vsub.s32 %v3691_v63, %v5965_v57 }
 0x3a9   :  { %v3522_v46 = vmul.f32 0.5, %v3506_v45  ;;  %v3659_v45 = vsub.s32 %v3656_v29, %v5965_v57  ;;  %v3634_v20 = vsel %vm3633_vm5, %v3632_v52, %v3627_v39  ;;  %v3687_v48 = vsub.s32 %v3684_v31, %v5965_v57 }
 0x3aa   :  { %v3641_v12 = vsel %vm3640_vm6, %v3639_v10, %v3634_v20 }
 0x3ab   :  { %4414 = vtanh.f32 %v3522_v46 }
 0x3b3   :  { %v3460_v44 = vpop.xlane.xlu1 %3459 }
 0x3b4   :  { %v3502_v9 = vadd.f32 %v5775_v14, %v3460_v44  ;;  %v4403_v14 = vpop.eup %4402 }
 0x3b5   :  { %v4405_v41 = vpop.eup %4404  ;;  %v3547_v36 = vmul.f32 0.5, %v4403_v14 }
 0x3b6   :  { %v3518_v32 = vmul.f32 0.5, %v3502_v9  ;;  %v4407_v47 = vpop.eup %4406  ;;  %v3548_v55 = vmul.f32 0.5, %v4405_v41 }
 0x3b7   :  { %v3549_v49 = vmul.f32 0.5, %v4407_v47  ;;  %v4409_v24 = vpop.eup %4408  ;;  %v3563_v18 = vadd.f32 0.5, %v3547_v36 }
 0x3b8   :  { %4416 = vtanh.f32 %v3518_v32  ;;  %v4411_v2 = vpop.eup %4410  ;;  %v3564_v51 = vadd.f32 0.5, %v3548_v55  ;;  %v3551_v5 = vmul.f32 0.5, %v4409_v24 }
 0x3b9   :  { %v4413_v8 = vpop.eup %4412  ;;  %v3565_v54 = vadd.f32 0.5, %v3549_v49  ;;  %v3552_v27 = vmul.f32 0.5, %v4411_v2  ;;  %v3646_v46 = vrot.slane %v3563_v18, %v3645_v3 }
 0x3ba   :  { %v4415_v62 = vpop.eup %4414  ;;  %v3553_v0 = vmul.f32 0.5, %v4413_v8  ;;  %v3653_v44 = vrot.slane %v3564_v51, %v3652_v16  ;;  %v3567_v7 = vadd.f32 0.5, %v3551_v5 }
 0x3bb   :  { %v3554_v22 = vmul.f32 0.5, %v4415_v62  ;;  %v3660_v9 = vrot.slane %v3565_v54, %v3659_v45  ;;  %v3568_v32 = vadd.f32 0.5, %v3552_v27  ;;  %v3648_v38 = vsel %vm3647_vm7, %v3646_v46, %v3641_v12 }
 0x3bc   :  { %v3569_v1 = vadd.f32 0.5, %v3553_v0  ;;  %v3655_v17 = vsel %vm3654_vm8, %v3653_v44, %v3648_v38  ;;  %v3674_v13 = vrot.slane %v3567_v7, %v3673_v15 }
 0x3bd   :  { %v3570_v21 = vadd.f32 0.5, %v3554_v22  ;;  %v3662_v14 = vsel %vm3661_vm9, %v3660_v9, %v3655_v17  ;;  %v3681_v40 = vrot.slane %v3568_v32, %v3680_v25 }
 0x3be   :  { %v3688_v41 = vrot.slane %v3569_v1, %v3687_v48 }
 0x3bf   :  { %v3695_v47 = vrot.slane %v3570_v21, %v3694_v43 }
 0x3c5   :  { %v4417_v53 = vpop.eup %4416 }
 0x3c6   :  { %v3550_v23 = vmul.f32 0.5, %v4417_v53 }
 0x3c8   :  { %v3566_v33 = vadd.f32 0.5, %v3550_v23 }
 0x3ca   :  { %v3667_v50 = vrot.slane %v3566_v33, %v3666_v26 }
 0x3cc   :  { %v3669_v58 = vsel %vm3668_vm10, %v3667_v50, %v3662_v14 }
 0x3cd   :  { %v3676_v59 = vsel %vm3675_vm11, %v3674_v13, %v3669_v58 }
 0x3ce   :  { %v3683_v56 = vsel %vm3682_vm12, %v3681_v40, %v3676_v59 }
 0x3cf   :  { %v3690_v57 = vsel %vm3689_vm13, %v3688_v41, %v3683_v56 }
 0x3d0   :  { %v3697_v11 = vsel %vm3696_vm14, %v3695_v47, %v3690_v57 }
 0x3d1   :  { %3699 = vst [vmem:[#allocation8] sm:$0x1] %v3697_v11 }
 0x3d2   :  { %4469 = shalt.err (!%p4466_p0)
}
 0x3d3   :  { %3709 = dma.vmem_to_hbm [thread:$0]  %s3707_s7, 16, %s5847_s9, [#allocation5]  }
 0x3d4   :  { %4482 = dma.done.wait [#allocation5], 16  }
 0x3d5   :  { %4483 = vsyncadd [#allocation5], 4294967280 }
 0x3d6   :  { %3713 = vsyncpa [#allocation4], 1 }
 0x3d7   :  { %3714 = vsyncpa [#allocation7], 1 }
 0x3d8   :  { %3715 = vsyncpa [#allocation5], 1 }

</bundles_post_ra>
